<compile_context>
chip_gen: v7x
topology: tpu7x:2x2x1
jax: 0.10.0
libtpu: 0.0.40
codegen_flags: <defaults>
</compile_context>

<pallas_src>
import numpy as np
import jax
import jax.numpy as jnp
from jax.experimental import pallas as pl
from jax.experimental.pallas import tpu as pltpu

N_INPUT = 80                 # fixed by the module (n_input = 80)
DMODEL = 128                 # small dmodel for the synthetic run
C1 = 64                      # conv channel count
H2 = N_INPUT // 4            # 20 feature rows after two stride-2 convs
K1 = 128                     # conv1 contraction (9 taps * 10 cols = 90, padded)
BN_EPS = 1e-5
LEAKY_SLOPE = 0.01           # nn.LeakyReLU default negative_slope
MATMUL_DTYPE = jnp.bfloat16  # MXU input dtype (f32 accumulation)


def _leaky(v):
    return jnp.where(v >= 0, v, LEAKY_SLOPE * v)


def _round_up(n, m):
    return ((n + m - 1) // m) * m


# ---------------------------------------------------------------------------
# Single fused kernel: conv1 -> LeakyReLU -> conv2 -> LeakyReLU -> proj.
# Grid = (R tiles,) "parallel".  Per tile:
#   cols (H2, r_tile, 128) bf16  --reshape-->  (H2*r_tile, 128)
#   c1 = leaky(cols @ w1aug)            (H2*r_tile, 576)
#   c2 = leaky(c1 @ w2m + b2)           (H2*r_tile,  64)
#   out = bp + sum_h c2[h] @ wp[h]      (r_tile, 128)   (h loop unrolled)
# ---------------------------------------------------------------------------
def _fused_conv_proj_kernel(cols_ref, w1_ref, w2_ref, b2_ref, wp_ref, bp_ref,
                            out_ref):
    h2, r_tile, k1 = cols_ref.shape
    cols = cols_ref[...].reshape(h2 * r_tile, k1)          # free merge (r_tile%16==0)

    # conv1 (Cin=1, 3x3) for all 9 conv2 taps at once: block-diagonal weight,
    # bias folded into the per-tap mask column (masked taps -> exactly 0).
    c1 = jnp.dot(cols, w1_ref[...], preferred_element_type=jnp.float32)
    c1 = _leaky(c1).astype(MATMUL_DTYPE)                   # (H2*r, 576)

    # conv2 3x3 over the 9 taps == one (M, 576) @ (576, 64) matmul.
    c2 = jnp.dot(c1, w2_ref[...],
                 preferred_element_type=jnp.float32) + b2_ref[...]
    c2 = _leaky(c2).astype(MATMUL_DTYPE)                   # (H2*r, 64)

    # proj (1280 -> dmodel): accumulate the 20 per-feature-row slices in an
    # f32 register value; out_ref is written exactly once (lane-dense, 128).
    acc = jnp.broadcast_to(bp_ref[...], out_ref.shape)     # (r_tile, 128) f32
    for h in range(h2):                                    # static unroll, H2=20
        acc = acc + jnp.dot(c2[h * r_tile:(h + 1) * r_tile, :], wp_ref[h],
                            preferred_element_type=jnp.float32)
    out_ref[...] = acc


def fused_conv_proj(cols, w1aug, w2m, b2, wp, bp, *, max_r_tile=256):
    h2, r, k1 = cols.shape
    d = wp.shape[-1]
    r_tile = _round_up(min(max_r_tile, _round_up(r, 16)), 16)
    num_tiles = pl.cdiv(r, r_tile)
    r_pad = num_tiles * r_tile
    if r_pad != r:
        cols = jnp.pad(cols, ((0, 0), (0, r_pad - r), (0, 0)))
    out = pl.pallas_call(
        _fused_conv_proj_kernel,
        out_shape=jax.ShapeDtypeStruct((r_pad, d), jnp.float32),
        grid=(num_tiles,),
        in_specs=[
            pl.BlockSpec((h2, r_tile, k1), lambda i: (0, i, 0)),
            pl.BlockSpec((k1, 9 * C1), lambda i: (0, 0)),
            pl.BlockSpec((9 * C1, C1), lambda i: (0, 0)),
            pl.BlockSpec((1, C1), lambda i: (0, 0)),
            pl.BlockSpec((h2, C1, d), lambda i: (0, 0, 0)),
            pl.BlockSpec((1, d), lambda i: (0, 0)),
        ],
        out_specs=pl.BlockSpec((r_tile, d), lambda i: (i, 0)),
        compiler_params=pltpu.CompilerParams(
            dimension_semantics=("parallel",),
            vmem_limit_bytes=48 * 1024 * 1024),
    )(cols, w1aug, w2m, b2, wp, bp)
    return out[:r]


# ---------------------------------------------------------------------------
# Host-side (XLA-fused) glue: composite im2col for the two stride-2 convs.
# ---------------------------------------------------------------------------
def _conv_out(n, k=3, s=2, p=1):
    return (n + 2 * p - k) // s + 1


def _conv2_tap_mask(h1, w1, h2, w2):
    """Static (H2, 9, 1, W2, 1) mask: 1 where a conv2 tap reads a real conv1
    output, 0 where it reads conv2's zero padding."""
    m = np.zeros((h2, 3, 3, w2), np.float32)
    for hh in range(h2):
        for a in range(3):
            r = 2 * hh - 1 + a
            if not (0 <= r < h1):
                continue
            for bb in range(3):
                for ww in range(w2):
                    c = 2 * ww - 1 + bb
                    m[hh, a, bb, ww] = float(0 <= c < w1)
    return jnp.asarray(m.reshape(h2, 9, 1, w2, 1))


def _build_cols(xf):
    """xf: (B, 80, T) BN-normalized f32.  Returns bf16 (H2, B*W2, 128): for
    each conv-output feature row and each of the 9 conv2 taps, the 9 conv1
    input samples plus the conv2-padding mask column (which gates conv1's
    bias inside the block-diagonal matmul); columns 90..127 are zero K-pad."""
    b, h, t = xf.shape
    h1, w1 = _conv_out(h), _conv_out(t)
    h2, w2 = _conv_out(h1), _conv_out(w1)
    xp = jnp.pad(xf, ((0, 0), (3, 3), (3, 3)))
    # 14 strided slices (7 row offsets x 7 col offsets of the stride-4 grid).
    rows = jnp.stack([xp[:, dh:dh + 4 * (h2 - 1) + 1:4, :] for dh in range(7)],
                     axis=1)                                    # (B,7,H2,Tp)
    win = jnp.stack([rows[..., dw:dw + 4 * (w2 - 1) + 1:4] for dw in range(7)],
                    axis=3)                                     # (B,7,H2,7,W2)
    # win[b, dh, h, dw, w] = xp[b, 4h + dh, 4w + dw];  dh = 2a + c, dw = 2b + d.
    off = (2 * np.arange(3)[:, None] + np.arange(3)[None, :]).reshape(-1)
    t1 = win[:, off, :, :, :]                                   # (B,9[a,c],H2,7,W2)
    t2 = t1[:, :, :, off, :]                                    # (B,9[a,c],H2,9[b,d],W2)
    t2 = t2.reshape(b, 3, 3, h2, 3, 3, w2)                      # (B,a,c,H2,b,d,W2)
    taps = t2.transpose(3, 1, 4, 0, 6, 2, 5)                    # (H2,a,b,B,W2,c,d)
    taps = taps.reshape(h2, 9, b, w2, 9)
    mask = _conv2_tap_mask(h1, w1, h2, w2)                      # (H2,9,1,W2,1)
    taps = jnp.concatenate(
        [taps * mask, jnp.broadcast_to(mask, (h2, 9, b, w2, 1))], axis=-1)
    cols = taps.transpose(0, 2, 3, 1, 4).reshape(h2, b * w2, 90)
    cols = jnp.pad(cols, ((0, 0), (0, 0), (0, K1 - 90)))        # K pad 90 -> 128
    return cols.astype(MATMUL_DTYPE), h2, w2


# ---------------------------------------------------------------------------
# Parameters: PyTorch layouts in init_params, one-time relayout outside jit.
# ---------------------------------------------------------------------------
def init_params(key, dmodel=DMODEL):
    ks = jax.random.split(key, 8)
    return {
        "bn_mean": jnp.zeros((N_INPUT,), jnp.float32),
        "bn_var": jnp.ones((N_INPUT,), jnp.float32),
        "conv1_w": 0.10 * jax.random.normal(ks[0], (C1, 1, 3, 3), jnp.float32),
        "conv1_b": 0.10 * jax.random.normal(ks[1], (C1,), jnp.float32),
        "conv2_w": 0.05 * jax.random.normal(ks[2], (C1, C1, 3, 3), jnp.float32),
        "conv2_b": 0.10 * jax.random.normal(ks[3], (C1,), jnp.float32),
        "proj_w": 0.02 * jax.random.normal(ks[4], (dmodel, H2 * C1), jnp.float32),
        "proj_b": 0.02 * jax.random.normal(ks[5], (dmodel,), jnp.float32),
        "down_w": 0.05 * jax.random.normal(ks[6], (dmodel, dmodel, 2), jnp.float32),
        "down_b": 0.02 * jax.random.normal(ks[7], (dmodel,), jnp.float32),
    }


def prepare_params(p, dmodel=DMODEL):
    """One-time (outside jit) weight relayout into kernel-ready constants."""
    scale = 1.0 / jnp.sqrt(p["bn_var"] + BN_EPS)      # eval-mode BN (affine=False)
    shift = -p["bn_mean"] * scale
    # conv1 as block-diagonal (128, 576) over the 9 conv2 taps; bias in the
    # 10th row of each tap block (gated by the conv2-padding mask column);
    # rows 90..127 are the zero K-pad.
    w1m = np.asarray(p["conv1_w"], np.float32).reshape(C1, 9).T       # (9, 64)
    b1 = np.asarray(p["conv1_b"], np.float32)
    w1aug = np.zeros((K1, 9 * C1), np.float32)
    for t in range(9):
        w1aug[t * 10:t * 10 + 9, t * C1:(t + 1) * C1] = w1m
        w1aug[t * 10 + 9, t * C1:(t + 1) * C1] = b1
    # conv2 as (9*64, 64), rows ordered (tap_h, tap_w, cin) to match c1 cols.
    w2m = np.asarray(p["conv2_w"], np.float32).transpose(2, 3, 1, 0).reshape(9 * C1, C1)
    # proj sliced per feature row h: wp[h, c, d] = proj_w[d, c*H2 + h].
    wp = np.asarray(p["proj_w"], np.float32).reshape(dmodel, C1, H2).transpose(2, 1, 0)
    # down Conv1d(dmodel, dmodel, 2, 2, 0) as (2*dmodel, dmodel), rows (k, cin).
    wd = np.asarray(p["down_w"], np.float32).transpose(2, 1, 0).reshape(2 * dmodel, dmodel)
    return {
        "bn_scale": scale, "bn_shift": shift,
        "w1aug": jnp.asarray(w1aug, MATMUL_DTYPE),
        "w2m": jnp.asarray(w2m, MATMUL_DTYPE),
        "b2": jnp.asarray(p["conv2_b"], jnp.float32).reshape(1, C1),
        "wp": jnp.asarray(wp, MATMUL_DTYPE),
        "bp": jnp.asarray(p["proj_b"], jnp.float32).reshape(1, dmodel),
        "wd": jnp.asarray(wd, jnp.float32),
        "bd": jnp.asarray(p["down_b"], jnp.float32),
    }


# ---------------------------------------------------------------------------
# Encoder forward (eval-mode)
# ---------------------------------------------------------------------------
def encoder_forward(kp, x, x_mask):
    """x: (B, T, 80) float32.  x_mask is unused by the reference forward."""
    del x_mask
    b, t, _ = x.shape

    # Eval-mode BatchNorm1d(80, affine=False): per-channel scale/shift, fused
    # by XLA into the patch gather below.
    xb = x * kp["bn_scale"] + kp["bn_shift"]          # (B, T, 80)
    xf = xb.transpose(0, 2, 1)                        # (B, 80, T): H = features

    cols, h2, w2 = _build_cols(xf)                    # (H2, B*W2, 128) bf16

    # One fused Pallas call: conv1 + LeakyReLU + conv2 + LeakyReLU + proj.
    y = fused_conv_proj(cols, kp["w1aug"], kp["w2m"], kp["b2"],
                        kp["wp"], kp["bp"])           # (B*W2, dmodel) f32
    x_seq = y.reshape(b, w2, DMODEL)
    # dropout: identity in eval mode.

    for i in range(12):
        # TODO(synk): ConformerBlock class is not defined in the provided source; treated as identity here.
        x_seq = x_seq
        if i == 3:
            bb, tt, d = x_seq.shape
            t_out = tt // 2
            # `down` Conv1d(k=2, s=2): tiny matmul — plain jnp.dot (XLA fuses
            # it with the reshape; a separate pallas_call is pure overhead).
            xr = x_seq[:, :t_out * 2, :].reshape(bb * t_out, 2 * d)
            x_seq = (jnp.dot(xr, kp["wd"], preferred_element_type=jnp.float32)
                     + kp["bd"]).reshape(bb, t_out, d)

    return x_seq.transpose(1, 0, 2)                   # (T_out, B, dmodel)


if __name__ == "__main__":
    key = jax.random.PRNGKey(0)
    k_param, k_x = jax.random.split(key)

    B, T = 2, 16
    x = jax.random.normal(k_x, (B, T, N_INPUT), jnp.float32)
    x_mask = jnp.ones((B, T), jnp.float32)            # unused, parity only

    params = init_params(k_param)
    kparams = prepare_params(params)                  # one-time relayout
    fwd = jax.jit(encoder_forward)
    out = fwd(kparams, x, x_mask)
    jax.block_until_ready(out)

    # (T=16) -> stride-2 conv twice -> 4 -> down conv (k=2, s=2) -> 2
    assert out.shape == (2, B, DMODEL), out.shape
    assert out.dtype == jnp.float32
    print("KERNEL_OK")
</pallas_src>

<mosaic_0001>
module attributes {stable_mosaic.version = 11 : i64} {
  func.func @_fused_conv_proj_kernel(%arg0: i32, %arg1: memref<20x16x128xbf16, #tpu.memory_space<vmem>>, %arg2: memref<128x576xbf16, #tpu.memory_space<vmem>>, %arg3: memref<576x64xbf16, #tpu.memory_space<vmem>>, %arg4: memref<1x64xf32, #tpu.memory_space<vmem>>, %arg5: memref<20x64x128xbf16, #tpu.memory_space<vmem>>, %arg6: memref<1x128xf32, #tpu.memory_space<vmem>>, %arg7: memref<16x128xf32, #tpu.memory_space<vmem>>) attributes {dimension_semantics = [#tpu.dimension_semantics<parallel>], iteration_bounds = array<i64: 1>, scalar_prefetch = 0 : i64, scratch_operands = 0 : i64, tpu.core_type = #tpu.core_type<tc>, window_params = [{transform_indices = @transform_0, window_bounds = array<i64: 20, 16, 128>}, {pipeline_mode = #tpu.pipeline_mode<synchronous>, transform_indices = @transform_1, window_bounds = array<i64: 128, 576>}, {pipeline_mode = #tpu.pipeline_mode<synchronous>, transform_indices = @transform_2, window_bounds = array<i64: 576, 64>}, {pipeline_mode = #tpu.pipeline_mode<synchronous>, transform_indices = @transform_3, window_bounds = array<i64: 1, 64>}, {pipeline_mode = #tpu.pipeline_mode<synchronous>, transform_indices = @transform_4, window_bounds = array<i64: 20, 64, 128>}, {pipeline_mode = #tpu.pipeline_mode<synchronous>, transform_indices = @transform_5, window_bounds = array<i64: 1, 128>}, {transform_indices = @transform_6, window_bounds = array<i64: 16, 128>}]} {
    %c0 = arith.constant 0 : index
    %c0_0 = arith.constant 0 : index
    %c0_1 = arith.constant 0 : index
    %0 = vector.load %arg1[%c0, %c0_0, %c0_1] : memref<20x16x128xbf16, #tpu.memory_space<vmem>>, vector<20x16x128xbf16>
    %1 = vector.shape_cast %0 : vector<20x16x128xbf16> to vector<320x128xbf16>
    %c0_2 = arith.constant 0 : index
    %c0_3 = arith.constant 0 : index
    %2 = vector.load %arg2[%c0_2, %c0_3] : memref<128x576xbf16, #tpu.memory_space<vmem>>, vector<128x576xbf16>
    %cst = arith.constant dense<0.000000e+00> : vector<320x576xf32>
    %3 = tpu.matmul %1, %2, %cst {dimension_numbers = #tpu.dot_dimension_numbers<[1], [0], [0], [1], [0, 0, 1, 1], [], []>} : vector<320x128xbf16>, vector<128x576xbf16>, vector<320x576xf32> -> vector<320x576xf32>
    %cst_4 = arith.constant 0.000000e+00 : f32
    %4 = vector.broadcast %cst_4 : f32 to vector<320x576xf32>
    %5 = arith.cmpf oge, %3, %4 : vector<320x576xf32>
    %cst_5 = arith.constant 0.00999999977 : f32
    %6 = vector.broadcast %cst_5 : f32 to vector<320x576xf32>
    %7 = arith.mulf %6, %3 : vector<320x576xf32>
    %8 = arith.select %5, %3, %7 : vector<320x576xi1>, vector<320x576xf32>
    %9 = arith.truncf %8 : vector<320x576xf32> to vector<320x576xbf16>
    %c0_6 = arith.constant 0 : index
    %c0_7 = arith.constant 0 : index
    %10 = vector.load %arg3[%c0_6, %c0_7] : memref<576x64xbf16, #tpu.memory_space<vmem>>, vector<576x64xbf16>
    %cst_8 = arith.constant dense<0.000000e+00> : vector<320x64xf32>
    %11 = tpu.matmul %9, %10, %cst_8 {dimension_numbers = #tpu.dot_dimension_numbers<[1], [0], [0], [1], [0, 0, 1, 1], [], []>} : vector<320x576xbf16>, vector<576x64xbf16>, vector<320x64xf32> -> vector<320x64xf32>
    %c0_9 = arith.constant 0 : index
    %c0_10 = arith.constant 0 : index
    %12 = vector.load %arg4[%c0_9, %c0_10] : memref<1x64xf32, #tpu.memory_space<vmem>>, vector<1x64xf32>
    %13 = vector.broadcast %12 : vector<1x64xf32> to vector<320x64xf32>
    %14 = arith.addf %11, %13 : vector<320x64xf32>
    %cst_11 = arith.constant 0.000000e+00 : f32
    %15 = vector.broadcast %cst_11 : f32 to vector<320x64xf32>
    %16 = arith.cmpf oge, %14, %15 : vector<320x64xf32>
    %cst_12 = arith.constant 0.00999999977 : f32
    %17 = vector.broadcast %cst_12 : f32 to vector<320x64xf32>
    %18 = arith.mulf %17, %14 : vector<320x64xf32>
    %19 = arith.select %16, %14, %18 : vector<320x64xi1>, vector<320x64xf32>
    %20 = arith.truncf %19 : vector<320x64xf32> to vector<320x64xbf16>
    %c0_13 = arith.constant 0 : index
    %c0_14 = arith.constant 0 : index
    %21 = vector.load %arg6[%c0_13, %c0_14] : memref<1x128xf32, #tpu.memory_space<vmem>>, vector<1x128xf32>
    %22 = vector.shape_cast %21 : vector<1x128xf32> to vector<1x128xf32>
    %23 = vector.broadcast %22 : vector<1x128xf32> to vector<16x128xf32>
    %24 = vector.extract_strided_slice %20 {offsets = [0, 0], sizes = [16, 64], strides = [1, 1]} : vector<320x64xbf16> to vector<16x64xbf16>
    %c0_15 = arith.constant 0 : index
    %c0_16 = arith.constant 0 : index
    %c0_17 = arith.constant 0 : index
    %25 = vector.load %arg5[%c0_15, %c0_16, %c0_17] : memref<20x64x128xbf16, #tpu.memory_space<vmem>>, vector<1x64x128xbf16>
    %26 = vector.shape_cast %25 : vector<1x64x128xbf16> to vector<64x128xbf16>
    %cst_18 = arith.constant dense<0.000000e+00> : vector<16x128xf32>
    %27 = tpu.matmul %24, %26, %cst_18 {dimension_numbers = #tpu.dot_dimension_numbers<[1], [0], [0], [1], [0, 0, 1, 1], [], []>} : vector<16x64xbf16>, vector<64x128xbf16>, vector<16x128xf32> -> vector<16x128xf32>
    %28 = arith.addf %23, %27 : vector<16x128xf32>
    %29 = vector.extract_strided_slice %20 {offsets = [16, 0], sizes = [16, 64], strides = [1, 1]} : vector<320x64xbf16> to vector<16x64xbf16>
    %c1 = arith.constant 1 : index
    %c0_19 = arith.constant 0 : index
    %c0_20 = arith.constant 0 : index
    %30 = vector.load %arg5[%c1, %c0_19, %c0_20] : memref<20x64x128xbf16, #tpu.memory_space<vmem>>, vector<1x64x128xbf16>
    %31 = vector.shape_cast %30 : vector<1x64x128xbf16> to vector<64x128xbf16>
    %cst_21 = arith.constant dense<0.000000e+00> : vector<16x128xf32>
    %32 = tpu.matmul %29, %31, %cst_21 {dimension_numbers = #tpu.dot_dimension_numbers<[1], [0], [0], [1], [0, 0, 1, 1], [], []>} : vector<16x64xbf16>, vector<64x128xbf16>, vector<16x128xf32> -> vector<16x128xf32>
    %33 = arith.addf %28, %32 : vector<16x128xf32>
    %34 = vector.extract_strided_slice %20 {offsets = [32, 0], sizes = [16, 64], strides = [1, 1]} : vector<320x64xbf16> to vector<16x64xbf16>
    %c2 = arith.constant 2 : index
    %c0_22 = arith.constant 0 : index
    %c0_23 = arith.constant 0 : index
    %35 = vector.load %arg5[%c2, %c0_22, %c0_23] : memref<20x64x128xbf16, #tpu.memory_space<vmem>>, vector<1x64x128xbf16>
    %36 = vector.shape_cast %35 : vector<1x64x128xbf16> to vector<64x128xbf16>
    %cst_24 = arith.constant dense<0.000000e+00> : vector<16x128xf32>
    %37 = tpu.matmul %34, %36, %cst_24 {dimension_numbers = #tpu.dot_dimension_numbers<[1], [0], [0], [1], [0, 0, 1, 1], [], []>} : vector<16x64xbf16>, vector<64x128xbf16>, vector<16x128xf32> -> vector<16x128xf32>
    %38 = arith.addf %33, %37 : vector<16x128xf32>
    %39 = vector.extract_strided_slice %20 {offsets = [48, 0], sizes = [16, 64], strides = [1, 1]} : vector<320x64xbf16> to vector<16x64xbf16>
    %c3 = arith.constant 3 : index
    %c0_25 = arith.constant 0 : index
    %c0_26 = arith.constant 0 : index
    %40 = vector.load %arg5[%c3, %c0_25, %c0_26] : memref<20x64x128xbf16, #tpu.memory_space<vmem>>, vector<1x64x128xbf16>
    %41 = vector.shape_cast %40 : vector<1x64x128xbf16> to vector<64x128xbf16>
    %cst_27 = arith.constant dense<0.000000e+00> : vector<16x128xf32>
    %42 = tpu.matmul %39, %41, %cst_27 {dimension_numbers = #tpu.dot_dimension_numbers<[1], [0], [0], [1], [0, 0, 1, 1], [], []>} : vector<16x64xbf16>, vector<64x128xbf16>, vector<16x128xf32> -> vector<16x128xf32>
    %43 = arith.addf %38, %42 : vector<16x128xf32>
    %44 = vector.extract_strided_slice %20 {offsets = [64, 0], sizes = [16, 64], strides = [1, 1]} : vector<320x64xbf16> to vector<16x64xbf16>
    %c4 = arith.constant 4 : index
    %c0_28 = arith.constant 0 : index
    %c0_29 = arith.constant 0 : index
    %45 = vector.load %arg5[%c4, %c0_28, %c0_29] : memref<20x64x128xbf16, #tpu.memory_space<vmem>>, vector<1x64x128xbf16>
    %46 = vector.shape_cast %45 : vector<1x64x128xbf16> to vector<64x128xbf16>
    %cst_30 = arith.constant dense<0.000000e+00> : vector<16x128xf32>
    %47 = tpu.matmul %44, %46, %cst_30 {dimension_numbers = #tpu.dot_dimension_numbers<[1], [0], [0], [1], [0, 0, 1, 1], [], []>} : vector<16x64xbf16>, vector<64x128xbf16>, vector<16x128xf32> -> vector<16x128xf32>
    %48 = arith.addf %43, %47 : vector<16x128xf32>
    %49 = vector.extract_strided_slice %20 {offsets = [80, 0], sizes = [16, 64], strides = [1, 1]} : vector<320x64xbf16> to vector<16x64xbf16>
    %c5 = arith.constant 5 : index
    %c0_31 = arith.constant 0 : index
    %c0_32 = arith.constant 0 : index
    %50 = vector.load %arg5[%c5, %c0_31, %c0_32] : memref<20x64x128xbf16, #tpu.memory_space<vmem>>, vector<1x64x128xbf16>
    %51 = vector.shape_cast %50 : vector<1x64x128xbf16> to vector<64x128xbf16>
    %cst_33 = arith.constant dense<0.000000e+00> : vector<16x128xf32>
    %52 = tpu.matmul %49, %51, %cst_33 {dimension_numbers = #tpu.dot_dimension_numbers<[1], [0], [0], [1], [0, 0, 1, 1], [], []>} : vector<16x64xbf16>, vector<64x128xbf16>, vector<16x128xf32> -> vector<16x128xf32>
    %53 = arith.addf %48, %52 : vector<16x128xf32>
    %54 = vector.extract_strided_slice %20 {offsets = [96, 0], sizes = [16, 64], strides = [1, 1]} : vector<320x64xbf16> to vector<16x64xbf16>
    %c6 = arith.constant 6 : index
    %c0_34 = arith.constant 0 : index
    %c0_35 = arith.constant 0 : index
    %55 = vector.load %arg5[%c6, %c0_34, %c0_35] : memref<20x64x128xbf16, #tpu.memory_space<vmem>>, vector<1x64x128xbf16>
    %56 = vector.shape_cast %55 : vector<1x64x128xbf16> to vector<64x128xbf16>
    %cst_36 = arith.constant dense<0.000000e+00> : vector<16x128xf32>
    %57 = tpu.matmul %54, %56, %cst_36 {dimension_numbers = #tpu.dot_dimension_numbers<[1], [0], [0], [1], [0, 0, 1, 1], [], []>} : vector<16x64xbf16>, vector<64x128xbf16>, vector<16x128xf32> -> vector<16x128xf32>
    %58 = arith.addf %53, %57 : vector<16x128xf32>
    %59 = vector.extract_strided_slice %20 {offsets = [112, 0], sizes = [16, 64], strides = [1, 1]} : vector<320x64xbf16> to vector<16x64xbf16>
    %c7 = arith.constant 7 : index
    %c0_37 = arith.constant 0 : index
    %c0_38 = arith.constant 0 : index
    %60 = vector.load %arg5[%c7, %c0_37, %c0_38] : memref<20x64x128xbf16, #tpu.memory_space<vmem>>, vector<1x64x128xbf16>
    %61 = vector.shape_cast %60 : vector<1x64x128xbf16> to vector<64x128xbf16>
    %cst_39 = arith.constant dense<0.000000e+00> : vector<16x128xf32>
    %62 = tpu.matmul %59, %61, %cst_39 {dimension_numbers = #tpu.dot_dimension_numbers<[1], [0], [0], [1], [0, 0, 1, 1], [], []>} : vector<16x64xbf16>, vector<64x128xbf16>, vector<16x128xf32> -> vector<16x128xf32>
    %63 = arith.addf %58, %62 : vector<16x128xf32>
    %64 = vector.extract_strided_slice %20 {offsets = [128, 0], sizes = [16, 64], strides = [1, 1]} : vector<320x64xbf16> to vector<16x64xbf16>
    %c8 = arith.constant 8 : index
    %c0_40 = arith.constant 0 : index
    %c0_41 = arith.constant 0 : index
    %65 = vector.load %arg5[%c8, %c0_40, %c0_41] : memref<20x64x128xbf16, #tpu.memory_space<vmem>>, vector<1x64x128xbf16>
    %66 = vector.shape_cast %65 : vector<1x64x128xbf16> to vector<64x128xbf16>
    %cst_42 = arith.constant dense<0.000000e+00> : vector<16x128xf32>
    %67 = tpu.matmul %64, %66, %cst_42 {dimension_numbers = #tpu.dot_dimension_numbers<[1], [0], [0], [1], [0, 0, 1, 1], [], []>} : vector<16x64xbf16>, vector<64x128xbf16>, vector<16x128xf32> -> vector<16x128xf32>
    %68 = arith.addf %63, %67 : vector<16x128xf32>
    %69 = vector.extract_strided_slice %20 {offsets = [144, 0], sizes = [16, 64], strides = [1, 1]} : vector<320x64xbf16> to vector<16x64xbf16>
    %c9 = arith.constant 9 : index
    %c0_43 = arith.constant 0 : index
    %c0_44 = arith.constant 0 : index
    %70 = vector.load %arg5[%c9, %c0_43, %c0_44] : memref<20x64x128xbf16, #tpu.memory_space<vmem>>, vector<1x64x128xbf16>
    %71 = vector.shape_cast %70 : vector<1x64x128xbf16> to vector<64x128xbf16>
    %cst_45 = arith.constant dense<0.000000e+00> : vector<16x128xf32>
    %72 = tpu.matmul %69, %71, %cst_45 {dimension_numbers = #tpu.dot_dimension_numbers<[1], [0], [0], [1], [0, 0, 1, 1], [], []>} : vector<16x64xbf16>, vector<64x128xbf16>, vector<16x128xf32> -> vector<16x128xf32>
    %73 = arith.addf %68, %72 : vector<16x128xf32>
    %74 = vector.extract_strided_slice %20 {offsets = [160, 0], sizes = [16, 64], strides = [1, 1]} : vector<320x64xbf16> to vector<16x64xbf16>
    %c10 = arith.constant 10 : index
    %c0_46 = arith.constant 0 : index
    %c0_47 = arith.constant 0 : index
    %75 = vector.load %arg5[%c10, %c0_46, %c0_47] : memref<20x64x128xbf16, #tpu.memory_space<vmem>>, vector<1x64x128xbf16>
    %76 = vector.shape_cast %75 : vector<1x64x128xbf16> to vector<64x128xbf16>
    %cst_48 = arith.constant dense<0.000000e+00> : vector<16x128xf32>
    %77 = tpu.matmul %74, %76, %cst_48 {dimension_numbers = #tpu.dot_dimension_numbers<[1], [0], [0], [1], [0, 0, 1, 1], [], []>} : vector<16x64xbf16>, vector<64x128xbf16>, vector<16x128xf32> -> vector<16x128xf32>
    %78 = arith.addf %73, %77 : vector<16x128xf32>
    %79 = vector.extract_strided_slice %20 {offsets = [176, 0], sizes = [16, 64], strides = [1, 1]} : vector<320x64xbf16> to vector<16x64xbf16>
    %c11 = arith.constant 11 : index
    %c0_49 = arith.constant 0 : index
    %c0_50 = arith.constant 0 : index
    %80 = vector.load %arg5[%c11, %c0_49, %c0_50] : memref<20x64x128xbf16, #tpu.memory_space<vmem>>, vector<1x64x128xbf16>
    %81 = vector.shape_cast %80 : vector<1x64x128xbf16> to vector<64x128xbf16>
    %cst_51 = arith.constant dense<0.000000e+00> : vector<16x128xf32>
    %82 = tpu.matmul %79, %81, %cst_51 {dimension_numbers = #tpu.dot_dimension_numbers<[1], [0], [0], [1], [0, 0, 1, 1], [], []>} : vector<16x64xbf16>, vector<64x128xbf16>, vector<16x128xf32> -> vector<16x128xf32>
    %83 = arith.addf %78, %82 : vector<16x128xf32>
    %84 = vector.extract_strided_slice %20 {offsets = [192, 0], sizes = [16, 64], strides = [1, 1]} : vector<320x64xbf16> to vector<16x64xbf16>
    %c12 = arith.constant 12 : index
    %c0_52 = arith.constant 0 : index
    %c0_53 = arith.constant 0 : index
    %85 = vector.load %arg5[%c12, %c0_52, %c0_53] : memref<20x64x128xbf16, #tpu.memory_space<vmem>>, vector<1x64x128xbf16>
    %86 = vector.shape_cast %85 : vector<1x64x128xbf16> to vector<64x128xbf16>
    %cst_54 = arith.constant dense<0.000000e+00> : vector<16x128xf32>
    %87 = tpu.matmul %84, %86, %cst_54 {dimension_numbers = #tpu.dot_dimension_numbers<[1], [0], [0], [1], [0, 0, 1, 1], [], []>} : vector<16x64xbf16>, vector<64x128xbf16>, vector<16x128xf32> -> vector<16x128xf32>
    %88 = arith.addf %83, %87 : vector<16x128xf32>
    %89 = vector.extract_strided_slice %20 {offsets = [208, 0], sizes = [16, 64], strides = [1, 1]} : vector<320x64xbf16> to vector<16x64xbf16>
    %c13 = arith.constant 13 : index
    %c0_55 = arith.constant 0 : index
    %c0_56 = arith.constant 0 : index
    %90 = vector.load %arg5[%c13, %c0_55, %c0_56] : memref<20x64x128xbf16, #tpu.memory_space<vmem>>, vector<1x64x128xbf16>
    %91 = vector.shape_cast %90 : vector<1x64x128xbf16> to vector<64x128xbf16>
    %cst_57 = arith.constant dense<0.000000e+00> : vector<16x128xf32>
    %92 = tpu.matmul %89, %91, %cst_57 {dimension_numbers = #tpu.dot_dimension_numbers<[1], [0], [0], [1], [0, 0, 1, 1], [], []>} : vector<16x64xbf16>, vector<64x128xbf16>, vector<16x128xf32> -> vector<16x128xf32>
    %93 = arith.addf %88, %92 : vector<16x128xf32>
    %94 = vector.extract_strided_slice %20 {offsets = [224, 0], sizes = [16, 64], strides = [1, 1]} : vector<320x64xbf16> to vector<16x64xbf16>
    %c14 = arith.constant 14 : index
    %c0_58 = arith.constant 0 : index
    %c0_59 = arith.constant 0 : index
    %95 = vector.load %arg5[%c14, %c0_58, %c0_59] : memref<20x64x128xbf16, #tpu.memory_space<vmem>>, vector<1x64x128xbf16>
    %96 = vector.shape_cast %95 : vector<1x64x128xbf16> to vector<64x128xbf16>
    %cst_60 = arith.constant dense<0.000000e+00> : vector<16x128xf32>
    %97 = tpu.matmul %94, %96, %cst_60 {dimension_numbers = #tpu.dot_dimension_numbers<[1], [0], [0], [1], [0, 0, 1, 1], [], []>} : vector<16x64xbf16>, vector<64x128xbf16>, vector<16x128xf32> -> vector<16x128xf32>
    %98 = arith.addf %93, %97 : vector<16x128xf32>
    %99 = vector.extract_strided_slice %20 {offsets = [240, 0], sizes = [16, 64], strides = [1, 1]} : vector<320x64xbf16> to vector<16x64xbf16>
    %c15 = arith.constant 15 : index
    %c0_61 = arith.constant 0 : index
    %c0_62 = arith.constant 0 : index
    %100 = vector.load %arg5[%c15, %c0_61, %c0_62] : memref<20x64x128xbf16, #tpu.memory_space<vmem>>, vector<1x64x128xbf16>
    %101 = vector.shape_cast %100 : vector<1x64x128xbf16> to vector<64x128xbf16>
    %cst_63 = arith.constant dense<0.000000e+00> : vector<16x128xf32>
    %102 = tpu.matmul %99, %101, %cst_63 {dimension_numbers = #tpu.dot_dimension_numbers<[1], [0], [0], [1], [0, 0, 1, 1], [], []>} : vector<16x64xbf16>, vector<64x128xbf16>, vector<16x128xf32> -> vector<16x128xf32>
    %103 = arith.addf %98, %102 : vector<16x128xf32>
    %104 = vector.extract_strided_slice %20 {offsets = [256, 0], sizes = [16, 64], strides = [1, 1]} : vector<320x64xbf16> to vector<16x64xbf16>
    %c16 = arith.constant 16 : index
    %c0_64 = arith.constant 0 : index
    %c0_65 = arith.constant 0 : index
    %105 = vector.load %arg5[%c16, %c0_64, %c0_65] : memref<20x64x128xbf16, #tpu.memory_space<vmem>>, vector<1x64x128xbf16>
    %106 = vector.shape_cast %105 : vector<1x64x128xbf16> to vector<64x128xbf16>
    %cst_66 = arith.constant dense<0.000000e+00> : vector<16x128xf32>
    %107 = tpu.matmul %104, %106, %cst_66 {dimension_numbers = #tpu.dot_dimension_numbers<[1], [0], [0], [1], [0, 0, 1, 1], [], []>} : vector<16x64xbf16>, vector<64x128xbf16>, vector<16x128xf32> -> vector<16x128xf32>
    %108 = arith.addf %103, %107 : vector<16x128xf32>
    %109 = vector.extract_strided_slice %20 {offsets = [272, 0], sizes = [16, 64], strides = [1, 1]} : vector<320x64xbf16> to vector<16x64xbf16>
    %c17 = arith.constant 17 : index
    %c0_67 = arith.constant 0 : index
    %c0_68 = arith.constant 0 : index
    %110 = vector.load %arg5[%c17, %c0_67, %c0_68] : memref<20x64x128xbf16, #tpu.memory_space<vmem>>, vector<1x64x128xbf16>
    %111 = vector.shape_cast %110 : vector<1x64x128xbf16> to vector<64x128xbf16>
    %cst_69 = arith.constant dense<0.000000e+00> : vector<16x128xf32>
    %112 = tpu.matmul %109, %111, %cst_69 {dimension_numbers = #tpu.dot_dimension_numbers<[1], [0], [0], [1], [0, 0, 1, 1], [], []>} : vector<16x64xbf16>, vector<64x128xbf16>, vector<16x128xf32> -> vector<16x128xf32>
    %113 = arith.addf %108, %112 : vector<16x128xf32>
    %114 = vector.extract_strided_slice %20 {offsets = [288, 0], sizes = [16, 64], strides = [1, 1]} : vector<320x64xbf16> to vector<16x64xbf16>
    %c18 = arith.constant 18 : index
    %c0_70 = arith.constant 0 : index
    %c0_71 = arith.constant 0 : index
    %115 = vector.load %arg5[%c18, %c0_70, %c0_71] : memref<20x64x128xbf16, #tpu.memory_space<vmem>>, vector<1x64x128xbf16>
    %116 = vector.shape_cast %115 : vector<1x64x128xbf16> to vector<64x128xbf16>
    %cst_72 = arith.constant dense<0.000000e+00> : vector<16x128xf32>
    %117 = tpu.matmul %114, %116, %cst_72 {dimension_numbers = #tpu.dot_dimension_numbers<[1], [0], [0], [1], [0, 0, 1, 1], [], []>} : vector<16x64xbf16>, vector<64x128xbf16>, vector<16x128xf32> -> vector<16x128xf32>
    %118 = arith.addf %113, %117 : vector<16x128xf32>
    %119 = vector.extract_strided_slice %20 {offsets = [304, 0], sizes = [16, 64], strides = [1, 1]} : vector<320x64xbf16> to vector<16x64xbf16>
    %c19 = arith.constant 19 : index
    %c0_73 = arith.constant 0 : index
    %c0_74 = arith.constant 0 : index
    %120 = vector.load %arg5[%c19, %c0_73, %c0_74] : memref<20x64x128xbf16, #tpu.memory_space<vmem>>, vector<1x64x128xbf16>
    %121 = vector.shape_cast %120 : vector<1x64x128xbf16> to vector<64x128xbf16>
    %cst_75 = arith.constant dense<0.000000e+00> : vector<16x128xf32>
    %122 = tpu.matmul %119, %121, %cst_75 {dimension_numbers = #tpu.dot_dimension_numbers<[1], [0], [0], [1], [0, 0, 1, 1], [], []>} : vector<16x64xbf16>, vector<64x128xbf16>, vector<16x128xf32> -> vector<16x128xf32>
    %123 = arith.addf %118, %122 : vector<16x128xf32>
    %c0_76 = arith.constant 0 : index
    %c0_77 = arith.constant 0 : index
    %124 = vector.load %arg7[%c0_76, %c0_77] : memref<16x128xf32, #tpu.memory_space<vmem>>, vector<16x128xf32>
    tpu.vector_store %arg7[%c0_76, %c0_77], %123 {strides = array<i32>} : memref<16x128xf32, #tpu.memory_space<vmem>>, vector<16x128xf32>,
    return
  }
  func.func @transform_0(%arg0: i32) -> (i32, i32, i32) {
    %c0_i32 = arith.constant 0 : i32
    %c0_i32_0 = arith.constant 0 : i32
    %c0_i32_1 = arith.constant 0 : i32
    return %c0_i32, %arg0, %c0_i32_0 : i32, i32, i32
  }
  func.func @transform_1(%arg0: i32) -> (i32, i32) {
    %c0_i32 = arith.constant 0 : i32
    %c0_i32_0 = arith.constant 0 : i32
    %c0_i32_1 = arith.constant 0 : i32
    return %c0_i32, %c0_i32_0 : i32, i32
  }
  func.func @transform_2(%arg0: i32) -> (i32, i32) {
    %c0_i32 = arith.constant 0 : i32
    %c0_i32_0 = arith.constant 0 : i32
    %c0_i32_1 = arith.constant 0 : i32
    return %c0_i32, %c0_i32_0 : i32, i32
  }
  func.func @transform_3(%arg0: i32) -> (i32, i32) {
    %c0_i32 = arith.constant 0 : i32
    %c0_i32_0 = arith.constant 0 : i32
    %c0_i32_1 = arith.constant 0 : i32
    return %c0_i32, %c0_i32_0 : i32, i32
  }
  func.func @transform_4(%arg0: i32) -> (i32, i32, i32) {
    %c0_i32 = arith.constant 0 : i32
    %c0_i32_0 = arith.constant 0 : i32
    %c0_i32_1 = arith.constant 0 : i32
    %c0_i32_2 = arith.constant 0 : i32
    return %c0_i32, %c0_i32_0, %c0_i32_1 : i32, i32, i32
  }
  func.func @transform_5(%arg0: i32) -> (i32, i32) {
    %c0_i32 = arith.constant 0 : i32
    %c0_i32_0 = arith.constant 0 : i32
    %c0_i32_1 = arith.constant 0 : i32
    return %c0_i32, %c0_i32_0 : i32, i32
  }
  func.func @transform_6(%arg0: i32) -> (i32, i32) {
    %c0_i32 = arith.constant 0 : i32
    %c0_i32_0 = arith.constant 0 : i32
    return %arg0, %c0_i32 : i32, i32
  }
}

</mosaic_0001>

<bundles_post_ra>
// kernel: encoder_forward.1
= control target key start
LH: loop header
LB: loop body
LE: loop exit
PB: predicated region body
PF: predicated region fallthrough
CT: control target
= control target key end

     0   :  { %v5741_v1 = vmov 0   ;;  %s7578_s1 = inlined_call_operand.vmem [shape: bf16[128,576], index: 1, kind: input, shape index: {}]   ;;  %s7579_s0 = inlined_call_operand.vmem [shape: bf16[20,16,128], index: 0, kind: input, shape index: {}]   ;;  %s7580_s2 = inlined_call_operand.vmem [shape: bf16[576,64], index: 2, kind: input, shape index: {}]   ;;  %s7581_s4 = inlined_call_operand.vmem [shape: bf16[20,64,128], index: 4, kind: input, shape index: {}]   ;;  %s7582_s3 = inlined_call_operand.vmem [shape: f32[1,64], index: 3, kind: input, shape index: {}]   ;;  %s7583_s5 = inlined_call_operand.vmem [shape: f32[1,128], index: 5, kind: input, shape index: {}]   ;;  %s7584_s6 = inlined_call_operand.vmem [shape: f32[16,128], index: 6, kind: output, shape index: {}]  }
   0x1   :  { %v5549_v0 = vld [vmem:[%s7578_s1 + $0x4] ss:$20 sps:$4 sm:$0xff]   ;;  %582 = vmatprep.mubr.bf16.mxu1 %v5741_v1  ;;  %472 = vmatprep.mubr.bf16.mxu0 %v5741_v1  ;;  %v5551_v2 = vld [vmem:[%s7578_s1] ss:$20 sps:$4 sm:$0xff]   ;;  %v5554_v4 = vld [vmem:[%s7578_s1 + $0x28] ss:$20 sps:$4 sm:$0xff]  }
   0x2   :  { %5332 = vmatprep.subr.bf16.mxu1 %v5549_v0  ;;  %v5552_v3 = vld [vmem:[%s7578_s1 + $0x2c] ss:$20 sps:$4 sm:$0xff]   ;;  %440 = vmatprep.subr.bf16.mxu0 %v5549_v0  ;;  %v5555_v5 = vld [vmem:[%s7578_s1 + $0x54] ss:$20 sps:$4 sm:$0xff]   ;;  %v5557_v6 = vld [vmem:[%s7578_s1 + $0x50] ss:$20 sps:$4 sm:$0xff]  }
   0x3   :  { %5340 = vmatpush1.bf16.msra.mxu1 %v5551_v2  ;;  %441 = vmatpush1.bf16.msra.mxu0 %v5551_v2  ;;  %v5558_v7 = vld [vmem:[%s7578_s1 + $0x7c] ss:$20 sps:$4 sm:$0xff]   ;;  %v5560_v8 = vld [vmem:[%s7578_s1 + $0x78] ss:$20 sps:$4 sm:$0xff]   ;;  %v5563_v10 = vld [vmem:[%s7578_s1 + $0xa0] ss:$20 sps:$4 sm:$0xff]  }
   0x4   :  { %5333 = vmatprep.subr.bf16.mxu1 %v5552_v3  ;;  %442 = vmatprep.subr.bf16.mxu0 %v5552_v3  ;;  %v5561_v9 = vld [vmem:[%s7578_s1 + $0xa4] ss:$20 sps:$4 sm:$0xff]   ;;  %v5564_v11 = vld [vmem:[%s7578_s1 + $0xcc] ss:$20 sps:$4 sm:$0xff]   ;;  %v5566_v12 = vld [vmem:[%s7578_s1 + $0xc8] ss:$20 sps:$4 sm:$0xff]  }
   0x5   :  { %v5567_v13 = vld [vmem:[%s7578_s1 + $0xf4] ss:$20 sps:$4 sm:$0xff]   ;;  %v5569_v14 = vld [vmem:[%s7578_s1 + $0xf0] ss:$20 sps:$4 sm:$0xff]   ;;  %v5572_v16 = vld [vmem:[%s7578_s1 + $0x118] ss:$20 sps:$4 sm:$0xff]  }
   0x6   :  { %v5570_v15 = vld [vmem:[%s7578_s1 + $0x11c] ss:$20 sps:$4 sm:$0xff]   ;;  %v5576_v17 = vld [vmem:[%s7578_s1 + $0xc] ss:$20 sps:$4 sm:$0xff]   ;;  %v5581_v21 = vld [vmem:[%s7578_s1 + $0x34] ss:$20 sps:$4 sm:$0xff]  }
   0x7   :  { %5341 = vmatpush1.bf16.msra.mxu1 %v5554_v4  ;;  %443 = vmatpush1.bf16.msra.mxu0 %v5554_v4  ;;  %v5835_v18 = vld [vmem:[%s7579_s0 + $0x58] sm:$0xff]   ;;  %v5840_v19 = vld [vmem:[%s7579_s0] sm:$0xff]   ;;  %v5866_v25 = vld [vmem:[%s7579_s0 + $0x8] sm:$0xff]  }
   0x8   :  { %5334 = vmatprep.subr.bf16.mxu1 %v5555_v5  ;;  %444 = vmatprep.subr.bf16.mxu0 %v5555_v5  ;;  %v5574_v20 = vld [vmem:[%s7578_s1 + $0x8] ss:$20 sps:$4 sm:$0xff]   ;;  %v5579_v22 = vld [vmem:[%s7578_s1 + $0x30] ss:$20 sps:$4 sm:$0xff]   ;;  %v5584_v26 = vld [vmem:[%s7578_s1 + $0x58] ss:$20 sps:$4 sm:$0xff]  }
   0x9   :  { %v5586_v23 = vld [vmem:[%s7578_s1 + $0x5c] ss:$20 sps:$4 sm:$0xff]   ;;  %v5861_v24 = vld [vmem:[%s7579_s0 + $0x60] sm:$0xff]   ;;  %v5886_v30 = vld [vmem:[%s7579_s0 + $0x68] sm:$0xff]  }
   0xa   :  { %v5591_v27 = vld [vmem:[%s7578_s1 + $0x84] ss:$20 sps:$4 sm:$0xff]   ;;  %v5589_v28 = vld [vmem:[%s7578_s1 + $0x80] ss:$20 sps:$4 sm:$0xff]   ;;  %v5594_v34 = vld [vmem:[%s7578_s1 + $0xa8] ss:$20 sps:$4 sm:$0xff]  }
   0xb   :  { %5342 = vmatpush1.bf16.msra.mxu1 %v5557_v6  ;;  %445 = vmatpush1.bf16.msra.mxu0 %v5557_v6  ;;  %v5618_v29 = vld [vmem:[%s7578_s1 + $0x10] ss:$20 sps:$4 sm:$0xff]   ;;  %v5596_v31 = vld [vmem:[%s7578_s1 + $0xac] ss:$20 sps:$4 sm:$0xff]   ;;  %v5601_v35 = vld [vmem:[%s7578_s1 + $0xd4] ss:$20 sps:$4 sm:$0xff]  }
   0xc   :  { %5335 = vmatprep.subr.bf16.mxu1 %v5558_v7  ;;  %446 = vmatprep.subr.bf16.mxu0 %v5558_v7  ;;  %v5895_v32 = vld [vmem:[%s7579_s0 + $0x10] sm:$0xff]   ;;  %v5621_v33 = vld [vmem:[%s7578_s1 + $0x38] ss:$20 sps:$4 sm:$0xff]   ;;  %v5625_v41 = vld [vmem:[%s7578_s1 + $0x88] ss:$20 sps:$4 sm:$0xff]  }
   0xd   :  { %v5623_v36 = vld [vmem:[%s7578_s1 + $0x60] ss:$20 sps:$4 sm:$0xff]   ;;  %v5599_v37 = vld [vmem:[%s7578_s1 + $0xd0] ss:$20 sps:$4 sm:$0xff]   ;;  %v5924_v39 = vld [vmem:[%s7579_s0 + $0x18] sm:$0xff]  }
   0xe   :  { %v5919_v38 = vld [vmem:[%s7579_s0 + $0x70] sm:$0xff]   ;;  %v5604_v42 = vld [vmem:[%s7578_s1 + $0xf8] ss:$20 sps:$4 sm:$0xff]   ;;  %v5959_v48 = vld [vmem:[%s7579_s0 + $0x20] sm:$0xff]  }
   0xf   :  { %5343 = vmatpush1.bf16.msra.mxu1 %v5560_v8  ;;  %447 = vmatpush1.bf16.msra.mxu0 %v5560_v8  ;;  %v5606_v40 = vld [vmem:[%s7578_s1 + $0xfc] ss:$20 sps:$4 sm:$0xff]   ;;  %v5612_v43 = vld [vmem:[%s7578_s1 + $0x124] ss:$20 sps:$4 sm:$0xff]   ;;  %v5610_v45 = vld [vmem:[%s7578_s1 + $0x120] ss:$20 sps:$4 sm:$0xff]  }
  0x10   :  { %5336 = vmatprep.subr.bf16.mxu1 %v5561_v9  ;;  %448 = vmatprep.subr.bf16.mxu0 %v5561_v9  ;;  %v5627_v44 = vld [vmem:[%s7578_s1 + $0xb0] ss:$20 sps:$4 sm:$0xff]   ;;  %v5629_v46 = vld [vmem:[%s7578_s1 + $0xd8] ss:$20 sps:$4 sm:$0xff]   ;;  %v5631_v49 = vld [vmem:[%s7578_s1 + $0x100] ss:$20 sps:$4 sm:$0xff]  }
  0x11   :  { %v5954_v47 = vld [vmem:[%s7579_s0 + $0x78] sm:$0xff]   ;;  %v5975_v51 = vld [vmem:[%s7579_s0 + $0x80] sm:$0xff]   ;;  %v5980_v52 = vld [vmem:[%s7579_s0 + $0x28] sm:$0xff]  }
  0x12   :  { %v5633_v50 = vld [vmem:[%s7578_s1 + $0x128] ss:$20 sps:$4 sm:$0xff]   ;;  %v5994_v54 = vld [vmem:[%s7579_s0 + $0x30] sm:$0xff]   ;;  %v6022_v58 = vld [vmem:[%s7579_s0 + $0x40] sm:$0xff]  }
  0x13   :  { %5344 = vmatpush1.bf16.msra.mxu1 %v5563_v10  ;;  %449 = vmatpush1.bf16.msra.mxu0 %v5563_v10  ;;  %v5989_v53 = vld [vmem:[%s7579_s0 + $0x88] sm:$0xff]   ;;  %v6003_v55 = vld [vmem:[%s7579_s0 + $0x90] sm:$0xff]   ;;  %v6008_v56 = vld [vmem:[%s7579_s0 + $0x38] sm:$0xff]  }
  0x14   :  { %5337 = vmatprep.subr.bf16.mxu1 %v5564_v11  ;;  %450 = vmatprep.subr.bf16.mxu0 %v5564_v11  ;;  %v6017_v57 = vld [vmem:[%s7579_s0 + $0x98] sm:$0xff]   ;;  %v6031_v59 = vld [vmem:[%s7579_s0 + $0x48] sm:$0xff]   ;;  %v5615_v60 = vld [vmem:[%s7580_s2] sm:$0xff]  }
  0x15   :  { %v5617_v61 = vld [vmem:[%s7580_s2 + $0x8] sm:$0xff]   ;;  %v6047_v62 = vld [vmem:[%s7579_s0 + $0x50] sm:$0xff]   ;;  %v5622_v0 = vld [vmem:[%s7580_s2 + $0x18] sm:$0xff]  }
  0x16   :  { %v5620_v63 = vld [vmem:[%s7580_s2 + $0x10] sm:$0xff]   ;;  %v5624_v2 = vld [vmem:[%s7580_s2 + $0x20] sm:$0xff]   ;;  %v5626_v3 = vld [vmem:[%s7580_s2 + $0x28] sm:$0xff]  }
  0x17   :  { %5345 = vmatpush1.bf16.msra.mxu1 %v5566_v12  ;;  %451 = vmatpush1.bf16.msra.mxu0 %v5566_v12  ;;  %v5628_v4 = vld [vmem:[%s7580_s2 + $0x30] sm:$0xff]   ;;  %v5630_v5 = vld [vmem:[%s7580_s2 + $0x38] sm:$0xff]   ;;  %v5632_v6 = vld [vmem:[%s7580_s2 + $0x40] sm:$0xff]  }
  0x18   :  { %5338 = vmatprep.subr.bf16.mxu1 %v5567_v13  ;;  %452 = vmatprep.subr.bf16.mxu0 %v5567_v13  ;;  %v5634_v7 = vld [vmem:[%s7580_s2 + $0x48] sm:$0xff]   ;;  %v5635_v8 = vld [vmem:[%s7580_s2 + $0x50] sm:$0xff]   ;;  %v5636_v9 = vld [vmem:[%s7580_s2 + $0x58] sm:$0xff]  }
  0x19   :  { %v5637_v10 = vld [vmem:[%s7580_s2 + $0x60] sm:$0xff]   ;;  %v5638_v11 = vld [vmem:[%s7580_s2 + $0x68] sm:$0xff]   ;;  %v5639_v12 = vld [vmem:[%s7580_s2 + $0x70] sm:$0xff]  }
  0x1a   :  { %v5640_v13 = vld [vmem:[%s7580_s2 + $0x78] sm:$0xff]  }
  0x1b   :  { %5346 = vmatpush1.bf16.msra.mxu1 %v5569_v14  ;;  %453 = vmatpush1.bf16.msra.mxu0 %v5569_v14  ;;  %v5650_v14 = vld [vmem:[%s7580_s2 + $0x100] sm:$0xff]  }
  0x1c   :  { %5339 = vmatprep.subr.bf16.mxu1 %v5570_v15  ;;  %454 = vmatprep.subr.bf16.mxu0 %v5570_v15  ;;  %v5653_v15 = vld [vmem:[%s7580_s2 + $0x108] sm:$0xff]  }
  0x1f   :  { %5347 = vmatpush1.bf16.msra.mxu1 %v5572_v16  ;;  %455 = vmatpush1.bf16.msra.mxu0 %v5572_v16 }
  0x20   :  { %673 = vmatprep.subr.bf16.mxu1 %v5576_v17  ;;  %4988 = vmatprep.subr.bf16.mxu0 %v5618_v29 }
  0x22   :  { %583 = vmatmul.mubr.bf16.vlgmr.msra.gmra.mrb[0].mxu1 %v5835_v18  ;;  %473 = vmatmul.mubr.bf16.vlgmr.msra.gmra.mrb[0].mxu0 %v5840_v19 }
  0x23   :  { %674 = vmatpush1.bf16.msra.mxu1 %v5574_v20  ;;  %592 = vmatprep.mubr.bf16.mxu1 %v5741_v1 }
  0x24   :  { %675 = vmatprep.subr.bf16.mxu1 %v5581_v21  ;;  %482 = vmatprep.mubr.bf16.mxu0 %v5741_v1 }
  0x25   :  { %4989 = vmatpush3.bf16.msra.mxu0 %v5618_v29 }
  0x26   :  { %4990 = vmatprep.subr.bf16.mxu0 %v5621_v33 }
  0x27   :  { %676 = vmatpush1.bf16.msra.mxu1 %v5579_v22 }
  0x28   :  { %677 = vmatprep.subr.bf16.mxu1 %v5586_v23 }
  0x29   :  { %4991 = vmatpush3.bf16.msra.mxu0 %v5621_v33 }
  0x2a   :  { %593 = vmatmul.mubr.bf16.gmra.mrb[4].mxu1 %v5861_v24  ;;  %483 = vmatmul.mubr.bf16.gmra.mrb[4].mxu0 %v5866_v25 }
  0x2b   :  { %602 = vmatprep.mubr.bf16.mxu1 %v5741_v1  ;;  %678 = vmatpush1.bf16.msra.mxu1 %v5584_v26 }
  0x2c   :  { %492 = vmatprep.mubr.bf16.mxu0 %v5741_v1  ;;  %679 = vmatprep.subr.bf16.mxu1 %v5591_v27 }
  0x2d   :  { %4992 = vmatprep.subr.bf16.mxu0 %v5623_v36 }
  0x2e   :  { %4993 = vmatpush3.bf16.msra.mxu0 %v5623_v36 }
  0x2f   :  { %680 = vmatpush1.bf16.msra.mxu1 %v5589_v28  ;;  %4994 = vmatprep.subr.bf16.mxu0 %v5625_v41 }
  0x30   :  { %681 = vmatprep.subr.bf16.mxu1 %v5596_v31 }
  0x32   :  { %603 = vmatmul.mubr.bf16.gmra.mrb[8].mxu1 %v5886_v30  ;;  %493 = vmatmul.mubr.bf16.gmra.mrb[8].mxu0 %v5895_v32 }
  0x33   :  { %612 = vmatprep.mubr.bf16.mxu1 %v5741_v1  ;;  %502 = vmatprep.mubr.bf16.mxu0 %v5741_v1 }
  0x34   :  { %682 = vmatpush1.bf16.msra.mxu1 %v5594_v34  ;;  %4995 = vmatpush3.bf16.msra.mxu0 %v5625_v41 }
  0x35   :  { %683 = vmatprep.subr.bf16.mxu1 %v5601_v35  ;;  %4996 = vmatprep.subr.bf16.mxu0 %v5627_v44 }
  0x38   :  { %684 = vmatpush1.bf16.msra.mxu1 %v5599_v37  ;;  %4997 = vmatpush3.bf16.msra.mxu0 %v5627_v44 }
  0x39   :  { %685 = vmatprep.subr.bf16.mxu1 %v5606_v40  ;;  %4998 = vmatprep.subr.bf16.mxu0 %v5629_v46 }
  0x3a   :  { %613 = vmatmul.mubr.bf16.gmra.mrb[12].mxu1 %v5919_v38  ;;  %503 = vmatmul.mubr.bf16.gmra.mrb[12].mxu0 %v5924_v39 }
  0x3b   :  { %622 = vmatprep.mubr.bf16.mxu1 %v5741_v1  ;;  %512 = vmatprep.mubr.bf16.mxu0 %v5741_v1 }
  0x3c   :  { %686 = vmatpush1.bf16.msra.mxu1 %v5604_v42  ;;  %4999 = vmatpush3.bf16.msra.mxu0 %v5629_v46 }
  0x3d   :  { %687 = vmatprep.subr.bf16.mxu1 %v5612_v43  ;;  %5000 = vmatprep.subr.bf16.mxu0 %v5631_v49 }
  0x40   :  { %688 = vmatpush1.bf16.msra.mxu1 %v5610_v45  ;;  %5001 = vmatpush3.bf16.msra.mxu0 %v5631_v49 }
  0x41   :  { %2155 = vmatprep.subr.bf16.mxu1 %v5741_v1  ;;  %5002 = vmatprep.subr.bf16.mxu0 %v5633_v50 }
  0x42   :  { %623 = vmatmul.mubr.bf16.gmra.mrb[16].mxu1 %v5954_v47  ;;  %513 = vmatmul.mubr.bf16.gmra.mrb[16].mxu0 %v5959_v48 }
  0x43   :  { %632 = vmatprep.mubr.bf16.mxu1 %v5741_v1  ;;  %522 = vmatprep.mubr.bf16.mxu0 %v5741_v1 }
  0x44   :  { %5003 = vmatpush3.bf16.msra.mxu0 %v5633_v50 }
  0x45   :  { %5044 = vmatprep.subr.bf16.mxu0 %v5650_v14 }
  0x4a   :  { %633 = vmatmul.mubr.bf16.gmra.mrb[20].mxu1 %v5975_v51  ;;  %523 = vmatmul.mubr.bf16.gmra.mrb[20].mxu0 %v5980_v52 }
  0x4b   :  { %642 = vmatprep.mubr.bf16.mxu1 %v5741_v1  ;;  %532 = vmatprep.mubr.bf16.mxu0 %v5741_v1 }
  0x52   :  { %643 = vmatmul.mubr.bf16.gmra.mrb[24].mxu1 %v5989_v53  ;;  %533 = vmatmul.mubr.bf16.gmra.mrb[24].mxu0 %v5994_v54 }
  0x53   :  { %652 = vmatprep.mubr.bf16.mxu1 %v5741_v1  ;;  %542 = vmatprep.mubr.bf16.mxu0 %v5741_v1 }
  0x5a   :  { %653 = vmatmul.mubr.bf16.gmra.mrb[28].mxu1 %v6003_v55  ;;  %543 = vmatmul.mubr.bf16.gmra.mrb[28].mxu0 %v6008_v56 }
  0x5b   :  { %662 = vmatprep.mubr.bf16.mxu1 %v5741_v1  ;;  %552 = vmatprep.mubr.bf16.mxu0 %v5741_v1 }
  0x62   :  { %663 = vmatmul.mubr.bf16.gmra.mrb[32].mxu1 %v6017_v57  ;;  %553 = vmatmul.mubr.bf16.gmra.mrb[32].mxu0 %v6022_v58 }
  0x63   :  { %705 = vmatprep.mubr.bf16.mxu1 %v5741_v1  ;;  %562 = vmatprep.mubr.bf16.mxu0 %v5741_v1 }
  0x6a   :  { %706 = vmatmul.mubr.bf16.vlgmr.msra.gmra.mrb[36].mxu1 %v5840_v19  ;;  %563 = vmatmul.mubr.bf16.gmra.mrb[36].mxu0 %v6031_v59 }
  0x6b   :  { %2156 = vmatpush1.bf16.msra.mxu1 %v5615_v60  ;;  %715 = vmatprep.mubr.bf16.mxu1 %v5741_v1 }
  0x6c   :  { %2157 = vmatprep.subr.bf16.mxu1 %v5741_v1  ;;  %572 = vmatprep.mubr.bf16.mxu0 %v5741_v1 }
  0x6f   :  { %2158 = vmatpush1.bf16.msra.mxu1 %v5617_v61 }
  0x70   :  { %2159 = vmatprep.subr.bf16.mxu1 %v5741_v1 }
  0x72   :  { %716 = vmatmul.mubr.bf16.gmra.mrb[40].mxu1 %v5866_v25  ;;  %573 = vmatmul.mubr.bf16.gmra.mrb[40].mxu0 %v6047_v62 }
  0x73   :  { %725 = vmatprep.mubr.bf16.mxu1 %v5741_v1  ;;  %2160 = vmatpush1.bf16.msra.mxu1 %v5620_v63 }
  0x74   :  { %2161 = vmatprep.subr.bf16.mxu1 %v5741_v1  ;;  %5004 = vmatprep.mubr.bf16.mxu0 %v5840_v19 }
  0x77   :  { %2162 = vmatpush1.bf16.msra.mxu1 %v5622_v0 }
  0x78   :  { %2163 = vmatprep.subr.bf16.mxu1 %v5741_v1 }
  0x7a   :  { %726 = vmatmul.mubr.bf16.gmra.mrb[44].mxu1 %v5895_v32  ;;  %5005 = vmatmul.mubr.bf16.vlgmr.msra.gmra.mrb[44].mxu0 %v5866_v25 }
  0x7b   :  { %735 = vmatprep.mubr.bf16.mxu1 %v5741_v1  ;;  %2164 = vmatpush1.bf16.msra.mxu1 %v5624_v2 }
  0x7c   :  { %2165 = vmatprep.subr.bf16.mxu1 %v5741_v1  ;;  %5008 = vmatprep.mubr.bf16.mxu0 %v5895_v32 }
  0x7d   :  { %5045 = vmatpush3.bf16.msra.mxu0 %v5650_v14 }
  0x7e   :  { %5046 = vmatprep.subr.bf16.mxu0 %v5653_v15 }
  0x7f   :  { %2166 = vmatpush1.bf16.msra.mxu1 %v5626_v3 }
  0x80   :  { %2167 = vmatprep.subr.bf16.mxu1 %v5741_v1 }
  0x81   :  { %5047 = vmatpush3.bf16.msra.mxu0 %v5653_v15 }
  0x82   :  { %736 = vmatmul.mubr.bf16.gmra.mrb[48].mxu1 %v5924_v39  ;;  %5009 = vmatmul.mubr.bf16.gmra.mrb[48].mxu0 %v5924_v39 }
  0x83   :  { %745 = vmatprep.mubr.bf16.mxu1 %v5741_v1  ;;  %2168 = vmatpush1.bf16.msra.mxu1 %v5628_v4  ;;  %v5656_v4 = vld [vmem:[%s7580_s2 + $0x110] sm:$0xff]  }
  0x84   :  { %2169 = vmatprep.subr.bf16.mxu1 %v5741_v1  ;;  %5012 = vmatprep.mubr.bf16.mxu0 %v5959_v48 }
  0x85   :  { %5048 = vmatprep.subr.bf16.mxu0 %v5656_v4 }
  0x86   :  { %5049 = vmatpush3.bf16.msra.mxu0 %v5656_v4 }
  0x87   :  { %2170 = vmatpush1.bf16.msra.mxu1 %v5630_v5 }
  0x88   :  { %2171 = vmatprep.subr.bf16.mxu1 %v5741_v1 }
  0x8a   :  { %746 = vmatmul.mubr.bf16.gmra.mrb[52].mxu1 %v5959_v48  ;;  %5013 = vmatmul.mubr.bf16.gmra.mrb[52].mxu0 %v5980_v52 }
  0x8b   :  { %755 = vmatprep.mubr.bf16.mxu1 %v5741_v1  ;;  %2172 = vmatpush1.bf16.msra.mxu1 %v5632_v6 }
  0x8c   :  { %2173 = vmatprep.subr.bf16.mxu1 %v5741_v1  ;;  %5016 = vmatprep.mubr.bf16.mxu0 %v5994_v54 }
  0x8f   :  { %2174 = vmatpush1.bf16.msra.mxu1 %v5634_v7 }
  0x90   :  { %2175 = vmatprep.subr.bf16.mxu1 %v5741_v1 }
  0x92   :  { %756 = vmatmul.mubr.bf16.gmra.mrb[56].mxu1 %v5980_v52  ;;  %5017 = vmatmul.mubr.bf16.gmra.mrb[56].mxu0 %v6008_v56 }
  0x93   :  { %765 = vmatprep.mubr.bf16.mxu1 %v5741_v1  ;;  %2176 = vmatpush1.bf16.msra.mxu1 %v5635_v8 }
  0x94   :  { %2177 = vmatprep.subr.bf16.mxu1 %v5741_v1  ;;  %5020 = vmatprep.mubr.bf16.mxu0 %v6022_v58 }
  0x97   :  { %2178 = vmatpush1.bf16.msra.mxu1 %v5636_v9  ;;  %v5641_v9 = vld [vmem:[%s7580_s2 + $0x80] sm:$0xff]  }
  0x98   :  { %2179 = vmatprep.subr.bf16.mxu1 %v5741_v1 }
  0x9a   :  { %766 = vmatmul.mubr.bf16.gmra.mrb[60].mxu1 %v5994_v54  ;;  %5021 = vmatmul.mubr.bf16.gmra.mrb[60].mxu0 %v6031_v59 }
  0x9b   :  { %775 = vmatprep.mubr.bf16.mxu1 %v5741_v1  ;;  %2180 = vmatpush1.bf16.msra.mxu1 %v5637_v10 }
  0x9c   :  { %2181 = vmatprep.subr.bf16.mxu1 %v5741_v1  ;;  %5024 = vmatprep.mubr.bf16.mxu0 %v6047_v62 }
  0x9f   :  { %2182 = vmatpush1.bf16.msra.mxu1 %v5638_v11 }
  0xa0   :  { %2183 = vmatprep.subr.bf16.mxu1 %v5741_v1 }
  0xa2   :  { %776 = vmatmul.mubr.bf16.gmra.mrb[64].mxu1 %v6008_v56  ;;  %5025 = vmatmul.mubr.bf16.gmra.mrb[64].mxu0 %v5835_v18 }
  0xa3   :  { %785 = vmatprep.mubr.bf16.mxu1 %v5741_v1  ;;  %2184 = vmatpush1.bf16.msra.mxu1 %v5639_v12 }
  0xa4   :  { %2185 = vmatprep.subr.bf16.mxu1 %v5741_v1  ;;  %5028 = vmatprep.mubr.bf16.mxu0 %v5861_v24 }
  0xa7   :  { %2186 = vmatpush1.bf16.msra.mxu1 %v5640_v13 }
  0xa8   :  { %2348 = vmatprep.subr.bf16.mxu1 %v5741_v1 }
  0xaa   :  { %786 = vmatmul.mubr.bf16.gmra.mrb[68].mxu1 %v6022_v58  ;;  %5029 = vmatmul.mubr.bf16.gmra.mrb[68].mxu0 %v5886_v30 }
  0xab   :  { %795 = vmatprep.mubr.bf16.mxu1 %v5741_v1  ;;  %5032 = vmatprep.mubr.bf16.mxu0 %v5919_v38 }
  0xb2   :  { %796 = vmatmul.mubr.bf16.gmra.mrb[72].mxu1 %v6031_v59  ;;  %5033 = vmatmul.mubr.bf16.gmra.mrb[72].mxu0 %v5954_v47 }
  0xb3   :  { %805 = vmatprep.mubr.bf16.mxu1 %v5741_v1  ;;  %5036 = vmatprep.mubr.bf16.mxu0 %v5975_v51 }
  0xba   :  { %806 = vmatmul.mubr.bf16.gmra.mrb[76].mxu1 %v6047_v62  ;;  %5037 = vmatmul.mubr.bf16.gmra.mrb[76].mxu0 %v5989_v53 }
  0xbb   :  { %815 = vmatprep.mubr.bf16.mxu1 %v5741_v1  ;;  %5040 = vmatprep.mubr.bf16.mxu0 %v6003_v55 }
  0xc2   :  { %816 = vmatmul.mubr.bf16.gmra.mrb[80].mxu1 %v5835_v18  ;;  %5041 = vmatmul.mubr.bf16.gmra.mrb[80].mxu0 %v6017_v57 }
  0xc3   :  { %825 = vmatprep.mubr.bf16.mxu1 %v5741_v1 }
  0xca   :  { %826 = vmatmul.mubr.bf16.gmra.mrb[84].mxu1 %v5861_v24 }
  0xcb   :  { %835 = vmatprep.mubr.bf16.mxu1 %v5741_v1 }
  0xd2   :  { %836 = vmatmul.mubr.bf16.gmra.mrb[88].mxu1 %v5886_v30 }
  0xd3   :  { %845 = vmatprep.mubr.bf16.mxu1 %v5741_v1 }
  0xda   :  { %846 = vmatmul.mubr.bf16.gmra.mrb[92].mxu1 %v5919_v38 }
  0xdb   :  { %855 = vmatprep.mubr.bf16.mxu1 %v5741_v1 }
  0xe2   :  { %856 = vmatmul.mubr.bf16.gmra.mrb[96].mxu1 %v5954_v47 }
  0xe3   :  { %865 = vmatprep.mubr.bf16.mxu1 %v5741_v1 }
  0xea   :  { %866 = vmatmul.mubr.bf16.gmra.mrb[100].mxu1 %v5975_v51 }
  0xeb   :  { %875 = vmatprep.mubr.bf16.mxu1 %v5741_v1 }
  0xf2   :  { %876 = vmatmul.mubr.bf16.gmra.mrb[104].mxu1 %v5989_v53 }
  0xf3   :  { %885 = vmatprep.mubr.bf16.mxu1 %v5741_v1 }
  0xf5   :  { %v584_v16 = vpop.f32.mrb[0].mxu1  ;;  %v474_v17 = vpop.f32.mrb[0].mxu0 }
  0xf6   :  { %vm1209_vm0 = vcmp.ge.f32.partialorder %v584_v16, 0.0  ;;  %v1409_v18 = vmul.f32 0.01, %v584_v16  ;;  %v586_v19 = vpop.f32.mrb[1].mxu1  ;;  %vm1099_vm1 = vcmp.ge.f32.partialorder %v474_v17, 0.0  ;;  %v476_v20 = vpop.f32.mrb[1].mxu0 }
  0xf7   :  { %vm1210_vm2 = vcmp.ge.f32.partialorder %v586_v19, 0.0  ;;  %v1410_v21 = vmul.f32 0.01, %v586_v19  ;;  %v588_v22 = vpop.f32.mrb[2].mxu1  ;;  %v1299_v23 = vmul.f32 0.01, %v474_v17 }
  0xf8   :  { %v6167_v24 = vsel %vm1209_vm0, %v584_v16, %v1409_v18  ;;  %vm1214_vm3 = vcmp.ge.f32.partialorder %v588_v22, 0.0  ;;  %v1414_v25 = vmul.f32 0.01, %v588_v22  ;;  %v590_v26 = vpop.f32.mrb[3].mxu1  ;;  %vm1100_vm4 = vcmp.ge.f32.partialorder %v476_v20, 0.0  ;;  %v478_v27 = vpop.f32.mrb[2].mxu0 }
  0xf9   :  { %v6169_v28 = vsel %vm1210_vm2, %v586_v19, %v1410_v21  ;;  %vm1215_vm5 = vcmp.ge.f32.partialorder %v590_v26, 0.0  ;;  %v1415_v29 = vmul.f32 0.01, %v590_v26  ;;  %v6171_v30 = vsel %vm1099_vm1, %v474_v17, %v1299_v23  ;;  %v480_v31 = vpop.f32.mrb[3].mxu0 }
  0xfa   :  { %v6173_v32 = vsel %vm1214_vm3, %v588_v22, %v1414_v25  ;;  %886 = vmatmul.mubr.bf16.gmra.mrb[108].mxu1 %v6003_v55  ;;  %v1300_v33 = vmul.f32 0.01, %v476_v20  ;;  %vm1104_vm6 = vcmp.ge.f32.partialorder %v478_v27, 0.0  ;;  %v1304_v34 = vmul.f32 0.01, %v478_v27 }
  0xfb   :  { %v6176_v35 = vsel %vm1215_vm5, %v590_v26, %v1415_v29  ;;  %vm1105_vm7 = vcmp.ge.f32.partialorder %v480_v31, 0.0  ;;  %v1305_v36 = vmul.f32 0.01, %v480_v31  ;;  %895 = vmatprep.mubr.bf16.mxu1 %v5741_v1 }
  0xfc   :  { %v1500_v38 = vsel %vm1100_vm4, %v476_v20, %v1300_v33  ;;  %v6182_v39 = vsel %vm1104_vm6, %v478_v27, %v1304_v34 }
  0xfd   :  { %v594_v41 = vpop.f32.mrb[4].mxu1  ;;  %v1699_v42 = vpack.c.bf16 %v6182_v39, %v6171_v30  ;;  %v1505_v43 = vsel %vm1105_vm7, %v480_v31, %v1305_v36  ;;  %v484_v44 = vpop.f32.mrb[4].mxu0 }
  0xfe   :  { %vm1219_vm8 = vcmp.ge.f32.partialorder %v594_v41, 0.0  ;;  %v1419_v45 = vmul.f32 0.01, %v594_v41  ;;  %v596_v46 = vpop.f32.mrb[5].mxu1  ;;  %vm1109_vm9 = vcmp.ge.f32.partialorder %v484_v44, 0.0  ;;  %v486_v47 = vpop.f32.mrb[5].mxu0  ;;  %v1700_v48 = vpack.c.bf16 %v1505_v43, %v1500_v38 }
  0xff   :  { %vm1220_vm10 = vcmp.ge.f32.partialorder %v596_v46, 0.0  ;;  %v1420_v49 = vmul.f32 0.01, %v596_v46  ;;  %v598_v50 = vpop.f32.mrb[6].mxu1  ;;  %v1309_v51 = vmul.f32 0.01, %v484_v44 }
 0x100   :  { %v6188_v52 = vsel %vm1219_vm8, %v594_v41, %v1419_v45  ;;  %vm1224_vm11 = vcmp.ge.f32.partialorder %v598_v50, 0.0  ;;  %v1424_v53 = vmul.f32 0.01, %v598_v50  ;;  %v600_v54 = vpop.f32.mrb[7].mxu1  ;;  %vm1110_vm12 = vcmp.ge.f32.partialorder %v486_v47, 0.0  ;;  %v488_v55 = vpop.f32.mrb[6].mxu0 }
 0x101   :  { %v6190_v56 = vsel %vm1220_vm10, %v596_v46, %v1420_v49  ;;  %vm1225_vm13 = vcmp.ge.f32.partialorder %v600_v54, 0.0  ;;  %v1425_v58 = vmul.f32 0.01, %v600_v54  ;;  %v6193_v59 = vsel %vm1109_vm9, %v484_v44, %v1309_v51  ;;  %v490_v60 = vpop.f32.mrb[7].mxu0  ;;  %v5642_v38 = vld [vmem:[%s7580_s2 + $0x88] sm:$0xff]  }
 0x102   :  { %v6195_v61 = vsel %vm1224_vm11, %v598_v50, %v1424_v53  ;;  %896 = vmatmul.mubr.bf16.gmra.mrb[112].mxu1 %v6017_v57  ;;  %v1310_v62 = vmul.f32 0.01, %v486_v47  ;;  %vm1114_vm14 = vcmp.ge.f32.partialorder %v488_v55, 0.0  ;;  %v1314_v63 = vmul.f32 0.01, %v488_v55 }
 0x103   :  { %v6198_v0 = vsel %vm1225_vm13, %v600_v54, %v1425_v58  ;;  %2187 = vmatprep.mubr.bf16.mxu1 %v1700_v48  ;;  %vm1115_vm15 = vcmp.ge.f32.partialorder %v490_v60, 0.0  ;;  %v1315_v2 = vmul.f32 0.01, %v490_v60 }
 0x104   :  { %v1510_v5 = vsel %vm1110_vm12, %v486_v47, %v1310_v62  ;;  %v6206_v6 = vsel %vm1114_vm14, %v488_v55, %v1314_v63  ;;  %v5643_v47 = vld [vmem:[%s7580_s2 + $0x90] sm:$0xff]  }
 0x105   :  { %v604_v7 = vpop.f32.mrb[8].mxu1  ;;  %v1515_v8 = vsel %vm1115_vm15, %v490_v60, %v1315_v2  ;;  %v494_v10 = vpop.f32.mrb[8].mxu0  ;;  %v1704_v11 = vpack.c.bf16 %v6206_v6, %v6193_v59 }
 0x106   :  { %vm1229_vm0 = vcmp.ge.f32.partialorder %v604_v7, 0.0  ;;  %v1429_v12 = vmul.f32 0.01, %v604_v7  ;;  %v606_v13 = vpop.f32.mrb[9].mxu1  ;;  %vm1119_vm1 = vcmp.ge.f32.partialorder %v494_v10, 0.0  ;;  %v496_v14 = vpop.f32.mrb[9].mxu0  ;;  %v1705_v15 = vpack.c.bf16 %v1515_v8, %v1510_v5 }
 0x107   :  { %vm1230_vm2 = vcmp.ge.f32.partialorder %v606_v13, 0.0  ;;  %v1430_v16 = vmul.f32 0.01, %v606_v13  ;;  %v608_v17 = vpop.f32.mrb[10].mxu1  ;;  %v1319_v18 = vmul.f32 0.01, %v494_v10 }
 0x108   :  { %v6215_v19 = vsel %vm1229_vm0, %v604_v7, %v1429_v12  ;;  %vm1234_vm3 = vcmp.ge.f32.partialorder %v608_v17, 0.0  ;;  %v1434_v20 = vmul.f32 0.01, %v608_v17  ;;  %v610_v21 = vpop.f32.mrb[11].mxu1  ;;  %vm1120_vm4 = vcmp.ge.f32.partialorder %v496_v14, 0.0  ;;  %v498_v22 = vpop.f32.mrb[10].mxu0 }
 0x109   :  { %v6217_v23 = vsel %vm1230_vm2, %v606_v13, %v1430_v16  ;;  %vm1235_vm5 = vcmp.ge.f32.partialorder %v610_v21, 0.0  ;;  %v1435_v25 = vmul.f32 0.01, %v610_v21  ;;  %v6220_v26 = vsel %vm1119_vm1, %v494_v10, %v1319_v18  ;;  %v500_v27 = vpop.f32.mrb[11].mxu0 }
 0x10a   :  { %v6222_v29 = vsel %vm1234_vm3, %v608_v17, %v1434_v20  ;;  %2188 = vmatmul.mubr.bf16.vlgmr.msra.gmra.mrb[116].mxu1 %v1699_v42  ;;  %v1320_v31 = vmul.f32 0.01, %v496_v14  ;;  %vm1124_vm6 = vcmp.ge.f32.partialorder %v498_v22, 0.0  ;;  %v1324_v33 = vmul.f32 0.01, %v498_v22 }
 0x10b   :  { %v6227_v34 = vsel %vm1235_vm5, %v610_v21, %v1435_v25  ;;  %2349 = vmatpush1.bf16.msra.mxu1 %v5641_v9  ;;  %2195 = vmatprep.mubr.bf16.mxu1 %v1705_v15  ;;  %vm1125_vm7 = vcmp.ge.f32.partialorder %v500_v27, 0.0  ;;  %v1325_v36 = vmul.f32 0.01, %v500_v27  ;;  %v5645_v21 = vld [vmem:[%s7580_s2 + $0xa0] sm:$0xff]  }
 0x10c   :  { %v1520_v43 = vsel %vm1120_vm4, %v496_v14, %v1320_v31  ;;  %v6235_v30 = vsel %vm1124_vm6, %v498_v22, %v1324_v33  ;;  %2350 = vmatprep.subr.bf16.mxu1 %v5741_v1  ;;  %v5644_v14 = vld [vmem:[%s7580_s2 + $0x98] sm:$0xff]  }
 0x10d   :  { %v614_v42 = vpop.f32.mrb[12].mxu1  ;;  %v1525_v44 = vsel %vm1125_vm7, %v500_v27, %v1325_v36  ;;  %v504_v45 = vpop.f32.mrb[12].mxu0  ;;  %v1709_v46 = vpack.c.bf16 %v6235_v30, %v6220_v26  ;;  %v5659_v26 = vld [vmem:[%s7580_s2 + $0x118] sm:$0xff]  }
 0x10e   :  { %vm1239_vm8 = vcmp.ge.f32.partialorder %v614_v42, 0.0  ;;  %v1439_v48 = vmul.f32 0.01, %v614_v42  ;;  %v616_v49 = vpop.f32.mrb[13].mxu1  ;;  %vm1129_vm9 = vcmp.ge.f32.partialorder %v504_v45, 0.0  ;;  %v506_v50 = vpop.f32.mrb[13].mxu0  ;;  %v1710_v51 = vpack.c.bf16 %v1525_v44, %v1520_v43  ;;  %5050 = vmatprep.subr.bf16.mxu0 %v5659_v26 }
 0x10f   :  { %vm1240_vm10 = vcmp.ge.f32.partialorder %v616_v49, 0.0  ;;  %v1440_v53 = vmul.f32 0.01, %v616_v49  ;;  %v618_v54 = vpop.f32.mrb[14].mxu1  ;;  %v1329_v55 = vmul.f32 0.01, %v504_v45  ;;  %2351 = vmatpush1.bf16.msra.mxu1 %v5642_v38  ;;  %5051 = vmatpush3.bf16.msra.mxu0 %v5659_v26 }
 0x110   :  { %v6245_v58 = vsel %vm1239_vm8, %v614_v42, %v1439_v48  ;;  %vm1244_vm11 = vcmp.ge.f32.partialorder %v618_v54, 0.0  ;;  %v1444_v60 = vmul.f32 0.01, %v618_v54  ;;  %v620_v62 = vpop.f32.mrb[15].mxu1  ;;  %vm1130_vm12 = vcmp.ge.f32.partialorder %v506_v50, 0.0  ;;  %v508_v63 = vpop.f32.mrb[14].mxu0  ;;  %2352 = vmatprep.subr.bf16.mxu1 %v5741_v1 }
 0x111   :  { %v6248_v2 = vsel %vm1240_vm10, %v616_v49, %v1440_v53  ;;  %vm1245_vm13 = vcmp.ge.f32.partialorder %v620_v62, 0.0  ;;  %v1445_v4 = vmul.f32 0.01, %v620_v62  ;;  %v6251_v5 = vsel %vm1129_vm9, %v504_v45, %v1329_v55  ;;  %v510_v7 = vpop.f32.mrb[15].mxu0 }
 0x112   :  { %v6253_v8 = vsel %vm1244_vm11, %v618_v54, %v1444_v60  ;;  %2196 = vmatmul.mubr.bf16.gmra.mrb[120].mxu1 %v1704_v11  ;;  %v1330_v9 = vmul.f32 0.01, %v506_v50  ;;  %vm1134_vm14 = vcmp.ge.f32.partialorder %v508_v63, 0.0  ;;  %v1334_v10 = vmul.f32 0.01, %v508_v63 }
 0x113   :  { %v6258_v12 = vsel %vm1245_vm13, %v620_v62, %v1445_v4  ;;  %2203 = vmatprep.mubr.bf16.mxu1 %v1710_v51  ;;  %vm1135_vm15 = vcmp.ge.f32.partialorder %v510_v7, 0.0  ;;  %v1335_v13 = vmul.f32 0.01, %v510_v7  ;;  %2353 = vmatpush1.bf16.msra.mxu1 %v5643_v47  ;;  %v5646_v62 = vld [vmem:[%s7580_s2 + $0xa8] sm:$0xff]  }
 0x114   :  { %v1530_v16 = vsel %vm1130_vm12, %v506_v50, %v1330_v9  ;;  %v6266_v59 = vsel %vm1134_vm14, %v508_v63, %v1334_v10  ;;  %2354 = vmatprep.subr.bf16.mxu1 %v5741_v1 }
 0x115   :  { %v624_v11 = vpop.f32.mrb[16].mxu1  ;;  %v1535_v17 = vsel %vm1135_vm15, %v510_v7, %v1335_v13  ;;  %v514_v18 = vpop.f32.mrb[16].mxu0  ;;  %v1714_v20 = vpack.c.bf16 %v6266_v59, %v6251_v5 }
 0x116   :  { %vm1249_vm0 = vcmp.ge.f32.partialorder %v624_v11, 0.0  ;;  %v1449_v22 = vmul.f32 0.01, %v624_v11  ;;  %v626_v25 = vpop.f32.mrb[17].mxu1  ;;  %vm1139_vm1 = vcmp.ge.f32.partialorder %v514_v18, 0.0  ;;  %v516_v27 = vpop.f32.mrb[17].mxu0  ;;  %v1715_v31 = vpack.c.bf16 %v1535_v17, %v1530_v16 }
 0x117   :  { %vm1250_vm2 = vcmp.ge.f32.partialorder %v626_v25, 0.0  ;;  %v1450_v33 = vmul.f32 0.01, %v626_v25  ;;  %v628_v36 = vpop.f32.mrb[18].mxu1  ;;  %v1339_v38 = vmul.f32 0.01, %v514_v18  ;;  %2355 = vmatpush1.bf16.msra.mxu1 %v5644_v14 }
 0x118   :  { %v6276_v43 = vsel %vm1249_vm0, %v624_v11, %v1449_v22  ;;  %vm1254_vm3 = vcmp.ge.f32.partialorder %v628_v36, 0.0  ;;  %v1454_v42 = vmul.f32 0.01, %v628_v36  ;;  %v630_v44 = vpop.f32.mrb[19].mxu1  ;;  %vm1140_vm4 = vcmp.ge.f32.partialorder %v516_v27, 0.0  ;;  %v518_v45 = vpop.f32.mrb[18].mxu0  ;;  %2356 = vmatprep.subr.bf16.mxu1 %v5741_v1 }
 0x119   :  { %v6279_v47 = vsel %vm1250_vm2, %v626_v25, %v1450_v33  ;;  %vm1255_vm5 = vcmp.ge.f32.partialorder %v630_v44, 0.0  ;;  %v1455_v48 = vmul.f32 0.01, %v630_v44  ;;  %v6282_v49 = vsel %vm1139_vm1, %v514_v18, %v1339_v38  ;;  %v520_v50 = vpop.f32.mrb[19].mxu0  ;;  %v5647_v14 = vld [vmem:[%s7580_s2 + $0xb0] sm:$0xff]  }
 0x11a   :  { %v6284_v51 = vsel %vm1254_vm3, %v628_v36, %v1454_v42  ;;  %2204 = vmatmul.mubr.bf16.gmra.mrb[124].mxu1 %v1709_v46  ;;  %v1340_v53 = vmul.f32 0.01, %v516_v27  ;;  %vm1144_vm6 = vcmp.ge.f32.partialorder %v518_v45, 0.0  ;;  %v1344_v54 = vmul.f32 0.01, %v518_v45 }
 0x11b   :  { %v6289_v55 = vsel %vm1255_vm5, %v630_v44, %v1455_v48  ;;  %2211 = vmatprep.mubr.bf16.mxu1 %v1715_v31  ;;  %vm1145_vm7 = vcmp.ge.f32.partialorder %v520_v50, 0.0  ;;  %v1345_v60 = vmul.f32 0.01, %v520_v50  ;;  %2357 = vmatpush1.bf16.msra.mxu1 %v5645_v21 }
 0x11c   :  { %v1540_v30 = vsel %vm1140_vm4, %v516_v27, %v1340_v53  ;;  %v6300_v46 = vsel %vm1144_vm6, %v518_v45, %v1344_v54  ;;  %2358 = vmatprep.subr.bf16.mxu1 %v5741_v1 }
 0x11d   :  { %v634_v7 = vpop.f32.mrb[20].mxu1  ;;  %v1545_v9 = vsel %vm1145_vm7, %v520_v50, %v1345_v60  ;;  %v524_v10 = vpop.f32.mrb[20].mxu0  ;;  %v1719_v13 = vpack.c.bf16 %v6300_v46, %v6282_v49 }
 0x11e   :  { %vm1259_vm8 = vcmp.ge.f32.partialorder %v634_v7, 0.0  ;;  %v1459_v16 = vmul.f32 0.01, %v634_v7  ;;  %v636_v11 = vpop.f32.mrb[21].mxu1  ;;  %vm1149_vm9 = vcmp.ge.f32.partialorder %v524_v10, 0.0  ;;  %v526_v17 = vpop.f32.mrb[21].mxu0  ;;  %v1720_v18 = vpack.c.bf16 %v1545_v9, %v1540_v30 }
 0x11f   :  { %vm1260_vm10 = vcmp.ge.f32.partialorder %v636_v11, 0.0  ;;  %v1460_v21 = vmul.f32 0.01, %v636_v11  ;;  %v638_v22 = vpop.f32.mrb[22].mxu1  ;;  %v1349_v25 = vmul.f32 0.01, %v524_v10  ;;  %2359 = vmatpush1.bf16.msra.mxu1 %v5646_v62 }
 0x120   :  { %v6310_v27 = vsel %vm1259_vm8, %v634_v7, %v1459_v16  ;;  %vm1264_vm11 = vcmp.ge.f32.partialorder %v638_v22, 0.0  ;;  %v1464_v31 = vmul.f32 0.01, %v638_v22  ;;  %v640_v33 = vpop.f32.mrb[23].mxu1  ;;  %vm1150_vm12 = vcmp.ge.f32.partialorder %v526_v17, 0.0  ;;  %v528_v36 = vpop.f32.mrb[22].mxu0  ;;  %2360 = vmatprep.subr.bf16.mxu1 %v5741_v1 }
 0x121   :  { %v6313_v38 = vsel %vm1260_vm10, %v636_v11, %v1460_v21  ;;  %vm1265_vm13 = vcmp.ge.f32.partialorder %v640_v33, 0.0  ;;  %v1465_v42 = vmul.f32 0.01, %v640_v33  ;;  %v6316_v44 = vsel %vm1149_vm9, %v524_v10, %v1349_v25  ;;  %v530_v45 = vpop.f32.mrb[23].mxu0  ;;  %v5648_v62 = vld [vmem:[%s7580_s2 + $0xb8] sm:$0xff]  }
 0x122   :  { %v6318_v48 = vsel %vm1264_vm11, %v638_v22, %v1464_v31  ;;  %2212 = vmatmul.mubr.bf16.gmra.mrb[128].mxu1 %v1714_v20  ;;  %v1350_v50 = vmul.f32 0.01, %v526_v17  ;;  %vm1154_vm14 = vcmp.ge.f32.partialorder %v528_v36, 0.0  ;;  %v1354_v53 = vmul.f32 0.01, %v528_v36 }
 0x123   :  { %v6323_v54 = vsel %vm1265_vm13, %v640_v33, %v1465_v42  ;;  %2219 = vmatprep.mubr.bf16.mxu1 %v1720_v18  ;;  %vm1155_vm15 = vcmp.ge.f32.partialorder %v530_v45, 0.0  ;;  %v1355_v60 = vmul.f32 0.01, %v530_v45  ;;  %2361 = vmatpush1.bf16.msra.mxu1 %v5647_v14  ;;  %v5649_v14 = vld [vmem:[%s7580_s2 + $0xc0] sm:$0xff]  }
 0x124   :  { %v1550_v30 = vsel %vm1150_vm12, %v526_v17, %v1350_v50  ;;  %v6331_v5 = vsel %vm1154_vm14, %v528_v36, %v1354_v53  ;;  %2362 = vmatprep.subr.bf16.mxu1 %v5741_v1 }
 0x125   :  { %v644_v20 = vpop.f32.mrb[24].mxu1  ;;  %v1555_v7 = vsel %vm1155_vm15, %v530_v45, %v1355_v60  ;;  %v534_v9 = vpop.f32.mrb[24].mxu0  ;;  %v1724_v10 = vpack.c.bf16 %v6331_v5, %v6316_v44 }
 0x126   :  { %vm1269_vm0 = vcmp.ge.f32.partialorder %v644_v20, 0.0  ;;  %v1469_v16 = vmul.f32 0.01, %v644_v20  ;;  %v646_v11 = vpop.f32.mrb[25].mxu1  ;;  %vm1159_vm1 = vcmp.ge.f32.partialorder %v534_v9, 0.0  ;;  %v536_v17 = vpop.f32.mrb[25].mxu0  ;;  %v1725_v18 = vpack.c.bf16 %v1555_v7, %v1550_v30 }
 0x127   :  { %vm1270_vm2 = vcmp.ge.f32.partialorder %v646_v11, 0.0  ;;  %v1470_v21 = vmul.f32 0.01, %v646_v11  ;;  %v648_v22 = vpop.f32.mrb[26].mxu1  ;;  %v1359_v25 = vmul.f32 0.01, %v534_v9  ;;  %2363 = vmatpush1.bf16.msra.mxu1 %v5648_v62 }
 0x128   :  { %v6341_v31 = vsel %vm1269_vm0, %v644_v20, %v1469_v16  ;;  %vm1274_vm3 = vcmp.ge.f32.partialorder %v648_v22, 0.0  ;;  %v1474_v33 = vmul.f32 0.01, %v648_v22  ;;  %v650_v36 = vpop.f32.mrb[27].mxu1  ;;  %vm1160_vm4 = vcmp.ge.f32.partialorder %v536_v17, 0.0  ;;  %v538_v42 = vpop.f32.mrb[26].mxu0  ;;  %2364 = vmatprep.subr.bf16.mxu1 %v5741_v1 }
 0x129   :  { %v6344_v45 = vsel %vm1270_vm2, %v646_v11, %v1470_v21  ;;  %vm1275_vm5 = vcmp.ge.f32.partialorder %v650_v36, 0.0  ;;  %v1475_v50 = vmul.f32 0.01, %v650_v36  ;;  %v6347_v53 = vsel %vm1159_vm1, %v534_v9, %v1359_v25  ;;  %v540_v60 = vpop.f32.mrb[27].mxu0  ;;  %v5651_v9 = vld [vmem:[%s7580_s2 + $0xc8] sm:$0xff]   ;;  %v5652_v25 = vld [vmem:[%s7580_s2 + $0xd0] sm:$0xff]  }
 0x12a   :  { %v6349_v30 = vsel %vm1274_vm3, %v648_v22, %v1474_v33  ;;  %2220 = vmatmul.mubr.bf16.gmra.mrb[132].mxu1 %v1719_v13  ;;  %v1360_v62 = vmul.f32 0.01, %v536_v17  ;;  %vm1164_vm6 = vcmp.ge.f32.partialorder %v538_v42, 0.0  ;;  %v1364_v20 = vmul.f32 0.01, %v538_v42 }
 0x12b   :  { %v6354_v7 = vsel %vm1275_vm5, %v650_v36, %v1475_v50  ;;  %2227 = vmatprep.mubr.bf16.mxu1 %v1725_v18  ;;  %vm1165_vm7 = vcmp.ge.f32.partialorder %v540_v60, 0.0  ;;  %v1365_v16 = vmul.f32 0.01, %v540_v60  ;;  %2365 = vmatpush1.bf16.msra.mxu1 %v5649_v14 }
 0x12c   :  { %v1560_v21 = vsel %vm1160_vm4, %v536_v17, %v1360_v62  ;;  %v6362_v49 = vsel %vm1164_vm6, %v538_v42, %v1364_v20  ;;  %2366 = vmatprep.subr.bf16.mxu1 %v5741_v1 }
 0x12d   :  { %v654_v13 = vpop.f32.mrb[28].mxu1  ;;  %v1565_v18 = vsel %vm1165_vm7, %v540_v60, %v1365_v16  ;;  %v544_v22 = vpop.f32.mrb[28].mxu0  ;;  %v1729_v14 = vpack.c.bf16 %v6362_v49, %v6347_v53 }
 0x12e   :  { %vm1279_vm8 = vcmp.ge.f32.partialorder %v654_v13, 0.0  ;;  %v1479_v33 = vmul.f32 0.01, %v654_v13  ;;  %v656_v17 = vpop.f32.mrb[29].mxu1  ;;  %vm1169_vm9 = vcmp.ge.f32.partialorder %v544_v22, 0.0  ;;  %v546_v36 = vpop.f32.mrb[29].mxu0  ;;  %v1730_v42 = vpack.c.bf16 %v1565_v18, %v1560_v21 }
 0x12f   :  { %vm1280_vm10 = vcmp.ge.f32.partialorder %v656_v17, 0.0  ;;  %v1480_v50 = vmul.f32 0.01, %v656_v17  ;;  %v658_v62 = vpop.f32.mrb[30].mxu1  ;;  %v1369_v20 = vmul.f32 0.01, %v544_v22  ;;  %2367 = vmatpush1.bf16.msra.mxu1 %v5651_v9 }
 0x130   :  { %v6372_v60 = vsel %vm1279_vm8, %v654_v13, %v1479_v33  ;;  %vm1284_vm11 = vcmp.ge.f32.partialorder %v658_v62, 0.0  ;;  %v1484_v16 = vmul.f32 0.01, %v658_v62  ;;  %v660_v11 = vpop.f32.mrb[31].mxu1  ;;  %vm1170_vm12 = vcmp.ge.f32.partialorder %v546_v36, 0.0  ;;  %v548_v46 = vpop.f32.mrb[30].mxu0  ;;  %2368 = vmatprep.subr.bf16.mxu1 %v5741_v1 }
 0x131   :  { %v6375_v26 = vsel %vm1280_vm10, %v656_v17, %v1480_v50  ;;  %vm1285_vm13 = vcmp.ge.f32.partialorder %v660_v11, 0.0  ;;  %v1485_v59 = vmul.f32 0.01, %v660_v11  ;;  %v6378_v21 = vsel %vm1169_vm9, %v544_v22, %v1369_v20  ;;  %v550_v18 = vpop.f32.mrb[31].mxu0  ;;  %v5654_v22 = vld [vmem:[%s7580_s2 + $0xd8] sm:$0xff]  }
 0x132   :  { %v6380_v63 = vsel %vm1284_vm11, %v658_v62, %v1484_v16  ;;  %2228 = vmatmul.mubr.bf16.gmra.mrb[136].mxu1 %v1724_v10  ;;  %v1370_v9 = vmul.f32 0.01, %v546_v36  ;;  %vm1174_vm14 = vcmp.ge.f32.partialorder %v548_v46, 0.0  ;;  %v1374_v13 = vmul.f32 0.01, %v548_v46 }
 0x133   :  { %v6385_v33 = vsel %vm1285_vm13, %v660_v11, %v1485_v59  ;;  %2235 = vmatprep.mubr.bf16.mxu1 %v1730_v42  ;;  %vm1175_vm15 = vcmp.ge.f32.partialorder %v550_v18, 0.0  ;;  %v1375_v17 = vmul.f32 0.01, %v550_v18  ;;  %2369 = vmatpush1.bf16.msra.mxu1 %v5652_v25  ;;  %v5655_v42 = vld [vmem:[%s7580_s2 + $0xe0] sm:$0xff]  }
 0x134   :  { %v1570_v62 = vsel %vm1170_vm12, %v546_v36, %v1370_v9  ;;  %v6393_v44 = vsel %vm1174_vm14, %v548_v46, %v1374_v13  ;;  %2370 = vmatprep.subr.bf16.mxu1 %v5741_v1 }
 0x135   :  { %v664_v59 = vpop.f32.mrb[32].mxu1  ;;  %v1575_v10 = vsel %vm1175_vm15, %v550_v18, %v1375_v17  ;;  %v554_v11 = vpop.f32.mrb[32].mxu0  ;;  %v1734_v25 = vpack.c.bf16 %v6393_v44, %v6378_v21 }
 0x136   :  { %vm1289_vm0 = vcmp.ge.f32.partialorder %v664_v59, 0.0  ;;  %v1489_v20 = vmul.f32 0.01, %v664_v59  ;;  %v666_v36 = vpop.f32.mrb[33].mxu1  ;;  %vm1179_vm1 = vcmp.ge.f32.partialorder %v554_v11, 0.0  ;;  %v556_v46 = vpop.f32.mrb[33].mxu0  ;;  %v1735_v16 = vpack.c.bf16 %v1575_v10, %v1570_v62 }
 0x137   :  { %vm1290_vm2 = vcmp.ge.f32.partialorder %v666_v36, 0.0  ;;  %v1490_v9 = vmul.f32 0.01, %v666_v36  ;;  %v668_v13 = vpop.f32.mrb[34].mxu1  ;;  %v1379_v50 = vmul.f32 0.01, %v554_v11  ;;  %2371 = vmatpush1.bf16.msra.mxu1 %v5654_v22 }
 0x138   :  { %v6403_v18 = vsel %vm1289_vm0, %v664_v59, %v1489_v20  ;;  %vm1294_vm3 = vcmp.ge.f32.partialorder %v668_v13, 0.0  ;;  %v1494_v17 = vmul.f32 0.01, %v668_v13  ;;  %v670_v5 = vpop.f32.mrb[35].mxu1  ;;  %vm1180_vm4 = vcmp.ge.f32.partialorder %v556_v46, 0.0  ;;  %v558_v4 = vpop.f32.mrb[34].mxu0  ;;  %2372 = vmatprep.subr.bf16.mxu1 %v5741_v1 }
 0x139   :  { %v6406_v15 = vsel %vm1290_vm2, %v666_v36, %v1490_v9  ;;  %vm1295_vm5 = vcmp.ge.f32.partialorder %v670_v5, 0.0  ;;  %v1495_v6 = vmul.f32 0.01, %v670_v5  ;;  %v6409_v62 = vsel %vm1179_vm1, %v554_v11, %v1379_v50  ;;  %v560_v10 = vpop.f32.mrb[35].mxu0  ;;  %v5657_v50 = vld [vmem:[%s7580_s2 + $0xe8] sm:$0xff]  }
 0x13a   :  { %v6411_v41 = vsel %vm1294_vm3, %v668_v13, %v1494_v17  ;;  %2236 = vmatmul.mubr.bf16.gmra.mrb[140].mxu1 %v1729_v14  ;;  %v1380_v22 = vmul.f32 0.01, %v556_v46  ;;  %vm1184_vm6 = vcmp.ge.f32.partialorder %v558_v4, 0.0  ;;  %v1384_v59 = vmul.f32 0.01, %v558_v4 }
 0x13b   :  { %v6416_v20 = vsel %vm1295_vm5, %v670_v5, %v1495_v6  ;;  %2243 = vmatprep.mubr.bf16.mxu1 %v1735_v16  ;;  %vm1185_vm7 = vcmp.ge.f32.partialorder %v560_v10, 0.0  ;;  %v1385_v36 = vmul.f32 0.01, %v560_v10  ;;  %2373 = vmatpush1.bf16.msra.mxu1 %v5655_v42  ;;  %v5658_v16 = vld [vmem:[%s7580_s2 + $0xf0] sm:$0xff]  }
 0x13c   :  { %v1580_v9 = vsel %vm1180_vm4, %v556_v46, %v1380_v22  ;;  %v6424_v53 = vsel %vm1184_vm6, %v558_v4, %v1384_v59  ;;  %2374 = vmatprep.subr.bf16.mxu1 %v5741_v1 }
 0x13d   :  { %v707_v49 = vpop.f32.mrb[36].mxu1  ;;  %v1585_v14 = vsel %vm1185_vm7, %v560_v10, %v1385_v36  ;;  %v564_v5 = vpop.f32.mrb[36].mxu0  ;;  %v1739_v42 = vpack.c.bf16 %v6424_v53, %v6409_v62 }
 0x13e   :  { %vm1101_vm8 = vcmp.ge.f32.partialorder %v707_v49, 0.0  ;;  %v1301_v13 = vmul.f32 0.01, %v707_v49  ;;  %v709_v46 = vpop.f32.mrb[37].mxu1  ;;  %vm1189_vm9 = vcmp.ge.f32.partialorder %v564_v5, 0.0  ;;  %v566_v4 = vpop.f32.mrb[37].mxu0  ;;  %v1740_v17 = vpack.c.bf16 %v1585_v14, %v1580_v9 }
 0x13f   :  { %vm1102_vm10 = vcmp.ge.f32.partialorder %v709_v46, 0.0  ;;  %v1302_v22 = vmul.f32 0.01, %v709_v46  ;;  %v711_v59 = vpop.f32.mrb[38].mxu1  ;;  %v1389_v11 = vmul.f32 0.01, %v564_v5  ;;  %2375 = vmatpush1.bf16.msra.mxu1 %v5657_v50 }
 0x140   :  { %v6434_v10 = vsel %vm1101_vm8, %v707_v49, %v1301_v13  ;;  %vm1106_vm11 = vcmp.ge.f32.partialorder %v711_v59, 0.0  ;;  %v1306_v36 = vmul.f32 0.01, %v711_v59  ;;  %v713_v6 = vpop.f32.mrb[39].mxu1  ;;  %vm1190_vm12 = vcmp.ge.f32.partialorder %v566_v4, 0.0  ;;  %v568_v39 = vpop.f32.mrb[38].mxu0  ;;  %2376 = vmatprep.subr.bf16.mxu1 %v5741_v1 }
 0x141   :  { %7601 = vst [vmem:[#allocation2_spill] sm:$0xff] %v6434_v10  ;;  %v6437_v3 = vsel %vm1102_vm10, %v709_v46, %v1302_v22  ;;  %vm1107_vm13 = vcmp.ge.f32.partialorder %v713_v6, 0.0  ;;  %v1307_v57 = vmul.f32 0.01, %v713_v6  ;;  %v6440_v9 = vsel %vm1189_vm9, %v564_v5, %v1389_v11  ;;  %v570_v14 = vpop.f32.mrb[39].mxu0  ;;  %v5660_v11 = vld [vmem:[%s7580_s2 + $0xf8] sm:$0xff]  }
 0x142   :  { %v6442_v37 = vsel %vm1106_vm11, %v711_v59, %v1306_v36  ;;  %2244 = vmatmul.mubr.bf16.gmra.mrb[144].mxu1 %v1734_v25  ;;  %v1390_v50 = vmul.f32 0.01, %v566_v4  ;;  %vm1194_vm14 = vcmp.ge.f32.partialorder %v568_v39, 0.0  ;;  %v1394_v49 = vmul.f32 0.01, %v568_v39 }
 0x143   :  { %7602 = vst [vmem:[#allocation3_spill] sm:$0xff] %v6442_v37  ;;  %v6449_v46 = vsel %vm1107_vm13, %v713_v6, %v1307_v57  ;;  %2251 = vmatprep.mubr.bf16.mxu1 %v1740_v17  ;;  %vm1195_vm15 = vcmp.ge.f32.partialorder %v570_v14, 0.0  ;;  %v1395_v22 = vmul.f32 0.01, %v570_v14  ;;  %2377 = vmatpush1.bf16.msra.mxu1 %v5658_v16 }
 0x144   :  { %v1590_v5 = vsel %vm1190_vm12, %v566_v4, %v1390_v50  ;;  %v6455_v21 = vsel %vm1194_vm14, %v568_v39, %v1394_v49  ;;  %2378 = vmatprep.subr.bf16.mxu1 %v5741_v1 }
 0x145   :  { %v717_v25 = vpop.f32.mrb[40].mxu1  ;;  %v1595_v57 = vsel %vm1195_vm15, %v570_v14, %v1395_v22  ;;  %v574_v6 = vpop.f32.mrb[40].mxu0 }
 0x146   :  { %vm1111_vm0 = vcmp.ge.f32.partialorder %v717_v25, 0.0  ;;  %v1311_v16 = vmul.f32 0.01, %v717_v25  ;;  %v719_v59 = vpop.f32.mrb[41].mxu1  ;;  %vm1199_vm1 = vcmp.ge.f32.partialorder %v574_v6, 0.0  ;;  %v576_v36 = vpop.f32.mrb[41].mxu0  ;;  %v1745_v13 = vpack.c.bf16 %v1595_v57, %v1590_v5 }
 0x147   :  { %vm1112_vm2 = vcmp.ge.f32.partialorder %v719_v59, 0.0  ;;  %v1312_v39 = vmul.f32 0.01, %v719_v59  ;;  %v721_v4 = vpop.f32.mrb[42].mxu1  ;;  %v1399_v50 = vmul.f32 0.01, %v574_v6  ;;  %2379 = vmatpush1.bf16.msra.mxu1 %v5660_v11 }
 0x148   :  { %v6462_v1 = vsel %vm1111_vm0, %v717_v25, %v1311_v16  ;;  %vm1116_vm3 = vcmp.ge.f32.partialorder %v721_v4, 0.0  ;;  %v1316_v49 = vmul.f32 0.01, %v721_v4  ;;  %v723_v14 = vpop.f32.mrb[43].mxu1  ;;  %vm1200_vm4 = vcmp.ge.f32.partialorder %v576_v36, 0.0  ;;  %v578_v22 = vpop.f32.mrb[42].mxu0 }
 0x149   :  { %7603 = vst [vmem:[#allocation4_spill] sm:$0xff] %v6462_v1  ;;  %v6464_v44 = vsel %vm1112_vm2, %v719_v59, %v1312_v39  ;;  %vm1117_vm5 = vcmp.ge.f32.partialorder %v723_v14, 0.0  ;;  %v1317_v40 = vmul.f32 0.01, %v723_v14  ;;  %v6467_v17 = vsel %vm1199_vm1, %v574_v6, %v1399_v50  ;;  %v580_v5 = vpop.f32.mrb[43].mxu0 }
 0x14a   :  { %7604 = vst [vmem:[#allocation5_spill] sm:$0xff] %v6464_v44  ;;  %v6469_v57 = vsel %vm1116_vm3, %v721_v4, %v1316_v49  ;;  %2252 = vmatmul.mubr.bf16.gmra.mrb[148].mxu1 %v1739_v42  ;;  %v1400_v11 = vmul.f32 0.01, %v576_v36  ;;  %vm1204_vm6 = vcmp.ge.f32.partialorder %v578_v22, 0.0  ;;  %v1404_v25 = vmul.f32 0.01, %v578_v22 }
 0x14b   :  { %7605 = vst [vmem:[#allocation6_spill] sm:$0xff] %v6469_v57  ;;  %v6474_v16 = vsel %vm1117_vm5, %v723_v14, %v1317_v40  ;;  %2259 = vmatprep.mubr.bf16.mxu1 %v1745_v13  ;;  %vm1205_vm7 = vcmp.ge.f32.partialorder %v580_v5, 0.0  ;;  %v1405_v59 = vmul.f32 0.01, %v580_v5  ;;  %vm2094_vm0 = vcmask 523264  }
 0x14c   :  { %7606 = vst [vmem:[#allocation7_spill] sm:$0xff] %v6474_v16  ;;  %v1600_v6 = vsel %vm1200_vm4, %v576_v36, %v1400_v11  ;;  %v6479_v50 = vsel %vm1204_vm6, %v578_v22, %v1404_v25 }
 0x14d   :  { %v727_v62 = vpop.f32.mrb[44].mxu1  ;;  %v1605_v53 = vsel %vm1205_vm7, %v580_v5, %v1405_v59  ;;  %v5006_v40 = vpop.f32.mrb[44].mxu0 }
 0x14e   :  { %vm1121_vm8 = vcmp.ge.f32.partialorder %v727_v62, 0.0  ;;  %v1321_v13 = vmul.f32 0.01, %v727_v62  ;;  %v729_v49 = vpop.f32.mrb[45].mxu1  ;;  %v1750_v14 = vpack.c.bf16 %v1605_v53, %v1600_v6  ;;  %vm1113_vm9 = vcmp.ge.f32.partialorder %v5006_v40, 0.0  ;;  %v940_v10 = vpop.f32.mrb[45].mxu0 }
 0x14f   :  { %vm1122_vm10 = vcmp.ge.f32.partialorder %v729_v49, 0.0  ;;  %v1322_v39 = vmul.f32 0.01, %v729_v49  ;;  %v731_v36 = vpop.f32.mrb[46].mxu1  ;;  %v1313_v22 = vmul.f32 0.01, %v5006_v40  ;;  %v7608_v53 = vpack.c.bf16 %v6455_v21, %v6440_v9 }
 0x150   :  { %v6485_v11 = vsel %vm1121_vm8, %v727_v62, %v1321_v13  ;;  %vm1126_vm11 = vcmp.ge.f32.partialorder %v731_v36, 0.0  ;;  %v1326_v25 = vmul.f32 0.01, %v731_v36  ;;  %v733_v4 = vpop.f32.mrb[47].mxu1  ;;  %vm1103_vm12 = vcmp.ge.f32.partialorder %v940_v10, 0.0  ;;  %v5007_v5 = vpop.f32.mrb[46].mxu0 }
 0x151   :  { %7607 = vst [vmem:[#allocation8_spill] sm:$0xff] %v6485_v11  ;;  %v6487_v59 = vsel %vm1122_vm10, %v729_v49, %v1322_v39  ;;  %vm1127_vm13 = vcmp.ge.f32.partialorder %v733_v4, 0.0  ;;  %v1327_v42 = vmul.f32 0.01, %v733_v4  ;;  %v1513_v1 = vsel %vm1113_vm9, %v5006_v40, %v1313_v22  ;;  %v943_v57 = vpop.f32.mrb[47].mxu0 }
 0x152   :  { %v6489_v6 = vsel %vm1126_vm11, %v731_v36, %v1326_v25  ;;  %2260 = vmatmul.mubr.bf16.gmra.mrb[152].mxu1 %v7608_v53  ;;  %v1303_v44 = vmul.f32 0.01, %v940_v10  ;;  %vm1118_vm14 = vcmp.ge.f32.partialorder %v5007_v5, 0.0  ;;  %v1318_v62 = vmul.f32 0.01, %v5007_v5 }
 0x153   :  { %v6494_v13 = vsel %vm1127_vm13, %v733_v4, %v1327_v42  ;;  %2267 = vmatprep.mubr.bf16.mxu1 %v1750_v14  ;;  %vm1108_vm15 = vcmp.ge.f32.partialorder %v943_v57, 0.0  ;;  %v1308_v16 = vmul.f32 0.01, %v943_v57 }
 0x154   :  { %v1503_v40 = vsel %vm1103_vm12, %v940_v10, %v1303_v44  ;;  %v1518_v49 = vsel %vm1118_vm14, %v5007_v5, %v1318_v62 }
 0x155   :  { %v737_v22 = vpop.f32.mrb[48].mxu1  ;;  %v1708_v9 = vpack.c.bf16 %v1518_v49, %v1513_v1  ;;  %v1508_v21 = vsel %vm1108_vm15, %v943_v57, %v1308_v16  ;;  %v5010_v25 = vpop.f32.mrb[48].mxu0 }
 0x156   :  { %vm1131_vm1 = vcmp.ge.f32.partialorder %v737_v22, 0.0  ;;  %v1331_v4 = vmul.f32 0.01, %v737_v22  ;;  %v739_v42 = vpop.f32.mrb[49].mxu1  ;;  %v1703_v14 = vpack.c.bf16 %v1508_v21, %v1503_v40  ;;  %vm1133_vm2 = vcmp.ge.f32.partialorder %v5010_v25, 0.0  ;;  %v956_v53 = vpop.f32.mrb[49].mxu0 }
 0x157   :  { %vm1132_vm3 = vcmp.ge.f32.partialorder %v739_v42, 0.0  ;;  %v1332_v37 = vmul.f32 0.01, %v739_v42  ;;  %v741_v39 = vpop.f32.mrb[50].mxu1  ;;  %v1333_v11 = vmul.f32 0.01, %v5010_v25 }
 0x158   :  { %v6501_v10 = vsel %vm1131_vm1, %v737_v22, %v1331_v4  ;;  %vm1136_vm4 = vcmp.ge.f32.partialorder %v741_v39, 0.0  ;;  %v1336_v44 = vmul.f32 0.01, %v741_v39  ;;  %v743_v5 = vpop.f32.mrb[51].mxu1  ;;  %5052 = vmatprep.mubr.msk.bf16.mxu0 %vm2094_vm0, %v1703_v14  ;;  %vm1123_vm5 = vcmp.ge.f32.partialorder %v956_v53, 0.0  ;;  %v5011_v1 = vpop.f32.mrb[50].mxu0 }
 0x159   :  { %7609 = vst [vmem:[#allocation9_spill] sm:$0xff] %v6501_v10  ;;  %v6504_v57 = vsel %vm1132_vm3, %v739_v42, %v1332_v37  ;;  %vm1137_vm6 = vcmp.ge.f32.partialorder %v743_v5, 0.0  ;;  %v1337_v16 = vmul.f32 0.01, %v743_v5  ;;  %5053 = vmatmul.mubr.msk.bf16.vlgmr.msra.gmra.mrb[84].mxu0 %vm2094_vm0, %v1708_v9  ;;  %v1533_v62 = vsel %vm1133_vm2, %v5010_v25, %v1333_v11  ;;  %v959_v40 = vpop.f32.mrb[51].mxu0 }
 0x15a   :  { %v6508_v49 = vsel %vm1136_vm4, %v741_v39, %v1336_v44  ;;  %v7610_v22 = vpack.c.bf16 %v6479_v50, %v6467_v17  ;;  %v1323_v21 = vmul.f32 0.01, %v956_v53  ;;  %vm1138_vm7 = vcmp.ge.f32.partialorder %v5011_v1, 0.0 }
 0x15b   :  { %v1338_v4 = vmul.f32 0.01, %v5011_v1  ;;  %v6513_v14 = vsel %vm1137_vm6, %v743_v5, %v1337_v16  ;;  %v7611_v37 = vpack.c.bf16 %v6176_v35, %v6169_v28  ;;  %vm1128_vm8 = vcmp.ge.f32.partialorder %v959_v40, 0.0 }
 0x15c   :  { %2268 = vmatmul.mubr.bf16.gmra.mrb[156].mxu1 %v7610_v22  ;;  %v1328_v9 = vmul.f32 0.01, %v959_v40  ;;  %v1523_v39 = vsel %vm1123_vm5, %v956_v53, %v1323_v21 }
 0x15d   :  { %2275 = vmatprep.mubr.bf16.mxu1 %v7611_v37  ;;  %v1538_v25 = vsel %vm1138_vm7, %v5011_v1, %v1338_v4  ;;  %v747_v50 = vpop.f32.mrb[52].mxu1  ;;  %v5014_v5 = vpop.f32.mrb[52].mxu0 }
 0x15e   :  { %v1718_v42 = vpack.c.bf16 %v1538_v25, %v1533_v62  ;;  %v1528_v44 = vsel %vm1128_vm8, %v959_v40, %v1328_v9  ;;  %vm1141_vm9 = vcmp.ge.f32.partialorder %v747_v50, 0.0  ;;  %v1341_v16 = vmul.f32 0.01, %v747_v50  ;;  %v749_v22 = vpop.f32.mrb[53].mxu1  ;;  %v972_v35 = vpop.f32.mrb[53].mxu0 }
 0x15f   :  { %v1713_v28 = vpack.c.bf16 %v1528_v44, %v1523_v39  ;;  %vm1153_vm10 = vcmp.ge.f32.partialorder %v5014_v5, 0.0  ;;  %vm1142_vm11 = vcmp.ge.f32.partialorder %v749_v22, 0.0  ;;  %v1342_v37 = vmul.f32 0.01, %v749_v22  ;;  %v751_v36 = vpop.f32.mrb[54].mxu1  ;;  %v5015_v62 = vpop.f32.mrb[54].mxu0 }
 0x160   :  { %v1353_v11 = vmul.f32 0.01, %v5014_v5  ;;  %v6523_v10 = vsel %vm1141_vm9, %v747_v50, %v1341_v16  ;;  %vm1146_vm12 = vcmp.ge.f32.partialorder %v751_v36, 0.0  ;;  %v1346_v53 = vmul.f32 0.01, %v751_v36  ;;  %v753_v1 = vpop.f32.mrb[55].mxu1 }
 0x161   :  { %5056 = vmatprep.mubr.msk.bf16.mxu0 %vm2094_vm0, %v1713_v28  ;;  %vm1143_vm13 = vcmp.ge.f32.partialorder %v972_v35, 0.0  ;;  %v6526_v40 = vsel %vm1142_vm11, %v749_v22, %v1342_v37  ;;  %vm1147_vm14 = vcmp.ge.f32.partialorder %v753_v1, 0.0  ;;  %v1347_v21 = vmul.f32 0.01, %v753_v1  ;;  %v975_v9 = vpop.f32.mrb[55].mxu0 }
 0x162   :  { %5057 = vmatmul.mubr.msk.bf16.gmra.mrb[88].mxu0 %vm2094_vm0, %v1718_v42  ;;  %v1553_v4 = vsel %vm1153_vm10, %v5014_v5, %v1353_v11  ;;  %v6530_v39 = vsel %vm1146_vm12, %v751_v36, %v1346_v53  ;;  %v7612_v25 = vpack.c.bf16 %v6173_v32, %v6167_v24  ;;  %v1343_v50 = vmul.f32 0.01, %v972_v35 }
 0x163   :  { %vm1158_vm15 = vcmp.ge.f32.partialorder %v5015_v62, 0.0  ;;  %v1358_v44 = vmul.f32 0.01, %v5015_v62  ;;  %v6535_v16 = vsel %vm1147_vm14, %v753_v1, %v1347_v21  ;;  %v7613_v22 = vpack.c.bf16 %v6198_v0, %v6190_v56 }
 0x164   :  { %2276 = vmatmul.mubr.bf16.gmra.mrb[160].mxu1 %v7612_v25  ;;  %vm1148_vm1 = vcmp.ge.f32.partialorder %v975_v9, 0.0  ;;  %v1348_v42 = vmul.f32 0.01, %v975_v9  ;;  %v1543_v36 = vsel %vm1143_vm13, %v972_v35, %v1343_v50 }
 0x165   :  { %2283 = vmatprep.mubr.bf16.mxu1 %v7613_v22  ;;  %v1558_v5 = vsel %vm1158_vm15, %v5015_v62, %v1358_v44  ;;  %v757_v32 = vpop.f32.mrb[56].mxu1  ;;  %v5018_v53 = vpop.f32.mrb[56].mxu0 }
 0x166   :  { %v1728_v28 = vpack.c.bf16 %v1558_v5, %v1553_v4  ;;  %v1548_v37 = vsel %vm1148_vm1, %v975_v9, %v1348_v42  ;;  %vm1151_vm2 = vcmp.ge.f32.partialorder %v757_v32, 0.0  ;;  %v1351_v1 = vmul.f32 0.01, %v757_v32  ;;  %v759_v21 = vpop.f32.mrb[57].mxu1  ;;  %v988_v0 = vpop.f32.mrb[57].mxu0 }
 0x167   :  { %v1723_v56 = vpack.c.bf16 %v1548_v37, %v1543_v36  ;;  %vm1173_vm3 = vcmp.ge.f32.partialorder %v5018_v53, 0.0  ;;  %vm1152_vm4 = vcmp.ge.f32.partialorder %v759_v21, 0.0  ;;  %v1352_v25 = vmul.f32 0.01, %v759_v21  ;;  %v761_v22 = vpop.f32.mrb[58].mxu1  ;;  %v5019_v4 = vpop.f32.mrb[58].mxu0 }
 0x168   :  { %v1373_v11 = vmul.f32 0.01, %v5018_v53  ;;  %v6545_v17 = vsel %vm1151_vm2, %v757_v32, %v1351_v1  ;;  %vm1156_vm5 = vcmp.ge.f32.partialorder %v761_v22, 0.0  ;;  %v1356_v35 = vmul.f32 0.01, %v761_v22  ;;  %v763_v62 = vpop.f32.mrb[59].mxu1 }
 0x169   :  { %5060 = vmatprep.mubr.msk.bf16.mxu0 %vm2094_vm0, %v1723_v56  ;;  %vm1163_vm6 = vcmp.ge.f32.partialorder %v988_v0, 0.0  ;;  %v6548_v9 = vsel %vm1152_vm4, %v759_v21, %v1352_v25  ;;  %vm1157_vm7 = vcmp.ge.f32.partialorder %v763_v62, 0.0  ;;  %v1357_v50 = vmul.f32 0.01, %v763_v62  ;;  %v991_v42 = vpop.f32.mrb[59].mxu0 }
 0x16a   :  { %5061 = vmatmul.mubr.msk.bf16.gmra.mrb[92].mxu0 %vm2094_vm0, %v1728_v28  ;;  %v1573_v44 = vsel %vm1173_vm3, %v5018_v53, %v1373_v11  ;;  %v6552_v36 = vsel %vm1156_vm5, %v761_v22, %v1356_v35  ;;  %v7614_v5 = vpack.c.bf16 %v6195_v61, %v6188_v52  ;;  %v1363_v32 = vmul.f32 0.01, %v988_v0 }
 0x16b   :  { %vm1178_vm8 = vcmp.ge.f32.partialorder %v5019_v4, 0.0  ;;  %v1378_v37 = vmul.f32 0.01, %v5019_v4  ;;  %v6557_v1 = vsel %vm1157_vm7, %v763_v62, %v1357_v50  ;;  %v7615_v21 = vpack.c.bf16 %v6227_v34, %v6217_v23 }
 0x16c   :  { %2284 = vmatmul.mubr.bf16.gmra.mrb[164].mxu1 %v7614_v5  ;;  %vm1168_vm9 = vcmp.ge.f32.partialorder %v991_v42, 0.0  ;;  %v1368_v11 = vmul.f32 0.01, %v991_v42  ;;  %v1563_v52 = vsel %vm1163_vm6, %v988_v0, %v1363_v32 }
 0x16d   :  { %2291 = vmatprep.mubr.bf16.mxu1 %v7615_v21  ;;  %v1578_v61 = vsel %vm1178_vm8, %v5019_v4, %v1378_v37  ;;  %v767_v56 = vpop.f32.mrb[60].mxu1  ;;  %v5022_v35 = vpop.f32.mrb[60].mxu0 }
 0x16e   :  { %v1738_v25 = vpack.c.bf16 %v1578_v61, %v1573_v44  ;;  %v1568_v22 = vsel %vm1168_vm9, %v991_v42, %v1368_v11  ;;  %vm1161_vm10 = vcmp.ge.f32.partialorder %v767_v56, 0.0  ;;  %v1361_v62 = vmul.f32 0.01, %v767_v56  ;;  %v769_v50 = vpop.f32.mrb[61].mxu1  ;;  %v1004_v34 = vpop.f32.mrb[61].mxu0 }
 0x16f   :  { %v1733_v23 = vpack.c.bf16 %v1568_v22, %v1563_v52  ;;  %vm1193_vm11 = vcmp.ge.f32.partialorder %v5022_v35, 0.0  ;;  %vm1162_vm12 = vcmp.ge.f32.partialorder %v769_v50, 0.0  ;;  %v1362_v5 = vmul.f32 0.01, %v769_v50  ;;  %v771_v21 = vpop.f32.mrb[62].mxu1  ;;  %v5023_v4 = vpop.f32.mrb[62].mxu0 }
 0x170   :  { %v1393_v28 = vmul.f32 0.01, %v5022_v35  ;;  %v6567_v24 = vsel %vm1161_vm10, %v767_v56, %v1361_v62  ;;  %vm1166_vm13 = vcmp.ge.f32.partialorder %v771_v21, 0.0  ;;  %v1366_v53 = vmul.f32 0.01, %v771_v21  ;;  %v773_v0 = vpop.f32.mrb[63].mxu1 }
 0x171   :  { %5064 = vmatprep.mubr.msk.bf16.mxu0 %vm2094_vm0, %v1733_v23  ;;  %vm1183_vm14 = vcmp.ge.f32.partialorder %v1004_v34, 0.0  ;;  %v6570_v44 = vsel %vm1162_vm12, %v769_v50, %v1362_v5  ;;  %vm1167_vm15 = vcmp.ge.f32.partialorder %v773_v0, 0.0  ;;  %v1367_v42 = vmul.f32 0.01, %v773_v0  ;;  %v1007_v37 = vpop.f32.mrb[63].mxu0 }
 0x172   :  { %5065 = vmatmul.mubr.msk.bf16.gmra.mrb[96].mxu0 %vm2094_vm0, %v1738_v25  ;;  %v1593_v32 = vsel %vm1193_vm11, %v5022_v35, %v1393_v28  ;;  %v6574_v11 = vsel %vm1166_vm13, %v771_v21, %v1366_v53  ;;  %v7616_v52 = vpack.c.bf16 %v6222_v29, %v6215_v19  ;;  %v1383_v61 = vmul.f32 0.01, %v1004_v34 }
 0x173   :  { %vm1198_vm1 = vcmp.ge.f32.partialorder %v5023_v4, 0.0  ;;  %v1398_v56 = vmul.f32 0.01, %v5023_v4  ;;  %v6579_v22 = vsel %vm1167_vm15, %v773_v0, %v1367_v42  ;;  %v7617_v62 = vpack.c.bf16 %v6258_v12, %v6248_v2 }
 0x174   :  { %2292 = vmatmul.mubr.bf16.gmra.mrb[168].mxu1 %v7616_v52  ;;  %vm1188_vm2 = vcmp.ge.f32.partialorder %v1007_v37, 0.0  ;;  %v1388_v28 = vmul.f32 0.01, %v1007_v37  ;;  %v1583_v19 = vsel %vm1183_vm14, %v1004_v34, %v1383_v61 }
 0x175   :  { %2299 = vmatprep.mubr.bf16.mxu1 %v7617_v62  ;;  %v1598_v29 = vsel %vm1198_vm1, %v5023_v4, %v1398_v56  ;;  %v777_v35 = vpop.f32.mrb[64].mxu1  ;;  %v5026_v5 = vpop.f32.mrb[64].mxu0 }
 0x176   :  { %v1748_v50 = vpack.c.bf16 %v1598_v29, %v1593_v32  ;;  %v1588_v23 = vsel %vm1188_vm2, %v1007_v37, %v1388_v28  ;;  %vm1171_vm3 = vcmp.ge.f32.partialorder %v777_v35, 0.0  ;;  %v1371_v21 = vmul.f32 0.01, %v777_v35  ;;  %v779_v0 = vpop.f32.mrb[65].mxu1  ;;  %v1020_v12 = vpop.f32.mrb[65].mxu0 }
 0x177   :  { %v1743_v2 = vpack.c.bf16 %v1588_v23, %v1583_v19  ;;  %vm1213_vm4 = vcmp.ge.f32.partialorder %v5026_v5, 0.0  ;;  %vm1172_vm5 = vcmp.ge.f32.partialorder %v779_v0, 0.0  ;;  %v1372_v42 = vmul.f32 0.01, %v779_v0  ;;  %v781_v52 = vpop.f32.mrb[66].mxu1  ;;  %v5027_v4 = vpop.f32.mrb[66].mxu0 }
 0x178   :  { %v1413_v62 = vmul.f32 0.01, %v5026_v5  ;;  %v6589_v25 = vsel %vm1171_vm3, %v777_v35, %v1371_v21  ;;  %vm1176_vm6 = vcmp.ge.f32.partialorder %v781_v52, 0.0  ;;  %v1376_v53 = vmul.f32 0.01, %v781_v52  ;;  %v783_v34 = vpop.f32.mrb[67].mxu1 }
 0x179   :  { %5068 = vmatprep.mubr.msk.bf16.mxu0 %vm2094_vm0, %v1743_v2  ;;  %vm1203_vm7 = vcmp.ge.f32.partialorder %v1020_v12, 0.0  ;;  %v6592_v32 = vsel %vm1172_vm5, %v779_v0, %v1372_v42  ;;  %vm1177_vm8 = vcmp.ge.f32.partialorder %v783_v34, 0.0  ;;  %v1377_v37 = vmul.f32 0.01, %v783_v34  ;;  %v1023_v56 = vpop.f32.mrb[67].mxu0 }
 0x17a   :  { %5069 = vmatmul.mubr.msk.bf16.gmra.mrb[100].mxu0 %vm2094_vm0, %v1748_v50  ;;  %v1613_v61 = vsel %vm1213_vm4, %v5026_v5, %v1413_v62  ;;  %v6596_v28 = vsel %vm1176_vm6, %v781_v52, %v1376_v53  ;;  %v7618_v19 = vpack.c.bf16 %v6253_v8, %v6245_v58  ;;  %v1403_v29 = vmul.f32 0.01, %v1020_v12 }
 0x17b   :  { %vm1218_vm9 = vcmp.ge.f32.partialorder %v5027_v4, 0.0  ;;  %v1418_v35 = vmul.f32 0.01, %v5027_v4  ;;  %v6601_v23 = vsel %vm1177_vm8, %v783_v34, %v1377_v37  ;;  %v7619_v21 = vpack.c.bf16 %v6289_v55, %v6279_v47 }
 0x17c   :  { %2300 = vmatmul.mubr.bf16.gmra.mrb[172].mxu1 %v7618_v19  ;;  %vm1208_vm10 = vcmp.ge.f32.partialorder %v1023_v56, 0.0  ;;  %v1408_v5 = vmul.f32 0.01, %v1023_v56  ;;  %v1603_v58 = vsel %vm1203_vm7, %v1020_v12, %v1403_v29  ;;  %v7620_v29 = vpack.c.bf16 %v6284_v51, %v6276_v43  ;;  %v7642_v43 = vld [vmem:[#allocation4_spill] sm:$0xff] }
 0x17d   :  { %2307 = vmatprep.mubr.bf16.mxu1 %v7619_v21  ;;  %v1618_v8 = vsel %vm1218_vm9, %v5027_v4, %v1418_v35  ;;  %v787_v0 = vpop.f32.mrb[68].mxu1  ;;  %v5030_v52 = vpop.f32.mrb[68].mxu0 }
 0x17e   :  { %v1758_v2 = vpack.c.bf16 %v1618_v8, %v1613_v61  ;;  %v1608_v42 = vsel %vm1208_vm10, %v1023_v56, %v1408_v5  ;;  %vm1181_vm11 = vcmp.ge.f32.partialorder %v787_v0, 0.0  ;;  %v1381_v62 = vmul.f32 0.01, %v787_v0  ;;  %v789_v34 = vpop.f32.mrb[69].mxu1  ;;  %v1036_v55 = vpop.f32.mrb[69].mxu0 }
 0x17f   :  { %v1753_v47 = vpack.c.bf16 %v1608_v42, %v1603_v58  ;;  %vm1233_vm12 = vcmp.ge.f32.partialorder %v5030_v52, 0.0  ;;  %vm1182_vm13 = vcmp.ge.f32.partialorder %v789_v34, 0.0  ;;  %v1382_v37 = vmul.f32 0.01, %v789_v34  ;;  %v791_v19 = vpop.f32.mrb[70].mxu1  ;;  %v5031_v58 = vpop.f32.mrb[70].mxu0 }
 0x180   :  { %v1433_v21 = vmul.f32 0.01, %v5030_v52  ;;  %vm1186_vm14 = vcmp.ge.f32.partialorder %v791_v19, 0.0  ;;  %v1386_v50 = vmul.f32 0.01, %v791_v19  ;;  %v793_v53 = vpop.f32.mrb[71].mxu1  ;;  %v6612_v12 = vsel %vm1181_vm11, %v787_v0, %v1381_v62 }
 0x181   :  { %5072 = vmatprep.mubr.msk.bf16.mxu0 %vm2094_vm0, %v1753_v47  ;;  %vm1187_vm15 = vcmp.ge.f32.partialorder %v793_v53, 0.0  ;;  %v1387_v4 = vmul.f32 0.01, %v793_v53  ;;  %vm1223_vm1 = vcmp.ge.f32.partialorder %v1036_v55, 0.0  ;;  %v6615_v61 = vsel %vm1182_vm13, %v789_v34, %v1382_v37  ;;  %v1039_v42 = vpop.f32.mrb[71].mxu0 }
 0x182   :  { %5073 = vmatmul.mubr.msk.bf16.gmra.mrb[104].mxu0 %vm2094_vm0, %v1758_v2  ;;  %v6617_v56 = vsel %vm1186_vm14, %v791_v19, %v1386_v50  ;;  %v1633_v35 = vsel %vm1233_vm12, %v5030_v52, %v1433_v21  ;;  %v1423_v5 = vmul.f32 0.01, %v1036_v55  ;;  %v7621_v0 = vpack.c.bf16 %v6323_v54, %v6313_v38 }
 0x183   :  { %v6623_v8 = vsel %vm1187_vm15, %v793_v53, %v1387_v4  ;;  %vm1238_vm2 = vcmp.ge.f32.partialorder %v5031_v58, 0.0  ;;  %v1438_v50 = vmul.f32 0.01, %v5031_v58  ;;  %vm1228_vm3 = vcmp.ge.f32.partialorder %v1039_v42, 0.0 }
 0x184   :  { %2308 = vmatmul.mubr.bf16.gmra.mrb[176].mxu1 %v7620_v29  ;;  %v1623_v51 = vsel %vm1223_vm1, %v1036_v55, %v1423_v5  ;;  %v1428_v52 = vmul.f32 0.01, %v1039_v42 }
 0x185   :  { %2315 = vmatprep.mubr.bf16.mxu1 %v7621_v0  ;;  %v797_v62 = vpop.f32.mrb[72].mxu1  ;;  %v1638_v34 = vsel %vm1238_vm2, %v5031_v58, %v1438_v50 }
 0x186   :  { %v1391_v53 = vmul.f32 0.01, %v797_v62  ;;  %v799_v47 = vpop.f32.mrb[73].mxu1  ;;  %v1768_v37 = vpack.c.bf16 %v1638_v34, %v1633_v35  ;;  %v1628_v19 = vsel %vm1228_vm3, %v1039_v42, %v1428_v52  ;;  %vm1191_vm4 = vcmp.ge.f32.partialorder %v797_v62, 0.0  ;;  %v5034_v52 = vpop.f32.mrb[72].mxu0 }
 0x187   :  { %v1392_v38 = vmul.f32 0.01, %v799_v47  ;;  %v801_v54 = vpop.f32.mrb[74].mxu1  ;;  %v1763_v21 = vpack.c.bf16 %v1628_v19, %v1623_v51  ;;  %vm1192_vm5 = vcmp.ge.f32.partialorder %v799_v47, 0.0  ;;  %v7622_v35 = vpack.c.bf16 %v6318_v48, %v6310_v27  ;;  %v1052_v34 = vpop.f32.mrb[73].mxu0 }
 0x188   :  { %vm1196_vm6 = vcmp.ge.f32.partialorder %v801_v54, 0.0  ;;  %v1396_v4 = vmul.f32 0.01, %v801_v54  ;;  %v803_v29 = vpop.f32.mrb[75].mxu1  ;;  %v6633_v55 = vsel %vm1191_vm4, %v797_v62, %v1391_v53  ;;  %v7623_v42 = vpack.c.bf16 %v6354_v7, %v6344_v45 }
 0x189   :  { %vm1197_vm7 = vcmp.ge.f32.partialorder %v803_v29, 0.0  ;;  %v1397_v0 = vmul.f32 0.01, %v803_v29  ;;  %5076 = vmatprep.mubr.msk.bf16.mxu0 %vm2094_vm0, %v1763_v21  ;;  %v6641_v58 = vsel %vm1192_vm5, %v799_v47, %v1392_v38  ;;  %vm1253_vm10 = vcmp.ge.f32.partialorder %v5034_v52, 0.0 }
 0x18a   :  { %v6635_v5 = vsel %vm1196_vm6, %v801_v54, %v1396_v4  ;;  %5077 = vmatmul.mubr.msk.bf16.gmra.mrb[108].mxu0 %vm2094_vm0, %v1768_v37  ;;  %v1453_v37 = vmul.f32 0.01, %v5034_v52  ;;  %v1443_v38 = vmul.f32 0.01, %v1052_v34  ;;  %vm1243_vm13 = vcmp.ge.f32.partialorder %v1052_v34, 0.0 }
 0x18b   :  { %v6643_v50 = vsel %vm1197_vm7, %v803_v29, %v1397_v0  ;;  %v7624_v0 = vpack.c.bf16 %v6349_v30, %v6341_v31  ;;  %v7625_v62 = vpack.c.bf16 %v6385_v33, %v6375_v26 }
 0x18c   :  { %2316 = vmatmul.mubr.bf16.gmra.mrb[180].mxu1 %v7622_v35  ;;  %v1653_v35 = vsel %vm1253_vm10, %v5034_v52, %v1453_v37 }
 0x18d   :  { %2323 = vmatprep.mubr.bf16.mxu1 %v7623_v42  ;;  %v807_v27 = vpop.f32.mrb[76].mxu1  ;;  %v5035_v42 = vpop.f32.mrb[74].mxu0 }
 0x18e   :  { %v1401_v48 = vmul.f32 0.01, %v807_v27  ;;  %v809_v53 = vpop.f32.mrb[77].mxu1  ;;  %vm1201_vm8 = vcmp.ge.f32.partialorder %v807_v27, 0.0  ;;  %vm1258_vm14 = vcmp.ge.f32.partialorder %v5035_v42, 0.0 }
 0x18f   :  { %vm1202_vm9 = vcmp.ge.f32.partialorder %v809_v53, 0.0  ;;  %v1402_v47 = vmul.f32 0.01, %v809_v53  ;;  %v811_v19 = vpop.f32.mrb[78].mxu1 }
 0x190   :  { %vm1206_vm11 = vcmp.ge.f32.partialorder %v811_v19, 0.0  ;;  %v1406_v45 = vmul.f32 0.01, %v811_v19  ;;  %v813_v7 = vpop.f32.mrb[79].mxu1  ;;  %v6652_v21 = vsel %vm1201_vm8, %v807_v27, %v1401_v48  ;;  %v1458_v48 = vmul.f32 0.01, %v5035_v42 }
 0x191   :  { %vm1207_vm12 = vcmp.ge.f32.partialorder %v813_v7, 0.0  ;;  %v1407_v54 = vmul.f32 0.01, %v813_v7  ;;  %v6654_v4 = vsel %vm1202_vm9, %v809_v53, %v1402_v47  ;;  %v1055_v53 = vpop.f32.mrb[75].mxu0 }
 0x192   :  { %v6656_v29 = vsel %vm1206_vm11, %v811_v19, %v1406_v45  ;;  %v1643_v19 = vsel %vm1243_vm13, %v1052_v34, %v1443_v38  ;;  %vm1248_vm15 = vcmp.ge.f32.partialorder %v1055_v53, 0.0  ;;  %v1448_v31 = vmul.f32 0.01, %v1055_v53 }
 0x193   :  { %v6661_v51 = vsel %vm1207_vm12, %v813_v7, %v1407_v54  ;;  %v1658_v52 = vsel %vm1258_vm14, %v5035_v42, %v1458_v48 }
 0x194   :  { %2324 = vmatmul.mubr.bf16.gmra.mrb[184].mxu1 %v7624_v0  ;;  %v1778_v7 = vpack.c.bf16 %v1658_v52, %v1653_v35  ;;  %v1648_v54 = vsel %vm1248_vm15, %v1055_v53, %v1448_v31  ;;  %v7626_v35 = vpack.c.bf16 %v6380_v63, %v6372_v60  ;;  %v7627_v53 = vpack.c.bf16 %v6416_v20, %v6406_v15  ;;  %v5038_v31 = vpop.f32.mrb[76].mxu0 }
 0x195   :  { %2331 = vmatprep.mubr.bf16.mxu1 %v7625_v62  ;;  %v817_v30 = vpop.f32.mrb[80].mxu1  ;;  %v1773_v62 = vpack.c.bf16 %v1648_v54, %v1643_v19  ;;  %v1068_v52 = vpop.f32.mrb[77].mxu0  ;;  %vm1273_vm7 = vcmp.ge.f32.partialorder %v5038_v31, 0.0 }
 0x196   :  { %v1411_v37 = vmul.f32 0.01, %v817_v30  ;;  %v819_v45 = vpop.f32.mrb[81].mxu1  ;;  %vm1211_vm1 = vcmp.ge.f32.partialorder %v817_v30, 0.0  ;;  %vm1263_vm10 = vcmp.ge.f32.partialorder %v1068_v52, 0.0 }
 0x197   :  { %v1412_v26 = vmul.f32 0.01, %v819_v45  ;;  %v821_v33 = vpop.f32.mrb[82].mxu1  ;;  %vm1212_vm2 = vcmp.ge.f32.partialorder %v819_v45, 0.0  ;;  %5080 = vmatprep.mubr.msk.bf16.mxu0 %vm2094_vm0, %v1773_v62 }
 0x198   :  { %vm1216_vm3 = vcmp.ge.f32.partialorder %v821_v33, 0.0  ;;  %v1416_v0 = vmul.f32 0.01, %v821_v33  ;;  %v823_v27 = vpop.f32.mrb[83].mxu1  ;;  %v6671_v34 = vsel %vm1211_vm1, %v817_v30, %v1411_v37  ;;  %5081 = vmatmul.mubr.msk.bf16.gmra.mrb[112].mxu0 %vm2094_vm0, %v1778_v7  ;;  %v1473_v7 = vmul.f32 0.01, %v5038_v31 }
 0x199   :  { %vm1217_vm4 = vcmp.ge.f32.partialorder %v823_v27, 0.0  ;;  %v1417_v2 = vmul.f32 0.01, %v823_v27  ;;  %v6679_v42 = vsel %vm1212_vm2, %v819_v45, %v1412_v26  ;;  %v1463_v45 = vmul.f32 0.01, %v1068_v52 }
 0x19a   :  { %v6673_v38 = vsel %vm1216_vm3, %v821_v33, %v1416_v0  ;;  %v7629_v0 = vpack.c.bf16 %v6411_v41, %v6403_v18  ;;  %v7630_v30 = vpack.c.bf16 %v6449_v46, %v6437_v3 }
 0x19b   :  { %v6681_v48 = vsel %vm1217_vm4, %v823_v27, %v1417_v2 }
 0x19c   :  { %2332 = vmatmul.mubr.bf16.gmra.mrb[188].mxu1 %v7626_v35  ;;  %v1673_v35 = vsel %vm1273_vm7, %v5038_v31, %v1473_v7 }
 0x19d   :  { %2339 = vmatprep.mubr.bf16.mxu1 %v7627_v53  ;;  %v827_v63 = vpop.f32.mrb[84].mxu1  ;;  %v5039_v53 = vpop.f32.mrb[78].mxu0 }
 0x19e   :  { %v1421_v60 = vmul.f32 0.01, %v827_v63  ;;  %v829_v37 = vpop.f32.mrb[85].mxu1  ;;  %vm1221_vm5 = vcmp.ge.f32.partialorder %v827_v63, 0.0  ;;  %vm1278_vm11 = vcmp.ge.f32.partialorder %v5039_v53, 0.0 }
 0x19f   :  { %vm1222_vm6 = vcmp.ge.f32.partialorder %v829_v37, 0.0  ;;  %v1422_v2 = vmul.f32 0.01, %v829_v37  ;;  %v831_v27 = vpop.f32.mrb[86].mxu1 }
 0x1a0   :  { %vm1226_vm8 = vcmp.ge.f32.partialorder %v831_v27, 0.0  ;;  %v1426_v15 = vmul.f32 0.01, %v831_v27  ;;  %v833_v20 = vpop.f32.mrb[87].mxu1  ;;  %v6690_v26 = vsel %vm1221_vm5, %v827_v63, %v1421_v60  ;;  %v1478_v60 = vmul.f32 0.01, %v5039_v53 }
 0x1a1   :  { %vm1227_vm9 = vcmp.ge.f32.partialorder %v833_v20, 0.0  ;;  %v1427_v54 = vmul.f32 0.01, %v833_v20  ;;  %7628 = vst [vmem:[#allocation10_spill] sm:$0xff] %v6690_v26  ;;  %v6692_v33 = vsel %vm1222_vm6, %v829_v37, %v1422_v2  ;;  %v1071_v37 = vpop.f32.mrb[79].mxu0  ;;  %v7641_v2 = vld [vmem:[#allocation6_spill] sm:$0xff]  ;;  %v7644_v26 = vpack.c.bf16 %v6494_v13, %v6487_v59 }
 0x1a2   :  { %v6694_v62 = vsel %vm1226_vm8, %v831_v27, %v1426_v15  ;;  %v1663_v27 = vsel %vm1263_vm10, %v1068_v52, %v1463_v45  ;;  %vm1268_vm12 = vcmp.ge.f32.partialorder %v1071_v37, 0.0  ;;  %v1468_v41 = vmul.f32 0.01, %v1071_v37 }
 0x1a3   :  { %v6699_v19 = vsel %vm1227_vm9, %v833_v20, %v1427_v54  ;;  %v1678_v31 = vsel %vm1278_vm11, %v5039_v53, %v1478_v60  ;;  %v7633_v53 = vld [vmem:[#allocation3_spill] sm:$0xff]  ;;  %v7634_v60 = vld [vmem:[#allocation2_spill] sm:$0xff] }
 0x1a4   :  { %2340 = vmatmul.mubr.bf16.gmra.mrb[192].mxu1 %v7629_v0  ;;  %v1788_v20 = vpack.c.bf16 %v1678_v31, %v1673_v35  ;;  %v1668_v54 = vsel %vm1268_vm12, %v1071_v37, %v1468_v41  ;;  %v7635_v35 = vpack.c.bf16 %v7633_v53, %v7634_v60  ;;  %v7638_v41 = vld [vmem:[#allocation7_spill] sm:$0xff]  ;;  %v7639_v31 = vld [vmem:[#allocation5_spill] sm:$0xff] }
 0x1a5   :  { %2380 = vmatprep.mubr.bf16.mxu1 %v7630_v30  ;;  %v837_v18 = vpop.f32.mrb[88].mxu1  ;;  %v1783_v30 = vpack.c.bf16 %v1668_v54, %v1663_v27  ;;  %v7640_v54 = vpack.c.bf16 %v7638_v41, %v7639_v31 }
 0x1a6   :  { %v1431_v7 = vmul.f32 0.01, %v837_v18  ;;  %v839_v15 = vpop.f32.mrb[89].mxu1  ;;  %vm1231_vm13 = vcmp.ge.f32.partialorder %v837_v18, 0.0 }
 0x1a7   :  { %v1432_v3 = vmul.f32 0.01, %v839_v15  ;;  %v841_v46 = vpop.f32.mrb[90].mxu1  ;;  %vm1232_vm14 = vcmp.ge.f32.partialorder %v839_v15, 0.0  ;;  %5084 = vmatprep.mubr.msk.bf16.mxu0 %vm2094_vm0, %v1783_v30 }
 0x1a8   :  { %vm1236_vm15 = vcmp.ge.f32.partialorder %v841_v46, 0.0  ;;  %v1436_v0 = vmul.f32 0.01, %v841_v46  ;;  %v843_v63 = vpop.f32.mrb[91].mxu1  ;;  %v6709_v52 = vsel %vm1231_vm13, %v837_v18, %v1431_v7  ;;  %5085 = vmatmul.mubr.msk.bf16.gmra.mrb[116].mxu0 %vm2094_vm0, %v1788_v20  ;;  %v5042_v7 = vpop.f32.mrb[80].mxu0 }
 0x1a9   :  { %vm1237_vm1 = vcmp.ge.f32.partialorder %v843_v63, 0.0  ;;  %v1437_v47 = vmul.f32 0.01, %v843_v63  ;;  %7631 = vst [vmem:[#allocation11_spill] sm:$0xff] %v6709_v52  ;;  %v6717_v37 = vsel %vm1232_vm14, %v839_v15, %v1432_v3  ;;  %v1084_v30 = vpop.f32.mrb[81].mxu0  ;;  %vm1293_vm2 = vcmp.ge.f32.partialorder %v5042_v7, 0.0 }
 0x1aa   :  { %v6711_v45 = vsel %vm1236_vm15, %v841_v46, %v1436_v0  ;;  %7636 = vst [vmem:[#allocation3_spill] sm:$0xff] %v6717_v37  ;;  %v1493_v53 = vmul.f32 0.01, %v5042_v7  ;;  %v1483_v15 = vmul.f32 0.01, %v1084_v30  ;;  %vm1283_vm5 = vcmp.ge.f32.partialorder %v1084_v30, 0.0 }
 0x1ab   :  { %7632 = vst [vmem:[#allocation12_spill] sm:$0xff] %v6711_v45  ;;  %v6719_v27 = vsel %vm1237_vm1, %v843_v63, %v1437_v47  ;;  %v7643_v52 = vpack.c.bf16 %v7641_v2, %v7642_v43  ;;  %v5043_v37 = vpop.f32.mrb[82].mxu0 }
 0x1ac   :  { %2381 = vmatmul.mubr.bf16.vlgmr.msra.gmra.mrb[116].mxu1 %v7635_v35  ;;  %7637 = vst [vmem:[#allocation2_spill] sm:$0xff] %v6719_v27  ;;  %v1693_v31 = vsel %vm1293_vm2, %v5042_v7, %v1493_v53  ;;  %v1683_v45 = vsel %vm1283_vm5, %v1084_v30, %v1483_v15  ;;  %vm1298_vm8 = vcmp.ge.f32.partialorder %v5043_v37, 0.0  ;;  %v1087_v53 = vpop.f32.mrb[83].mxu0  ;;  %v7598_v30 = vmov 0.0   ;;  %v7645_v7 = vld [vmem:[#allocation8_spill] sm:$0xff] }
 0x1ad   :  { %2388 = vmatprep.mubr.bf16.mxu1 %v7640_v54  ;;  %v847_v0 = vpop.f32.mrb[92].mxu1  ;;  %vm1288_vm9 = vcmp.ge.f32.partialorder %v1087_v53, 0.0  ;;  %v1488_v43 = vmul.f32 0.01, %v1087_v53  ;;  %5092 = vmatprep.subr.bf16.mxu0 %v7598_v30 }
 0x1ae   :  { %v1441_v60 = vmul.f32 0.01, %v847_v0  ;;  %v849_v20 = vpop.f32.mrb[93].mxu1  ;;  %vm1241_vm3 = vcmp.ge.f32.partialorder %v847_v0, 0.0 }
 0x1af   :  { %vm1242_vm4 = vcmp.ge.f32.partialorder %v849_v20, 0.0  ;;  %v1442_v47 = vmul.f32 0.01, %v849_v20  ;;  %v851_v63 = vpop.f32.mrb[94].mxu1  ;;  %v1688_v13 = vsel %vm1288_vm9, %v1087_v53, %v1488_v43  ;;  %v7647_v43 = vpack.c.bf16 %v6513_v14, %v6504_v57 }
 0x1b0   :  { %vm1246_vm6 = vcmp.ge.f32.partialorder %v851_v63, 0.0  ;;  %v1446_v3 = vmul.f32 0.01, %v851_v63  ;;  %v853_v35 = vpop.f32.mrb[95].mxu1  ;;  %v6728_v54 = vsel %vm1241_vm3, %v847_v0, %v1441_v60  ;;  %v1498_v0 = vmul.f32 0.01, %v5043_v37 }
 0x1b1   :  { %vm1247_vm7 = vcmp.ge.f32.partialorder %v853_v35, 0.0  ;;  %v1447_v41 = vmul.f32 0.01, %v853_v35  ;;  %v6730_v18 = vsel %vm1242_vm4, %v849_v20, %v1442_v47 }
 0x1b2   :  { %v6732_v46 = vsel %vm1246_vm6, %v851_v63, %v1446_v3  ;;  %v1793_v63 = vpack.c.bf16 %v1688_v13, %v1683_v45 }
 0x1b3   :  { %v6737_v27 = vsel %vm1247_vm7, %v853_v35, %v1447_v41 }
 0x1b4   :  { %2389 = vmatmul.mubr.bf16.gmra.mrb[120].mxu1 %v7643_v52  ;;  %v1698_v52 = vsel %vm1298_vm8, %v5043_v37, %v1498_v0  ;;  %5088 = vmatprep.mubr.msk.bf16.mxu0 %vm2094_vm0, %v1793_v63 }
 0x1b5   :  { %2396 = vmatprep.mubr.bf16.mxu1 %v7644_v26  ;;  %v857_v2 = vpop.f32.mrb[96].mxu1  ;;  %v1798_v59 = vpack.c.bf16 %v1698_v52, %v1693_v31  ;;  %v7646_v31 = vpack.c.bf16 %v6489_v6, %v7645_v7  ;;  %v5661_v52 = vld [vmem:[%s7581_s4] sm:$0xff]  }
 0x1b6   :  { %v1451_v20 = vmul.f32 0.01, %v857_v2  ;;  %v859_v15 = vpop.f32.mrb[97].mxu1  ;;  %vm1251_vm10 = vcmp.ge.f32.partialorder %v857_v2, 0.0  ;;  %5093 = vmatpush3.bf16.msra.mxu0 %v5661_v52  ;;  %v7650_v52 = vpack.c.bf16 %v6535_v16, %v6526_v40  ;;  %v5664_v40 = vld [vmem:[%s7581_s4 + $0x18] sm:$0xff]  }
 0x1b7   :  { %v1452_v26 = vmul.f32 0.01, %v859_v15  ;;  %v861_v47 = vpop.f32.mrb[98].mxu1  ;;  %vm1252_vm11 = vcmp.ge.f32.partialorder %v859_v15, 0.0  ;;  %5089 = vmatmul.mubr.msk.bf16.gmra.mrb[120].mxu0 %vm2094_vm0, %v1798_v59  ;;  %5094 = vmatprep.subr.bf16.mxu0 %v7598_v30 }
 0x1b8   :  { %vm1256_vm12 = vcmp.ge.f32.partialorder %v861_v47, 0.0  ;;  %v1456_v3 = vmul.f32 0.01, %v861_v47  ;;  %v863_v35 = vpop.f32.mrb[99].mxu1  ;;  %v6748_v37 = vsel %vm1251_vm10, %v857_v2, %v1451_v20  ;;  %v7653_v2 = vpack.c.bf16 %v6557_v1, %v6548_v9 }
 0x1b9   :  { %vm1257_vm13 = vcmp.ge.f32.partialorder %v863_v35, 0.0  ;;  %v1457_v41 = vmul.f32 0.01, %v863_v35  ;;  %v6756_v53 = vsel %vm1252_vm11, %v859_v15, %v1452_v26 }
 0x1ba   :  { %v6750_v0 = vsel %vm1256_vm12, %v861_v47, %v1456_v3  ;;  %v7648_v3 = vld [vmem:[#allocation9_spill] sm:$0xff] }
 0x1bb   :  { %v6758_v45 = vsel %vm1257_vm13, %v863_v35, %v1457_v41  ;;  %v7649_v35 = vpack.c.bf16 %v6508_v49, %v7648_v3  ;;  %v5662_v41 = vld [vmem:[%s7581_s4 + $0x8] sm:$0xff]   ;;  %v5663_v49 = vld [vmem:[%s7581_s4 + $0x10] sm:$0xff]  }
 0x1bc   :  { %2397 = vmatmul.mubr.bf16.gmra.mrb[124].mxu1 %v7646_v31  ;;  %5095 = vmatpush3.bf16.msra.mxu0 %v5662_v41 }
 0x1bd   :  { %2404 = vmatprep.mubr.bf16.mxu1 %v7647_v43  ;;  %v867_v7 = vpop.f32.mrb[100].mxu1  ;;  %5096 = vmatprep.subr.bf16.mxu0 %v7598_v30 }
 0x1be   :  { %vm1261_vm14 = vcmp.ge.f32.partialorder %v867_v7, 0.0  ;;  %v1461_v20 = vmul.f32 0.01, %v867_v7  ;;  %v869_v15 = vpop.f32.mrb[101].mxu1 }
 0x1bf   :  { %vm1262_vm15 = vcmp.ge.f32.partialorder %v869_v15, 0.0  ;;  %v1462_v57 = vmul.f32 0.01, %v869_v15  ;;  %v871_v14 = vpop.f32.mrb[102].mxu1 }
 0x1c0   :  { %vm1266_vm1 = vcmp.ge.f32.partialorder %v871_v14, 0.0  ;;  %v1466_v59 = vmul.f32 0.01, %v871_v14  ;;  %v873_v13 = vpop.f32.mrb[103].mxu1  ;;  %v6771_v47 = vsel %vm1261_vm14, %v867_v7, %v1461_v20  ;;  %5097 = vmatpush3.bf16.msra.mxu0 %v5663_v49 }
 0x1c1   :  { %vm1267_vm2 = vcmp.ge.f32.partialorder %v873_v13, 0.0  ;;  %v1467_v26 = vmul.f32 0.01, %v873_v13  ;;  %v6781_v31 = vsel %vm1262_vm15, %v869_v15, %v1462_v57  ;;  %5098 = vmatprep.subr.bf16.mxu0 %v7598_v30  ;;  %vm5743_vm15 = vmmov 0  }
 0x1c2   :  { %v6773_v63 = vsel %vm1266_vm1, %v871_v14, %v1466_v59 }
 0x1c3   :  { %v6783_v43 = vsel %vm1267_vm2, %v873_v13, %v1467_v26 }
 0x1c4   :  { %2405 = vmatmul.mubr.bf16.gmra.mrb[128].mxu1 %v7649_v35  ;;  %5099 = vmatpush3.bf16.msra.mxu0 %v5664_v40 }
 0x1c5   :  { %2412 = vmatprep.mubr.bf16.mxu1 %v7650_v52  ;;  %v877_v14 = vpop.f32.mrb[104].mxu1  ;;  %v7652_v52 = vpack.c.bf16 %v6530_v39, %v6523_v10  ;;  %5104 = vmatprep.subr.bf16.mxu0 %v7598_v30 }
 0x1c6   :  { %vm1271_vm3 = vcmp.ge.f32.partialorder %v877_v14, 0.0  ;;  %v1471_v15 = vmul.f32 0.01, %v877_v14  ;;  %v879_v57 = vpop.f32.mrb[105].mxu1 }
 0x1c7   :  { %vm1272_vm4 = vcmp.ge.f32.partialorder %v879_v57, 0.0  ;;  %v1472_v16 = vmul.f32 0.01, %v879_v57  ;;  %v881_v59 = vpop.f32.mrb[106].mxu1 }
 0x1c8   :  { %vm1276_vm5 = vcmp.ge.f32.partialorder %v881_v59, 0.0  ;;  %v1476_v13 = vmul.f32 0.01, %v881_v59  ;;  %v883_v26 = vpop.f32.mrb[107].mxu1  ;;  %v6800_v35 = vsel %vm1271_vm3, %v877_v14, %v1471_v15 }
 0x1c9   :  { %vm1277_vm6 = vcmp.ge.f32.partialorder %v883_v26, 0.0  ;;  %v1477_v3 = vmul.f32 0.01, %v883_v26  ;;  %7651 = vst [vmem:[#allocation7_spill] sm:$0xff] %v6800_v35  ;;  %v6807_v7 = vsel %vm1272_vm4, %v879_v57, %v1472_v16 }
 0x1ca   :  { %v6802_v41 = vsel %vm1276_vm5, %v881_v59, %v1476_v13 }
 0x1cb   :  { %v6809_v20 = vsel %vm1277_vm6, %v883_v26, %v1477_v3  ;;  %v7654_v26 = vpack.c.bf16 %v6552_v36, %v6545_v17 }
 0x1cc   :  { %2413 = vmatmul.mubr.bf16.gmra.mrb[132].mxu1 %v7652_v52  ;;  %v7655_v52 = vpack.c.bf16 %v6579_v22, %v6570_v44  ;;  %v7656_v44 = vpack.c.bf16 %v6574_v11, %v6567_v24  ;;  %v7660_v24 = vpack.c.bf16 %v6617_v56, %v6612_v12  ;;  %v7661_v11 = vpack.c.bf16 %v6643_v50, %v6641_v58  ;;  %v7672_v58 = vld [vmem:[#allocation3_spill] sm:$0xff] }
 0x1cd   :  { %2420 = vmatprep.mubr.bf16.mxu1 %v7653_v2  ;;  %v887_v15 = vpop.f32.mrb[108].mxu1  ;;  %v7666_v12 = vpack.c.bf16 %v6673_v38, %v6671_v34  ;;  %v7668_v56 = vmov 0.0   ;;  %v7678_v34 = vpack.c.bf16 %v6732_v46, %v6728_v54  ;;  %v7679_v38 = vpack.c.bf16 %v6758_v45, %v6756_v53 }
 0x1ce   :  { %vm1281_vm7 = vcmp.ge.f32.partialorder %v887_v15, 0.0  ;;  %v1481_v10 = vmul.f32 0.01, %v887_v15  ;;  %v889_v39 = vpop.f32.mrb[109].mxu1  ;;  %5100 = vmatprep.mubr.msk.bf16.mxu0 %vm5743_vm15, %v7668_v56 }
 0x1cf   :  { %vm1282_vm8 = vcmp.ge.f32.partialorder %v889_v39, 0.0  ;;  %v1482_v57 = vmul.f32 0.01, %v889_v39  ;;  %v891_v16 = vpop.f32.mrb[110].mxu1 }
 0x1d0   :  { %vm1286_vm9 = vcmp.ge.f32.partialorder %v891_v16, 0.0  ;;  %v1486_v59 = vmul.f32 0.01, %v891_v16  ;;  %v893_v9 = vpop.f32.mrb[111].mxu1  ;;  %v1681_v2 = vsel %vm1281_vm7, %v887_v15, %v1481_v10  ;;  %v7684_v54 = vld [vmem:[#allocation7_spill] sm:$0xff] }
 0x1d1   :  { %vm1287_vm10 = vcmp.ge.f32.partialorder %v893_v9, 0.0  ;;  %v1487_v1 = vmul.f32 0.01, %v893_v9  ;;  %v1682_v40 = vsel %vm1282_vm8, %v889_v39, %v1482_v57 }
 0x1d2   :  { %v1686_v13 = vsel %vm1286_vm9, %v891_v16, %v1486_v59  ;;  %v7657_v59 = vpack.c.bf16 %v6601_v23, %v6592_v32  ;;  %v7662_v32 = vpack.c.bf16 %v6635_v5, %v6633_v55  ;;  %v7665_v23 = vpack.c.bf16 %v6681_v48, %v6679_v42  ;;  %v7671_v5 = vld [vmem:[#allocation2_spill] sm:$0xff] }
 0x1d3   :  { %v1687_v3 = vsel %vm1287_vm10, %v893_v9, %v1487_v1  ;;  %v1791_v49 = vpack.c.bf16 %v1686_v13, %v1681_v2  ;;  %v7658_v2 = vpack.c.bf16 %v6596_v28, %v6589_v25  ;;  %v7663_v25 = vpack.c.bf16 %v6661_v51, %v6654_v4  ;;  %v7674_v51 = vld [vmem:[#allocation12_spill] sm:$0xff] }
 0x1d4   :  { %2421 = vmatmul.mubr.bf16.gmra.mrb[136].mxu1 %v7654_v26  ;;  %v1792_v14 = vpack.c.bf16 %v1687_v3, %v1682_v40  ;;  %v7664_v28 = vpack.c.bf16 %v6656_v29, %v6652_v21  ;;  %v7673_v50 = vpack.c.bf16 %v7671_v5, %v7672_v58  ;;  %v7675_v21 = vld [vmem:[#allocation11_spill] sm:$0xff]  ;;  %v7677_v29 = vpack.c.bf16 %v6737_v27, %v6730_v18 }
 0x1d5   :  { %2428 = vmatprep.mubr.bf16.mxu1 %v7655_v52  ;;  %v897_v6 = vpop.f32.mrb[112].mxu1  ;;  %v7676_v4 = vpack.c.bf16 %v7674_v51, %v7675_v21  ;;  %v7680_v42 = vpack.c.bf16 %v6750_v0, %v6748_v37  ;;  %v7681_v48 = vpack.c.bf16 %v6783_v43, %v6781_v31  ;;  %v5665_v21 = vld [vmem:[%s7581_s4 + $0x20] sm:$0xff]  }
 0x1d6   :  { %vm1291_vm11 = vcmp.ge.f32.partialorder %v897_v6, 0.0  ;;  %v1491_v60 = vmul.f32 0.01, %v897_v6  ;;  %v899_v30 = vpop.f32.mrb[113].mxu1 }
 0x1d7   :  { %vm1292_vm12 = vcmp.ge.f32.partialorder %v899_v30, 0.0  ;;  %v1492_v35 = vmul.f32 0.01, %v899_v30  ;;  %v901_v15 = vpop.f32.mrb[114].mxu1 }
 0x1d8   :  { %vm1296_vm13 = vcmp.ge.f32.partialorder %v901_v15, 0.0  ;;  %v1496_v10 = vmul.f32 0.01, %v901_v15  ;;  %v903_v16 = vpop.f32.mrb[115].mxu1  ;;  %v1691_v36 = vsel %vm1291_vm11, %v897_v6, %v1491_v60  ;;  %v7659_v60 = vpack.c.bf16 %v6623_v8, %v6615_v61  ;;  %v7669_v8 = vld [vmem:[#allocation10_spill] sm:$0xff] }
 0x1d9   :  { %vm1297_vm14 = vcmp.ge.f32.partialorder %v903_v16, 0.0  ;;  %v1497_v17 = vmul.f32 0.01, %v903_v16  ;;  %v1692_v22 = vsel %vm1292_vm12, %v899_v30, %v1492_v35  ;;  %v7667_v61 = vpack.c.bf16 %v6699_v19, %v6692_v33 }
 0x1da   :  { %v1696_v39 = vsel %vm1296_vm13, %v901_v15, %v1496_v10  ;;  %v7670_v55 = vpack.c.bf16 %v6694_v62, %v7669_v8  ;;  %v7682_v19 = vpack.c.bf16 %v6773_v63, %v6771_v47  ;;  %v7683_v33 = vpack.c.bf16 %v6809_v20, %v6807_v7 }
 0x1db   :  { %v1697_v57 = vsel %vm1297_vm14, %v903_v16, %v1497_v17  ;;  %v1796_v9 = vpack.c.bf16 %v1696_v39, %v1691_v36  ;;  %v7685_v30 = vpack.c.bf16 %v6802_v41, %v7684_v54 }
 0x1dc   :  { %2429 = vmatmul.mubr.bf16.gmra.mrb[140].mxu1 %v7656_v44  ;;  %v1797_v1 = vpack.c.bf16 %v1697_v57, %v1692_v22  ;;  %v6959_v57 = vld [vmem:[%s7582_s3] ss:$0 sm:$0xff] }
 0x1dd   :  { %2436 = vmatprep.mubr.bf16.mxu1 %v7657_v59 }
 0x1e4   :  { %2437 = vmatmul.mubr.bf16.gmra.mrb[144].mxu1 %v7658_v2 }
 0x1e5   :  { %2444 = vmatprep.mubr.bf16.mxu1 %v7659_v60 }
 0x1ec   :  { %2445 = vmatmul.mubr.bf16.gmra.mrb[148].mxu1 %v7660_v24 }
 0x1ed   :  { %2452 = vmatprep.mubr.bf16.mxu1 %v7661_v11 }
 0x1f4   :  { %2453 = vmatmul.mubr.bf16.gmra.mrb[152].mxu1 %v7662_v32 }
 0x1f5   :  { %2460 = vmatprep.mubr.bf16.mxu1 %v7663_v25 }
 0x1fc   :  { %2461 = vmatmul.mubr.bf16.gmra.mrb[156].mxu1 %v7664_v28 }
 0x1fd   :  { %2468 = vmatprep.mubr.bf16.mxu1 %v7665_v23 }
 0x204   :  { %2469 = vmatmul.mubr.bf16.gmra.mrb[160].mxu1 %v7666_v12 }
 0x205   :  { %2476 = vmatprep.mubr.bf16.mxu1 %v7667_v61 }
 0x20c   :  { %2477 = vmatmul.mubr.bf16.gmra.mrb[164].mxu1 %v7670_v55 }
 0x20d   :  { %2484 = vmatprep.mubr.bf16.mxu1 %v7673_v50 }
 0x214   :  { %2485 = vmatmul.mubr.bf16.gmra.mrb[168].mxu1 %v7676_v4 }
 0x215   :  { %2492 = vmatprep.mubr.bf16.mxu1 %v7677_v29 }
 0x21c   :  { %2493 = vmatmul.mubr.bf16.gmra.mrb[172].mxu1 %v7678_v34 }
 0x21d   :  { %2500 = vmatprep.mubr.bf16.mxu1 %v7679_v38 }
 0x224   :  { %2501 = vmatmul.mubr.bf16.gmra.mrb[176].mxu1 %v7680_v42 }
 0x225   :  { %2508 = vmatprep.mubr.bf16.mxu1 %v7681_v48 }
 0x22c   :  { %2509 = vmatmul.mubr.bf16.gmra.mrb[180].mxu1 %v7682_v19  ;;  %v6893_v62 = vpop.f32.mrb[84].mxu0 }
 0x22d   :  { %2516 = vmatprep.mubr.bf16.mxu1 %v7683_v33  ;;  %v2575_v27 = vpop.f32.mrb[85].mxu0  ;;  %v5666_v33 = vld [vmem:[%s7581_s4 + $0x28] sm:$0xff]  }
 0x22e   :  { %v6895_v18 = vpop.f32.mrb[86].mxu0 }
 0x22f   :  { %v2578_v46 = vpop.f32.mrb[87].mxu0 }
 0x234   :  { %2517 = vmatmul.mubr.bf16.gmra.mrb[184].mxu1 %v7685_v30 }
 0x235   :  { %2524 = vmatprep.mubr.bf16.mxu1 %v1792_v14  ;;  %v6900_v37 = vpop.f32.mrb[88].mxu0 }
 0x236   :  { %v6902_v0 = vpop.f32.mrb[89].mxu0 }
 0x237   :  { %v6904_v53 = vpop.f32.mrb[90].mxu0 }
 0x238   :  { %v6906_v45 = vpop.f32.mrb[91].mxu0 }
 0x23c   :  { %2525 = vmatmul.mubr.bf16.gmra.mrb[188].mxu1 %v1791_v49 }
 0x23d   :  { %2532 = vmatprep.mubr.bf16.mxu1 %v1797_v1  ;;  %v6908_v6 = vpop.f32.mrb[92].mxu0 }
 0x23e   :  { %v6910_v47 = vpop.f32.mrb[93].mxu0 }
 0x23f   :  { %v6912_v63 = vpop.f32.mrb[94].mxu0 }
 0x240   :  { %v6914_v31 = vpop.f32.mrb[95].mxu0 }
 0x244   :  { %2533 = vmatmul.mubr.bf16.gmra.mrb[192].mxu1 %v1796_v9 }
 0x245   :  { %v6916_v43 = vpop.f32.mrb[96].mxu0 }
 0x246   :  { %v6918_v7 = vpop.f32.mrb[97].mxu0 }
 0x247   :  { %v6920_v20 = vpop.f32.mrb[98].mxu0 }
 0x248   :  { %v6922_v35 = vpop.f32.mrb[99].mxu0 }
 0x24d   :  { %v6924_v41 = vpop.f32.mrb[100].mxu0 }
 0x24e   :  { %v6926_v49 = vpop.f32.mrb[101].mxu0 }
 0x24f   :  { %v6928_v14 = vpop.f32.mrb[102].mxu0 }
 0x250   :  { %v6930_v13 = vpop.f32.mrb[103].mxu0 }
 0x255   :  { %v6932_v26 = vpop.f32.mrb[104].mxu0 }
 0x256   :  { %v6934_v40 = vpop.f32.mrb[105].mxu0 }
 0x257   :  { %v6936_v3 = vpop.f32.mrb[106].mxu0 }
 0x258   :  { %v6938_v52 = vpop.f32.mrb[107].mxu0 }
 0x25d   :  { %v6940_v15 = vpop.f32.mrb[108].mxu0 }
 0x25e   :  { %v6942_v10 = vpop.f32.mrb[109].mxu0 }
 0x25f   :  { %v6944_v16 = vpop.f32.mrb[110].mxu0 }
 0x260   :  { %v6946_v17 = vpop.f32.mrb[111].mxu0 }
 0x26b   :  { %v6948_v36 = vpop.f32.mrb[112].mxu0 }
 0x26c   :  { %v6950_v39 = vpop.f32.mrb[113].mxu0 }
 0x26d   :  { %v6952_v44 = vpop.f32.mrb[114].mxu0 }
 0x26e   :  { %v6954_v22 = vpop.f32.mrb[115].mxu0 }
 0x27b   :  { %v6962_v60 = vpop.f32.mrb[116].mxu0 }
 0x27c   :  { %v6965_v25 = vpop.f32.mrb[117].mxu0 }
 0x27d   :  { %v6967_v28 = vpop.f32.mrb[118].mxu0 }
 0x27e   :  { %v6969_v61 = vpop.f32.mrb[119].mxu0 }
 0x27f   :  { %v2382_v59 = vpop.f32.mrb[116].mxu1 }
 0x280   :  { %v5348_v9 = vadd.f32 %v6959_v57, %v2382_v59  ;;  %v2384_v1 = vpop.f32.mrb[117].mxu1  ;;  %v5667_v59 = vld [vmem:[%s7581_s4 + $0x30] sm:$0xff]  }
 0x281   :  { %v2385_v2 = vpop.f32.mrb[118].mxu1 }
 0x282   :  { %v2576_v24 = vadd.f32 %v5348_v9, %v2575_v27  ;;  %v5349_v11 = vadd.f32 %v6959_v57, %v2385_v2  ;;  %v2387_v32 = vpop.f32.mrb[119].mxu1 }
 0x284   :  { %v2774_v23 = vmul.f32 0.01, %v2576_v24  ;;  %v2579_v12 = vadd.f32 %v5349_v11, %v2578_v46  ;;  %vm2734_vm1 = vcmp.ge.f32.partialorder %v2576_v24, 0.0 }
 0x286   :  { %vm2735_vm2 = vcmp.ge.f32.partialorder %v2579_v12, 0.0  ;;  %v2775_v8 = vmul.f32 0.01, %v2579_v12  ;;  %v2814_v5 = vsel %vm2734_vm1, %v2576_v24, %v2774_v23 }
 0x287   :  { %v2390_v55 = vpop.f32.mrb[120].mxu1 }
 0x288   :  { %v2815_v58 = vsel %vm2735_vm2, %v2579_v12, %v2775_v8  ;;  %v5350_v50 = vadd.f32 %v6959_v57, %v2390_v55  ;;  %v2392_v51 = vpop.f32.mrb[121].mxu1 }
 0x289   :  { %v2854_v4 = vpack.c.bf16 %v2815_v58, %v2814_v5  ;;  %v2393_v29 = vpop.f32.mrb[122].mxu1  ;;  %v5668_v5 = vld [vmem:[%s7581_s4 + $0x38] sm:$0xff]  }
 0x28a   :  { %v2584_v34 = vadd.f32 %v5350_v50, %v6893_v62  ;;  %v5351_v38 = vadd.f32 %v6959_v57, %v2393_v29  ;;  %v2395_v42 = vpop.f32.mrb[123].mxu1  ;;  %v6990_v2 = vpop.f32.mrb[120].mxu0 }
 0x28b   :  { %5101 = vmatmul.mubr.msk.bf16.vlgmr.msra.gmra.mrb[124].mxu0 %vm2094_vm0, %v2854_v4  ;;  %v6994_v23 = vpop.f32.mrb[121].mxu0 }
 0x28c   :  { %v2776_v48 = vmul.f32 0.01, %v2584_v34  ;;  %v2587_v19 = vadd.f32 %v5351_v38, %v6895_v18  ;;  %5105 = vmatpush3.bf16.msra.mxu0 %v5665_v21  ;;  %5112 = vmatprep.mubr.msk.bf16.mxu0 %vm5743_vm15, %v7668_v56  ;;  %vm2736_vm3 = vcmp.ge.f32.partialorder %v2584_v34, 0.0  ;;  %v6996_v12 = vpop.f32.mrb[122].mxu0 }
 0x28d   :  { %5106 = vmatprep.subr.bf16.mxu0 %v7668_v56  ;;  %v7002_v58 = vpop.f32.mrb[123].mxu0 }
 0x28e   :  { %vm2737_vm4 = vcmp.ge.f32.partialorder %v2587_v19, 0.0  ;;  %v2777_v62 = vmul.f32 0.01, %v2587_v19  ;;  %v2816_v46 = vsel %vm2736_vm3, %v2584_v34, %v2776_v48 }
 0x28f   :  { %v2398_v27 = vpop.f32.mrb[124].mxu1 }
 0x290   :  { %v2817_v54 = vsel %vm2737_vm4, %v2587_v19, %v2777_v62  ;;  %v5352_v30 = vadd.f32 %v6959_v57, %v2398_v27  ;;  %5107 = vmatpush3.bf16.msra.mxu0 %v5666_v33  ;;  %v2400_v18 = vpop.f32.mrb[125].mxu1  ;;  %v5670_v27 = vld [vmem:[%s7581_s4 + $0x48] sm:$0xff]  }
 0x291   :  { %v2855_v9 = vpack.c.bf16 %v2817_v54, %v2816_v46  ;;  %v2401_v1 = vpop.f32.mrb[126].mxu1  ;;  %5108 = vmatprep.subr.bf16.mxu0 %v7668_v56 }
 0x292   :  { %v5353_v24 = vadd.f32 %v6959_v57, %v2401_v1  ;;  %v2592_v11 = vadd.f32 %v5352_v30, %v6902_v0  ;;  %v2403_v32 = vpop.f32.mrb[127].mxu1 }
 0x294   :  { %v2778_v8 = vmul.f32 0.01, %v2592_v11  ;;  %v2595_v55 = vadd.f32 %v5353_v24, %v6906_v45  ;;  %5109 = vmatpush3.bf16.msra.mxu0 %v5667_v59  ;;  %vm2738_vm5 = vcmp.ge.f32.partialorder %v2592_v11, 0.0  ;;  %v5669_v45 = vld [vmem:[%s7581_s4 + $0x40] sm:$0xff]   ;;  %v5671_v59 = vld [vmem:[%s7581_s4 + $0x50] sm:$0xff]  }
 0x295   :  { %5110 = vmatprep.subr.bf16.mxu0 %v7668_v56 }
 0x296   :  { %vm2739_vm6 = vcmp.ge.f32.partialorder %v2595_v55, 0.0  ;;  %v2779_v0 = vmul.f32 0.01, %v2595_v55  ;;  %v2818_v51 = vsel %vm2738_vm5, %v2592_v11, %v2778_v8 }
 0x297   :  { %v2406_v50 = vpop.f32.mrb[128].mxu1 }
 0x298   :  { %v2819_v21 = vsel %vm2739_vm6, %v2595_v55, %v2779_v0  ;;  %v5354_v4 = vadd.f32 %v6959_v57, %v2406_v50  ;;  %5111 = vmatpush3.bf16.msra.mxu0 %v5668_v5  ;;  %v2408_v29 = vpop.f32.mrb[129].mxu1  ;;  %v5672_v5 = vld [vmem:[%s7581_s4 + $0x58] sm:$0xff]  }
 0x299   :  { %v2856_v34 = vpack.c.bf16 %v2819_v21, %v2818_v51  ;;  %v2409_v38 = vpop.f32.mrb[130].mxu1  ;;  %5116 = vmatprep.subr.bf16.mxu0 %v7668_v56 }
 0x29a   :  { %v2600_v42 = vadd.f32 %v5354_v4, %v6900_v37  ;;  %v5355_v48 = vadd.f32 %v6959_v57, %v2409_v38  ;;  %v2411_v19 = vpop.f32.mrb[131].mxu1 }
 0x29b   :  { %5113 = vmatmul.mubr.msk.bf16.vlgmr.msra.gmra.mrb[124].mxu0 %vm2094_vm0, %v2855_v9 }
 0x29c   :  { %v2780_v33 = vmul.f32 0.01, %v2600_v42  ;;  %v2603_v62 = vadd.f32 %v5355_v48, %v6904_v53  ;;  %5117 = vmatpush3.bf16.msra.mxu0 %v5669_v45  ;;  %5124 = vmatprep.mubr.msk.bf16.mxu0 %vm5743_vm15, %v7668_v56  ;;  %vm2740_vm7 = vcmp.ge.f32.partialorder %v2600_v42, 0.0 }
 0x29d   :  { %5118 = vmatprep.subr.bf16.mxu0 %v7668_v56 }
 0x29e   :  { %vm2741_vm8 = vcmp.ge.f32.partialorder %v2603_v62, 0.0  ;;  %v2781_v37 = vmul.f32 0.01, %v2603_v62  ;;  %v7020_v54 = vsel %vm2740_vm7, %v2600_v42, %v2780_v33 }
 0x29f   :  { %v2414_v46 = vpop.f32.mrb[132].mxu1 }
 0x2a0   :  { %v7022_v30 = vsel %vm2741_vm8, %v2603_v62, %v2781_v37  ;;  %v5356_v53 = vadd.f32 %v6959_v57, %v2414_v46  ;;  %5119 = vmatpush3.bf16.msra.mxu0 %v5670_v27  ;;  %v2416_v18 = vpop.f32.mrb[133].mxu1  ;;  %v5674_v62 = vld [vmem:[%s7581_s4 + $0x68] sm:$0xff]  }
 0x2a1   :  { %v2857_v9 = vpack.c.bf16 %v7022_v30, %v7020_v54  ;;  %v2417_v1 = vpop.f32.mrb[134].mxu1  ;;  %5120 = vmatprep.subr.bf16.mxu0 %v7668_v56 }
 0x2a2   :  { %v5357_v24 = vadd.f32 %v6959_v57, %v2417_v1  ;;  %v2608_v11 = vadd.f32 %v5356_v53, %v6910_v47  ;;  %v2419_v32 = vpop.f32.mrb[135].mxu1  ;;  %v5675_v53 = vld [vmem:[%s7581_s4 + $0x70] sm:$0xff]  }
 0x2a4   :  { %v2782_v8 = vmul.f32 0.01, %v2608_v11  ;;  %v2611_v55 = vadd.f32 %v5357_v24, %v6914_v31  ;;  %5121 = vmatpush3.bf16.msra.mxu0 %v5671_v59  ;;  %vm2742_vm9 = vcmp.ge.f32.partialorder %v2608_v11, 0.0  ;;  %v5673_v31 = vld [vmem:[%s7581_s4 + $0x60] sm:$0xff]  }
 0x2a5   :  { %5122 = vmatprep.subr.bf16.mxu0 %v7668_v56 }
 0x2a6   :  { %vm2743_vm10 = vcmp.ge.f32.partialorder %v2611_v55, 0.0  ;;  %v2783_v0 = vmul.f32 0.01, %v2611_v55  ;;  %v7038_v51 = vsel %vm2742_vm9, %v2608_v11, %v2782_v8 }
 0x2a7   :  { %v2422_v50 = vpop.f32.mrb[136].mxu1 }
 0x2a8   :  { %v7040_v21 = vsel %vm2743_vm10, %v2611_v55, %v2783_v0  ;;  %v5358_v47 = vadd.f32 %v6959_v57, %v2422_v50  ;;  %5123 = vmatpush3.bf16.msra.mxu0 %v5672_v5  ;;  %v2424_v4 = vpop.f32.mrb[137].mxu1  ;;  %v5676_v55 = vld [vmem:[%s7581_s4 + $0x78] sm:$0xff]  }
 0x2a9   :  { %v2858_v29 = vpack.c.bf16 %v7040_v21, %v7038_v51  ;;  %v2425_v45 = vpop.f32.mrb[138].mxu1  ;;  %5128 = vmatprep.subr.bf16.mxu0 %v7668_v56 }
 0x2aa   :  { %v2616_v38 = vadd.f32 %v5358_v47, %v6908_v6  ;;  %v5359_v42 = vadd.f32 %v6959_v57, %v2425_v45  ;;  %v2427_v48 = vpop.f32.mrb[139].mxu1 }
 0x2ab   :  { %5125 = vmatmul.mubr.msk.bf16.vlgmr.msra.gmra.mrb[124].mxu0 %vm2094_vm0, %v2856_v34 }
 0x2ac   :  { %v2784_v19 = vmul.f32 0.01, %v2616_v38  ;;  %v2619_v33 = vadd.f32 %v5359_v42, %v6912_v63  ;;  %5129 = vmatpush3.bf16.msra.mxu0 %v5673_v31  ;;  %5136 = vmatprep.mubr.msk.bf16.mxu0 %vm5743_vm15, %v7668_v56  ;;  %vm2744_vm11 = vcmp.ge.f32.partialorder %v2616_v38, 0.0 }
 0x2ad   :  { %5130 = vmatprep.subr.bf16.mxu0 %v7668_v56 }
 0x2ae   :  { %vm2745_vm12 = vcmp.ge.f32.partialorder %v2619_v33, 0.0  ;;  %v2785_v6 = vmul.f32 0.01, %v2619_v33  ;;  %v7059_v37 = vsel %vm2744_vm11, %v2616_v38, %v2784_v19 }
 0x2af   :  { %v2430_v27 = vpop.f32.mrb[140].mxu1 }
 0x2b0   :  { %v7061_v34 = vsel %vm2745_vm12, %v2619_v33, %v2785_v6  ;;  %v5360_v63 = vadd.f32 %v6959_v57, %v2430_v27  ;;  %5131 = vmatpush3.bf16.msra.mxu0 %v5674_v62  ;;  %v2432_v46 = vpop.f32.mrb[141].mxu1  ;;  %v5678_v62 = vld [vmem:[%s7581_s4 + $0x88] sm:$0xff]   ;;  %v5679_v27 = vld [vmem:[%s7581_s4 + $0x90] sm:$0xff]  }
 0x2b1   :  { %v2859_v18 = vpack.c.bf16 %v7061_v34, %v7059_v37  ;;  %v2433_v59 = vpop.f32.mrb[142].mxu1  ;;  %5132 = vmatprep.subr.bf16.mxu0 %v7668_v56 }
 0x2b2   :  { %v5361_v1 = vadd.f32 %v6959_v57, %v2433_v59  ;;  %v2624_v24 = vadd.f32 %v5360_v63, %v6918_v7  ;;  %v2435_v11 = vpop.f32.mrb[143].mxu1 }
 0x2b4   :  { %v2786_v32 = vmul.f32 0.01, %v2624_v24  ;;  %v2627_v8 = vadd.f32 %v5361_v1, %v6922_v35  ;;  %5133 = vmatpush3.bf16.msra.mxu0 %v5675_v53  ;;  %vm2746_vm13 = vcmp.ge.f32.partialorder %v2624_v24, 0.0  ;;  %v5677_v35 = vld [vmem:[%s7581_s4 + $0x80] sm:$0xff]  }
 0x2b5   :  { %5134 = vmatprep.subr.bf16.mxu0 %v7668_v56 }
 0x2b6   :  { %vm2747_vm14 = vcmp.ge.f32.partialorder %v2627_v8, 0.0  ;;  %v2787_v5 = vmul.f32 0.01, %v2627_v8  ;;  %v7077_v50 = vsel %vm2746_vm13, %v2624_v24, %v2786_v32  ;;  %v5680_v32 = vld [vmem:[%s7581_s4 + $0x98] sm:$0xff]  }
 0x2b7   :  { %v2438_v0 = vpop.f32.mrb[144].mxu1 }
 0x2b8   :  { %v7079_v47 = vsel %vm2747_vm14, %v2627_v8, %v2787_v5  ;;  %v5362_v7 = vadd.f32 %v6959_v57, %v2438_v0  ;;  %5135 = vmatpush3.bf16.msra.mxu0 %v5676_v55  ;;  %v2440_v4 = vpop.f32.mrb[145].mxu1 }
 0x2b9   :  { %v2860_v31 = vpack.c.bf16 %v7079_v47, %v7077_v50  ;;  %v2441_v45 = vpop.f32.mrb[146].mxu1  ;;  %5140 = vmatprep.subr.bf16.mxu0 %v7668_v56 }
 0x2ba   :  { %v2632_v38 = vadd.f32 %v5362_v7, %v6916_v43  ;;  %v5363_v42 = vadd.f32 %v6959_v57, %v2441_v45  ;;  %v2443_v48 = vpop.f32.mrb[147].mxu1 }
 0x2bb   :  { %5137 = vmatmul.mubr.msk.bf16.vlgmr.msra.gmra.mrb[124].mxu0 %vm2094_vm0, %v2857_v9 }
 0x2bc   :  { %v2788_v19 = vmul.f32 0.01, %v2632_v38  ;;  %v2635_v33 = vadd.f32 %v5363_v42, %v6920_v20  ;;  %5141 = vmatpush3.bf16.msra.mxu0 %v5677_v35  ;;  %5148 = vmatprep.mubr.msk.bf16.mxu0 %vm5743_vm15, %v7668_v56  ;;  %vm2748_vm1 = vcmp.ge.f32.partialorder %v2632_v38, 0.0 }
 0x2bd   :  { %5142 = vmatprep.subr.bf16.mxu0 %v7668_v56 }
 0x2be   :  { %vm2749_vm2 = vcmp.ge.f32.partialorder %v2635_v33, 0.0  ;;  %v2789_v43 = vmul.f32 0.01, %v2635_v33  ;;  %v7101_v54 = vsel %vm2748_vm1, %v2632_v38, %v2788_v19 }
 0x2bf   :  { %v2446_v6 = vpop.f32.mrb[148].mxu1 }
 0x2c0   :  { %v7103_v30 = vsel %vm2749_vm2, %v2635_v33, %v2789_v43  ;;  %v5364_v20 = vadd.f32 %v6959_v57, %v2446_v6  ;;  %5143 = vmatpush3.bf16.msra.mxu0 %v5678_v62  ;;  %v2448_v9 = vpop.f32.mrb[149].mxu1  ;;  %v5682_v33 = vld [vmem:[%s7581_s4 + $0xa8] sm:$0xff]   ;;  %v5683_v43 = vld [vmem:[%s7581_s4 + $0xb0] sm:$0xff]  }
 0x2c1   :  { %v2861_v63 = vpack.c.bf16 %v7103_v30, %v7101_v54  ;;  %v2449_v46 = vpop.f32.mrb[150].mxu1  ;;  %5144 = vmatprep.subr.bf16.mxu0 %v7668_v56 }
 0x2c2   :  { %v5365_v53 = vadd.f32 %v6959_v57, %v2449_v46  ;;  %v2640_v59 = vadd.f32 %v5364_v20, %v6926_v49  ;;  %v2451_v1 = vpop.f32.mrb[151].mxu1 }
 0x2c3   :  { %v5684_v1 = vld [vmem:[%s7581_s4 + $0xb8] sm:$0xff]  }
 0x2c4   :  { %v2790_v24 = vmul.f32 0.01, %v2640_v59  ;;  %v2643_v11 = vadd.f32 %v5365_v53, %v6930_v13  ;;  %5145 = vmatpush3.bf16.msra.mxu0 %v5679_v27  ;;  %vm2750_vm3 = vcmp.ge.f32.partialorder %v2640_v59, 0.0  ;;  %v5681_v13 = vld [vmem:[%s7581_s4 + $0xa0] sm:$0xff]  }
 0x2c5   :  { %5146 = vmatprep.subr.bf16.mxu0 %v7668_v56 }
 0x2c6   :  { %vm2751_vm4 = vcmp.ge.f32.partialorder %v2643_v11, 0.0  ;;  %v2791_v8 = vmul.f32 0.01, %v2643_v11  ;;  %v7119_v5 = vsel %vm2750_vm3, %v2640_v59, %v2790_v24 }
 0x2c7   :  { %v2454_v55 = vpop.f32.mrb[152].mxu1 }
 0x2c8   :  { %v7121_v0 = vsel %vm2751_vm4, %v2643_v11, %v2791_v8  ;;  %v5366_v49 = vadd.f32 %v6959_v57, %v2454_v55  ;;  %5147 = vmatpush3.bf16.msra.mxu0 %v5680_v32  ;;  %v2456_v7 = vpop.f32.mrb[153].mxu1 }
 0x2c9   :  { %v2862_v4 = vpack.c.bf16 %v7121_v0, %v7119_v5  ;;  %v2457_v35 = vpop.f32.mrb[154].mxu1  ;;  %5152 = vmatprep.subr.bf16.mxu0 %v7668_v56 }
 0x2ca   :  { %v2648_v45 = vadd.f32 %v5366_v49, %v6924_v41  ;;  %v5367_v38 = vadd.f32 %v6959_v57, %v2457_v35  ;;  %v2459_v42 = vpop.f32.mrb[155].mxu1 }
 0x2cb   :  { %5149 = vmatmul.mubr.msk.bf16.vlgmr.msra.gmra.mrb[124].mxu0 %vm2094_vm0, %v2858_v29 }
 0x2cc   :  { %v2792_v48 = vmul.f32 0.01, %v2648_v45  ;;  %v2651_v19 = vadd.f32 %v5367_v38, %v6928_v14  ;;  %5153 = vmatpush3.bf16.msra.mxu0 %v5681_v13  ;;  %5160 = vmatprep.mubr.msk.bf16.mxu0 %vm5743_vm15, %v7668_v56  ;;  %vm2752_vm5 = vcmp.ge.f32.partialorder %v2648_v45, 0.0 }
 0x2cd   :  { %5154 = vmatprep.subr.bf16.mxu0 %v7668_v56 }
 0x2ce   :  { %vm2753_vm6 = vcmp.ge.f32.partialorder %v2651_v19, 0.0  ;;  %v2793_v41 = vmul.f32 0.01, %v2651_v19  ;;  %v7143_v51 = vsel %vm2752_vm5, %v2648_v45, %v2792_v48  ;;  %v5686_v48 = vld [vmem:[%s7581_s4 + $0xc8] sm:$0xff]  }
 0x2cf   :  { %v2462_v62 = vpop.f32.mrb[156].mxu1 }
 0x2d0   :  { %v7145_v21 = vsel %vm2753_vm6, %v2651_v19, %v2793_v41  ;;  %v5368_v14 = vadd.f32 %v6959_v57, %v2462_v62  ;;  %5155 = vmatpush3.bf16.msra.mxu0 %v5682_v33  ;;  %v2464_v29 = vpop.f32.mrb[157].mxu1  ;;  %v5687_v33 = vld [vmem:[%s7581_s4 + $0xd0] sm:$0xff]  }
 0x2d1   :  { %v2863_v6 = vpack.c.bf16 %v7145_v21, %v7143_v51  ;;  %v2465_v20 = vpop.f32.mrb[158].mxu1  ;;  %5156 = vmatprep.subr.bf16.mxu0 %v7668_v56 }
 0x2d2   :  { %v5369_v9 = vadd.f32 %v6959_v57, %v2465_v20  ;;  %v2656_v27 = vadd.f32 %v5368_v14, %v6934_v40  ;;  %v2467_v46 = vpop.f32.mrb[159].mxu1 }
 0x2d4   :  { %v2794_v53 = vmul.f32 0.01, %v2656_v27  ;;  %v2659_v59 = vadd.f32 %v5369_v9, %v6938_v52  ;;  %5157 = vmatpush3.bf16.msra.mxu0 %v5683_v43  ;;  %vm2754_vm7 = vcmp.ge.f32.partialorder %v2656_v27, 0.0  ;;  %v5685_v52 = vld [vmem:[%s7581_s4 + $0xc0] sm:$0xff]  }
 0x2d5   :  { %5158 = vmatprep.subr.bf16.mxu0 %v7668_v56 }
 0x2d6   :  { %vm2755_vm8 = vcmp.ge.f32.partialorder %v2659_v59, 0.0  ;;  %v2795_v24 = vmul.f32 0.01, %v2659_v59  ;;  %v7161_v32 = vsel %vm2754_vm7, %v2656_v27, %v2794_v53  ;;  %v5688_v27 = vld [vmem:[%s7581_s4 + $0xd8] sm:$0xff]  }
 0x2d7   :  { %v2470_v11 = vpop.f32.mrb[160].mxu1 }
 0x2d8   :  { %v7163_v8 = vsel %vm2755_vm8, %v2659_v59, %v2795_v24  ;;  %v5370_v40 = vadd.f32 %v6959_v57, %v2470_v11  ;;  %5159 = vmatpush3.bf16.msra.mxu0 %v5684_v1  ;;  %v2472_v55 = vpop.f32.mrb[161].mxu1 }
 0x2d9   :  { %v2864_v49 = vpack.c.bf16 %v7163_v8, %v7161_v32  ;;  %v2473_v7 = vpop.f32.mrb[162].mxu1  ;;  %5164 = vmatprep.subr.bf16.mxu0 %v7668_v56  ;;  %v5708_v32 = vld [vmem:[%s7581_s4 + $0x178] sm:$0xff]   ;;  %v5709_v8 = vld [vmem:[%s7581_s4 + $0x180] sm:$0xff]  }
 0x2da   :  { %v2664_v13 = vadd.f32 %v5370_v40, %v6932_v26  ;;  %v5371_v35 = vadd.f32 %v6959_v57, %v2473_v7  ;;  %v2475_v45 = vpop.f32.mrb[163].mxu1 }
 0x2db   :  { %5161 = vmatmul.mubr.msk.bf16.vlgmr.msra.gmra.mrb[124].mxu0 %vm2094_vm0, %v2859_v18  ;;  %v5690_v45 = vld [vmem:[%s7581_s4 + $0xe8] sm:$0xff]  }
 0x2dc   :  { %v2796_v38 = vmul.f32 0.01, %v2664_v13  ;;  %v2667_v42 = vadd.f32 %v5371_v35, %v6936_v3  ;;  %5165 = vmatpush3.bf16.msra.mxu0 %v5685_v52  ;;  %5172 = vmatprep.mubr.msk.bf16.mxu0 %vm5743_vm15, %v7668_v56  ;;  %vm2756_vm9 = vcmp.ge.f32.partialorder %v2664_v13, 0.0 }
 0x2dd   :  { %5166 = vmatprep.subr.bf16.mxu0 %v7668_v56 }
 0x2de   :  { %vm2757_vm10 = vcmp.ge.f32.partialorder %v2667_v42, 0.0  ;;  %v2797_v26 = vmul.f32 0.01, %v2667_v42  ;;  %v7185_v37 = vsel %vm2756_vm9, %v2664_v13, %v2796_v38 }
 0x2df   :  { %v2478_v19 = vpop.f32.mrb[164].mxu1 }
 0x2e0   :  { %v7187_v34 = vsel %vm2757_vm10, %v2667_v42, %v2797_v26  ;;  %v5372_v3 = vadd.f32 %v6959_v57, %v2478_v19  ;;  %5167 = vmatpush3.bf16.msra.mxu0 %v5686_v48  ;;  %v2480_v18 = vpop.f32.mrb[165].mxu1  ;;  %v5691_v42 = vld [vmem:[%s7581_s4 + $0xf0] sm:$0xff]  }
 0x2e1   :  { %v2865_v41 = vpack.c.bf16 %v7187_v34, %v7185_v37  ;;  %v2481_v62 = vpop.f32.mrb[166].mxu1  ;;  %5168 = vmatprep.subr.bf16.mxu0 %v7668_v56  ;;  %v5712_v37 = vld [vmem:[%s7581_s4 + $0x198] sm:$0xff]   ;;  %v5713_v34 = vld [vmem:[%s7581_s4 + $0x1a0] sm:$0xff]  }
 0x2e2   :  { %v5373_v14 = vadd.f32 %v6959_v57, %v2481_v62  ;;  %v2672_v29 = vadd.f32 %v5372_v3, %v6942_v10  ;;  %v2483_v43 = vpop.f32.mrb[167].mxu1 }
 0x2e4   :  { %v2798_v20 = vmul.f32 0.01, %v2672_v29  ;;  %v2675_v9 = vadd.f32 %v5373_v14, %v6946_v17  ;;  %5169 = vmatpush3.bf16.msra.mxu0 %v5687_v33  ;;  %vm2758_vm11 = vcmp.ge.f32.partialorder %v2672_v29, 0.0  ;;  %v5689_v17 = vld [vmem:[%s7581_s4 + $0xe0] sm:$0xff]   ;;  %v5692_v14 = vld [vmem:[%s7581_s4 + $0xf8] sm:$0xff]  }
 0x2e5   :  { %5170 = vmatprep.subr.bf16.mxu0 %v7668_v56 }
 0x2e6   :  { %vm2759_vm12 = vcmp.ge.f32.partialorder %v2675_v9, 0.0  ;;  %v2799_v46 = vmul.f32 0.01, %v2675_v9  ;;  %v7203_v59 = vsel %vm2758_vm11, %v2672_v29, %v2798_v20 }
 0x2e7   :  { %v2486_v53 = vpop.f32.mrb[168].mxu1 }
 0x2e8   :  { %v7205_v1 = vsel %vm2759_vm12, %v2675_v9, %v2799_v46  ;;  %v5374_v10 = vadd.f32 %v6959_v57, %v2486_v53  ;;  %5171 = vmatpush3.bf16.msra.mxu0 %v5688_v27  ;;  %v2488_v24 = vpop.f32.mrb[169].mxu1 }
 0x2e9   :  { %v2866_v11 = vpack.c.bf16 %v7205_v1, %v7203_v59  ;;  %v2489_v40 = vpop.f32.mrb[170].mxu1  ;;  %5176 = vmatprep.subr.bf16.mxu0 %v7668_v56  ;;  %v5716_v59 = vld [vmem:[%s7581_s4 + $0x1b8] sm:$0xff]   ;;  %v5717_v1 = vld [vmem:[%s7581_s4 + $0x1c0] sm:$0xff]  }
 0x2ea   :  { %v2680_v55 = vadd.f32 %v5374_v10, %v6940_v15  ;;  %v5375_v52 = vadd.f32 %v6959_v57, %v2489_v40  ;;  %v2491_v7 = vpop.f32.mrb[171].mxu1 }
 0x2eb   :  { %5173 = vmatmul.mubr.msk.bf16.vlgmr.msra.gmra.mrb[124].mxu0 %vm2094_vm0, %v2860_v31 }
 0x2ec   :  { %v2800_v13 = vmul.f32 0.01, %v2680_v55  ;;  %v2683_v35 = vadd.f32 %v5375_v52, %v6944_v16  ;;  %5177 = vmatpush3.bf16.msra.mxu0 %v5689_v17  ;;  %5184 = vmatprep.mubr.msk.bf16.mxu0 %vm5743_vm15, %v7668_v56  ;;  %vm2760_vm13 = vcmp.ge.f32.partialorder %v2680_v55, 0.0  ;;  %v5694_v52 = vld [vmem:[%s7581_s4 + $0x108] sm:$0xff]  }
 0x2ed   :  { %5178 = vmatprep.subr.bf16.mxu0 %v7668_v56 }
 0x2ee   :  { %vm2761_vm14 = vcmp.ge.f32.partialorder %v2683_v35, 0.0  ;;  %v2801_v15 = vmul.f32 0.01, %v2683_v35  ;;  %v7227_v50 = vsel %vm2760_vm13, %v2680_v55, %v2800_v13  ;;  %v5695_v13 = vld [vmem:[%s7581_s4 + $0x110] sm:$0xff]  }
 0x2ef   :  { %v2494_v38 = vpop.f32.mrb[172].mxu1 }
 0x2f0   :  { %v7229_v47 = vsel %vm2761_vm14, %v2683_v35, %v2801_v15  ;;  %v5376_v16 = vadd.f32 %v6959_v57, %v2494_v38  ;;  %5179 = vmatpush3.bf16.msra.mxu0 %v5690_v45  ;;  %v2496_v31 = vpop.f32.mrb[173].mxu1 }
 0x2f1   :  { %v2867_v48 = vpack.c.bf16 %v7229_v47, %v7227_v50  ;;  %v2497_v26 = vpop.f32.mrb[174].mxu1  ;;  %5180 = vmatprep.subr.bf16.mxu0 %v7668_v56  ;;  %v5720_v50 = vld [vmem:[%s7581_s4 + $0x1d8] sm:$0xff]   ;;  %v5721_v47 = vld [vmem:[%s7581_s4 + $0x1e0] sm:$0xff]  }
 0x2f2   :  { %v5377_v19 = vadd.f32 %v6959_v57, %v2497_v26  ;;  %v2688_v3 = vadd.f32 %v5376_v16, %v6950_v39  ;;  %v2499_v18 = vpop.f32.mrb[175].mxu1  ;;  %v5696_v26 = vld [vmem:[%s7581_s4 + $0x118] sm:$0xff]  }
 0x2f4   :  { %v2802_v33 = vmul.f32 0.01, %v2688_v3  ;;  %v2691_v62 = vadd.f32 %v5377_v19, %v6954_v22  ;;  %5181 = vmatpush3.bf16.msra.mxu0 %v5691_v42  ;;  %vm2762_vm1 = vcmp.ge.f32.partialorder %v2688_v3, 0.0  ;;  %v5693_v22 = vld [vmem:[%s7581_s4 + $0x100] sm:$0xff]  }
 0x2f5   :  { %5182 = vmatprep.subr.bf16.mxu0 %v7668_v56 }
 0x2f6   :  { %vm2763_vm2 = vcmp.ge.f32.partialorder %v2691_v62, 0.0  ;;  %v2803_v29 = vmul.f32 0.01, %v2691_v62  ;;  %v7245_v20 = vsel %vm2762_vm1, %v2688_v3, %v2802_v33 }
 0x2f7   :  { %v2502_v43 = vpop.f32.mrb[176].mxu1 }
 0x2f8   :  { %v7247_v9 = vsel %vm2763_vm2, %v2691_v62, %v2803_v29  ;;  %v5378_v39 = vadd.f32 %v6959_v57, %v2502_v43  ;;  %5183 = vmatpush3.bf16.msra.mxu0 %v5692_v14  ;;  %v2504_v27 = vpop.f32.mrb[177].mxu1 }
 0x2f9   :  { %v2868_v46 = vpack.c.bf16 %v7247_v9, %v7245_v20  ;;  %v2505_v53 = vpop.f32.mrb[178].mxu1  ;;  %5188 = vmatprep.subr.bf16.mxu0 %v7668_v56  ;;  %v5724_v20 = vld [vmem:[%s7581_s4 + $0x1f8] sm:$0xff]   ;;  %v5725_v9 = vld [vmem:[%s7581_s4 + $0x200] sm:$0xff]  }
 0x2fa   :  { %v2696_v10 = vadd.f32 %v5378_v39, %v6948_v36  ;;  %v5379_v24 = vadd.f32 %v6959_v57, %v2505_v53  ;;  %v2507_v17 = vpop.f32.mrb[179].mxu1 }
 0x2fb   :  { %5185 = vmatmul.mubr.msk.bf16.vlgmr.msra.gmra.mrb[124].mxu0 %vm2094_vm0, %v2861_v63  ;;  %v5699_v17 = vld [vmem:[%s7581_s4 + $0x130] sm:$0xff]  }
 0x2fc   :  { %v2804_v40 = vmul.f32 0.01, %v2696_v10  ;;  %v2699_v55 = vadd.f32 %v5379_v24, %v6952_v44  ;;  %5189 = vmatpush3.bf16.msra.mxu0 %v5693_v22  ;;  %5196 = vmatprep.mubr.msk.bf16.mxu0 %vm5743_vm15, %v7668_v56  ;;  %vm2764_vm3 = vcmp.ge.f32.partialorder %v2696_v10, 0.0 }
 0x2fd   :  { %5190 = vmatprep.subr.bf16.mxu0 %v7668_v56 }
 0x2fe   :  { %vm2765_vm4 = vcmp.ge.f32.partialorder %v2699_v55, 0.0  ;;  %v2805_v36 = vmul.f32 0.01, %v2699_v55  ;;  %v7269_v54 = vsel %vm2764_vm3, %v2696_v10, %v2804_v40  ;;  %v5698_v10 = vld [vmem:[%s7581_s4 + $0x128] sm:$0xff]  }
 0x2ff   :  { %v2510_v7 = vpop.f32.mrb[180].mxu1 }
 0x300   :  { %v7271_v30 = vsel %vm2765_vm4, %v2699_v55, %v2805_v36  ;;  %v5380_v44 = vadd.f32 %v6959_v57, %v2510_v7  ;;  %5191 = vmatpush3.bf16.msra.mxu0 %v5694_v52  ;;  %v2512_v63 = vpop.f32.mrb[181].mxu1 }
 0x301   :  { %v2869_v35 = vpack.c.bf16 %v7271_v30, %v7269_v54  ;;  %v2513_v45 = vpop.f32.mrb[182].mxu1  ;;  %5192 = vmatprep.subr.bf16.mxu0 %v7668_v56  ;;  %v5728_v54 = vld [vmem:[%s7581_s4 + $0x218] sm:$0xff]   ;;  %v5729_v30 = vld [vmem:[%s7581_s4 + $0x220] sm:$0xff]  }
 0x302   :  { %v5381_v15 = vadd.f32 %v6959_v57, %v2513_v45  ;;  %v2704_v38 = vadd.f32 %v5380_v44, %v6965_v25  ;;  %v2515_v16 = vpop.f32.mrb[183].mxu1 }
 0x304   :  { %v2806_v31 = vmul.f32 0.01, %v2704_v38  ;;  %v2707_v42 = vadd.f32 %v5381_v15, %v6969_v61  ;;  %5193 = vmatpush3.bf16.msra.mxu0 %v5695_v13  ;;  %vm2766_vm5 = vcmp.ge.f32.partialorder %v2704_v38, 0.0  ;;  %v5697_v61 = vld [vmem:[%s7581_s4 + $0x120] sm:$0xff]   ;;  %v5700_v13 = vld [vmem:[%s7581_s4 + $0x138] sm:$0xff]  }
 0x305   :  { %5194 = vmatprep.subr.bf16.mxu0 %v7668_v56 }
 0x306   :  { %vm2767_vm6 = vcmp.ge.f32.partialorder %v2707_v42, 0.0  ;;  %v2807_v19 = vmul.f32 0.01, %v2707_v42  ;;  %v7287_v18 = vsel %vm2766_vm5, %v2704_v38, %v2806_v31 }
 0x307   :  { %v2518_v3 = vpop.f32.mrb[184].mxu1 }
 0x308   :  { %v7289_v33 = vsel %vm2767_vm6, %v2707_v42, %v2807_v19  ;;  %v5382_v25 = vadd.f32 %v6959_v57, %v2518_v3  ;;  %5195 = vmatpush3.bf16.msra.mxu0 %v5696_v26  ;;  %v2520_v62 = vpop.f32.mrb[185].mxu1 }
 0x309   :  { %v2870_v14 = vpack.c.bf16 %v7289_v33, %v7287_v18  ;;  %v2521_v29 = vpop.f32.mrb[186].mxu1  ;;  %5200 = vmatprep.subr.bf16.mxu0 %v7668_v56  ;;  %v5732_v18 = vld [vmem:[%s7581_s4 + $0x238] sm:$0xff]   ;;  %v5733_v33 = vld [vmem:[%s7581_s4 + $0x240] sm:$0xff]  }
 0x30a   :  { %v2712_v43 = vadd.f32 %v5382_v25, %v6962_v60  ;;  %v5383_v39 = vadd.f32 %v6959_v57, %v2521_v29  ;;  %v2523_v27 = vpop.f32.mrb[187].mxu1  ;;  %v5702_v29 = vld [vmem:[%s7581_s4 + $0x148] sm:$0xff]  }
 0x30b   :  { %5197 = vmatmul.mubr.msk.bf16.vlgmr.msra.gmra.mrb[124].mxu0 %vm2094_vm0, %v2862_v4  ;;  %v5707_v27 = vld [vmem:[%s7581_s4 + $0x170] sm:$0xff]  }
 0x30c   :  { %v2808_v22 = vmul.f32 0.01, %v2712_v43  ;;  %v2715_v53 = vadd.f32 %v5383_v39, %v6967_v28  ;;  %5201 = vmatpush3.bf16.msra.mxu0 %v5697_v61  ;;  %5208 = vmatprep.mubr.msk.bf16.mxu0 %vm5743_vm15, %v7668_v56  ;;  %vm2768_vm7 = vcmp.ge.f32.partialorder %v2712_v43, 0.0  ;;  %v5706_v39 = vld [vmem:[%s7581_s4 + $0x168] sm:$0xff]  }
 0x30d   :  { %5202 = vmatprep.subr.bf16.mxu0 %v7668_v56 }
 0x30e   :  { %vm2769_vm8 = vcmp.ge.f32.partialorder %v2715_v53, 0.0  ;;  %v2809_v60 = vmul.f32 0.01, %v2715_v53  ;;  %v7311_v5 = vsel %vm2768_vm7, %v2712_v43, %v2808_v22  ;;  %v5705_v43 = vld [vmem:[%s7581_s4 + $0x160] sm:$0xff]   ;;  %v5711_v22 = vld [vmem:[%s7581_s4 + $0x190] sm:$0xff]  }
 0x30f   :  { %v2526_v24 = vpop.f32.mrb[188].mxu1 }
 0x310   :  { %v7313_v0 = vsel %vm2769_vm8, %v2715_v53, %v2809_v60  ;;  %v5384_v28 = vadd.f32 %v6959_v57, %v2526_v24  ;;  %5203 = vmatpush3.bf16.msra.mxu0 %v5698_v10  ;;  %v2528_v4 = vpop.f32.mrb[189].mxu1  ;;  %v5715_v53 = vld [vmem:[%s7581_s4 + $0x1b0] sm:$0xff]  }
 0x311   :  { %v2871_v40 = vpack.c.bf16 %v7313_v0, %v7311_v5  ;;  %v2529_v55 = vpop.f32.mrb[190].mxu1  ;;  %5204 = vmatprep.subr.bf16.mxu0 %v7668_v56  ;;  %v5719_v10 = vld [vmem:[%s7581_s4 + $0x1d0] sm:$0xff]   ;;  %v5736_v5 = vld [vmem:[%s7581_s4 + $0x258] sm:$0xff]   ;;  %v5737_v0 = vld [vmem:[%s7581_s4 + $0x260] sm:$0xff]  }
 0x312   :  { %v5385_v52 = vadd.f32 %v6959_v57, %v2529_v55  ;;  %v2720_v36 = vadd.f32 %v5384_v28, %v6994_v23  ;;  %v2531_v7 = vpop.f32.mrb[191].mxu1  ;;  %v5723_v60 = vld [vmem:[%s7581_s4 + $0x1f0] sm:$0xff]   ;;  %v5740_v55 = vld [vmem:[%s7581_s4 + $0x278] sm:$0xff]  }
 0x313   :  { %v5727_v24 = vld [vmem:[%s7581_s4 + $0x210] sm:$0xff]  }
 0x314   :  { %v2810_v44 = vmul.f32 0.01, %v2720_v36  ;;  %v2723_v63 = vadd.f32 %v5385_v52, %v7002_v58  ;;  %5205 = vmatpush3.bf16.msra.mxu0 %v5699_v17  ;;  %vm2770_vm9 = vcmp.ge.f32.partialorder %v2720_v36, 0.0  ;;  %v5701_v58 = vld [vmem:[%s7581_s4 + $0x140] sm:$0xff]   ;;  %v5731_v28 = vld [vmem:[%s7581_s4 + $0x230] sm:$0xff]   ;;  %v5738_v17 = vld [vmem:[%s7581_s4 + $0x268] sm:$0xff]  }
 0x315   :  { %5206 = vmatprep.subr.bf16.mxu0 %v7668_v56  ;;  %v5735_v4 = vld [vmem:[%s7581_s4 + $0x250] sm:$0xff]   ;;  %v4583_v52 = vld [vmem:[%s7583_s5] ss:$0 sm:$0xff] }
 0x316   :  { %vm2771_vm10 = vcmp.ge.f32.partialorder %v2723_v63, 0.0  ;;  %v2811_v45 = vmul.f32 0.01, %v2723_v63  ;;  %v7329_v38 = vsel %vm2770_vm9, %v2720_v36, %v2810_v44 }
 0x317   :  { %v2534_v15 = vpop.f32.mrb[192].mxu1 }
 0x318   :  { %v7331_v16 = vsel %vm2771_vm10, %v2723_v63, %v2811_v45  ;;  %v5386_v23 = vadd.f32 %v6959_v57, %v2534_v15  ;;  %5207 = vmatpush3.bf16.msra.mxu0 %v5700_v13  ;;  %v2536_v31 = vpop.f32.mrb[193].mxu1 }
 0x319   :  { %v2872_v42 = vpack.c.bf16 %v7331_v16, %v7329_v38  ;;  %v2537_v26 = vpop.f32.mrb[194].mxu1  ;;  %5212 = vmatprep.subr.bf16.mxu0 %v7668_v56 }
 0x31a   :  { %v2728_v19 = vadd.f32 %v5386_v23, %v6990_v2  ;;  %v5387_v3 = vadd.f32 %v6959_v57, %v2537_v26  ;;  %v2539_v25 = vpop.f32.mrb[195].mxu1 }
 0x31b   :  { %5209 = vmatmul.mubr.msk.bf16.vlgmr.msra.gmra.mrb[124].mxu0 %vm2094_vm0, %v2863_v6  ;;  %v5704_v6 = vld [vmem:[%s7581_s4 + $0x158] sm:$0xff]  }
 0x31c   :  { %v2812_v62 = vmul.f32 0.01, %v2728_v19  ;;  %v2731_v61 = vadd.f32 %v5387_v3, %v6996_v12  ;;  %5213 = vmatpush3.bf16.msra.mxu0 %v5701_v58  ;;  %5220 = vmatprep.mubr.msk.bf16.mxu0 %vm5743_vm15, %v7668_v56  ;;  %vm2772_vm11 = vcmp.ge.f32.partialorder %v2728_v19, 0.0  ;;  %v5703_v12 = vld [vmem:[%s7581_s4 + $0x150] sm:$0xff]  }
 0x31d   :  { %5214 = vmatprep.subr.bf16.mxu0 %v7668_v56 }
 0x31e   :  { %vm2773_vm12 = vcmp.ge.f32.partialorder %v2731_v61, 0.0  ;;  %v2813_v57 = vmul.f32 0.01, %v2731_v61  ;;  %v7353_v2 = vsel %vm2772_vm11, %v2728_v19, %v2812_v62 }
 0x320   :  { %v7355_v51 = vsel %vm2773_vm12, %v2731_v61, %v2813_v57  ;;  %5215 = vmatpush3.bf16.msra.mxu0 %v5702_v29 }
 0x321   :  { %v2873_v21 = vpack.c.bf16 %v7355_v51, %v7353_v2  ;;  %5216 = vmatprep.subr.bf16.mxu0 %v7668_v56 }
 0x324   :  { %5217 = vmatpush3.bf16.msra.mxu0 %v5703_v12 }
 0x325   :  { %5218 = vmatprep.subr.bf16.mxu0 %v7668_v56 }
 0x328   :  { %5219 = vmatpush3.bf16.msra.mxu0 %v5704_v6 }
 0x329   :  { %5224 = vmatprep.subr.bf16.mxu0 %v7668_v56 }
 0x32b   :  { %5221 = vmatmul.mubr.msk.bf16.vlgmr.msra.gmra.mrb[124].mxu0 %vm2094_vm0, %v2864_v49  ;;  %v5710_v49 = vld [vmem:[%s7581_s4 + $0x188] sm:$0xff]  }
 0x32c   :  { %5225 = vmatpush3.bf16.msra.mxu0 %v5705_v43  ;;  %5232 = vmatprep.mubr.msk.bf16.mxu0 %vm5743_vm15, %v7668_v56 }
 0x32d   :  { %5226 = vmatprep.subr.bf16.mxu0 %v7668_v56 }
 0x330   :  { %5227 = vmatpush3.bf16.msra.mxu0 %v5706_v39 }
 0x331   :  { %5228 = vmatprep.subr.bf16.mxu0 %v7668_v56 }
 0x334   :  { %5229 = vmatpush3.bf16.msra.mxu0 %v5707_v27 }
 0x335   :  { %5230 = vmatprep.subr.bf16.mxu0 %v7668_v56 }
 0x338   :  { %5231 = vmatpush3.bf16.msra.mxu0 %v5708_v32 }
 0x339   :  { %5236 = vmatprep.subr.bf16.mxu0 %v7668_v56 }
 0x33b   :  { %5233 = vmatmul.mubr.msk.bf16.vlgmr.msra.gmra.mrb[124].mxu0 %vm2094_vm0, %v2865_v41  ;;  %v5714_v41 = vld [vmem:[%s7581_s4 + $0x1a8] sm:$0xff]  }
 0x33c   :  { %5237 = vmatpush3.bf16.msra.mxu0 %v5709_v8  ;;  %5244 = vmatprep.mubr.msk.bf16.mxu0 %vm5743_vm15, %v7668_v56 }
 0x33d   :  { %5238 = vmatprep.subr.bf16.mxu0 %v7668_v56 }
 0x340   :  { %5239 = vmatpush3.bf16.msra.mxu0 %v5710_v49 }
 0x341   :  { %5240 = vmatprep.subr.bf16.mxu0 %v7668_v56 }
 0x344   :  { %5241 = vmatpush3.bf16.msra.mxu0 %v5711_v22 }
 0x345   :  { %5242 = vmatprep.subr.bf16.mxu0 %v7668_v56 }
 0x348   :  { %5243 = vmatpush3.bf16.msra.mxu0 %v5712_v37 }
 0x349   :  { %5248 = vmatprep.subr.bf16.mxu0 %v7668_v56 }
 0x34b   :  { %5245 = vmatmul.mubr.msk.bf16.vlgmr.msra.gmra.mrb[124].mxu0 %vm2094_vm0, %v2866_v11  ;;  %v5718_v11 = vld [vmem:[%s7581_s4 + $0x1c8] sm:$0xff]  }
 0x34c   :  { %5249 = vmatpush3.bf16.msra.mxu0 %v5713_v34  ;;  %5256 = vmatprep.mubr.msk.bf16.mxu0 %vm5743_vm15, %v7668_v56 }
 0x34d   :  { %5250 = vmatprep.subr.bf16.mxu0 %v7668_v56 }
 0x350   :  { %5251 = vmatpush3.bf16.msra.mxu0 %v5714_v41 }
 0x351   :  { %5252 = vmatprep.subr.bf16.mxu0 %v7668_v56 }
 0x354   :  { %5253 = vmatpush3.bf16.msra.mxu0 %v5715_v53 }
 0x355   :  { %5254 = vmatprep.subr.bf16.mxu0 %v7668_v56 }
 0x358   :  { %5255 = vmatpush3.bf16.msra.mxu0 %v5716_v59 }
 0x359   :  { %5260 = vmatprep.subr.bf16.mxu0 %v7668_v56 }
 0x35b   :  { %5257 = vmatmul.mubr.msk.bf16.vlgmr.msra.gmra.mrb[124].mxu0 %vm2094_vm0, %v2867_v48  ;;  %v5722_v48 = vld [vmem:[%s7581_s4 + $0x1e8] sm:$0xff]  }
 0x35c   :  { %5261 = vmatpush3.bf16.msra.mxu0 %v5717_v1  ;;  %5268 = vmatprep.mubr.msk.bf16.mxu0 %vm5743_vm15, %v7668_v56 }
 0x35d   :  { %5262 = vmatprep.subr.bf16.mxu0 %v7668_v56 }
 0x360   :  { %5263 = vmatpush3.bf16.msra.mxu0 %v5718_v11 }
 0x361   :  { %5264 = vmatprep.subr.bf16.mxu0 %v7668_v56 }
 0x364   :  { %5265 = vmatpush3.bf16.msra.mxu0 %v5719_v10 }
 0x365   :  { %5266 = vmatprep.subr.bf16.mxu0 %v7668_v56 }
 0x368   :  { %5267 = vmatpush3.bf16.msra.mxu0 %v5720_v50 }
 0x369   :  { %5272 = vmatprep.subr.bf16.mxu0 %v7668_v56 }
 0x36b   :  { %5269 = vmatmul.mubr.msk.bf16.vlgmr.msra.gmra.mrb[124].mxu0 %vm2094_vm0, %v2868_v46  ;;  %v5726_v46 = vld [vmem:[%s7581_s4 + $0x208] sm:$0xff]  }
 0x36c   :  { %5273 = vmatpush3.bf16.msra.mxu0 %v5721_v47  ;;  %5280 = vmatprep.mubr.msk.bf16.mxu0 %vm5743_vm15, %v7668_v56 }
 0x36d   :  { %5274 = vmatprep.subr.bf16.mxu0 %v7668_v56 }
 0x370   :  { %5275 = vmatpush3.bf16.msra.mxu0 %v5722_v48 }
 0x371   :  { %5276 = vmatprep.subr.bf16.mxu0 %v7668_v56 }
 0x374   :  { %5277 = vmatpush3.bf16.msra.mxu0 %v5723_v60 }
 0x375   :  { %5278 = vmatprep.subr.bf16.mxu0 %v7668_v56 }
 0x378   :  { %5279 = vmatpush3.bf16.msra.mxu0 %v5724_v20 }
 0x379   :  { %5284 = vmatprep.subr.bf16.mxu0 %v7668_v56 }
 0x37b   :  { %5281 = vmatmul.mubr.msk.bf16.vlgmr.msra.gmra.mrb[124].mxu0 %vm2094_vm0, %v2869_v35  ;;  %v5730_v35 = vld [vmem:[%s7581_s4 + $0x228] sm:$0xff]  }
 0x37c   :  { %5285 = vmatpush3.bf16.msra.mxu0 %v5725_v9  ;;  %5292 = vmatprep.mubr.msk.bf16.mxu0 %vm5743_vm15, %v7668_v56 }
 0x37d   :  { %5286 = vmatprep.subr.bf16.mxu0 %v7668_v56 }
 0x380   :  { %5287 = vmatpush3.bf16.msra.mxu0 %v5726_v46 }
 0x381   :  { %5288 = vmatprep.subr.bf16.mxu0 %v7668_v56 }
 0x384   :  { %5289 = vmatpush3.bf16.msra.mxu0 %v5727_v24 }
 0x385   :  { %5290 = vmatprep.subr.bf16.mxu0 %v7668_v56 }
 0x388   :  { %5291 = vmatpush3.bf16.msra.mxu0 %v5728_v54 }
 0x389   :  { %5296 = vmatprep.subr.bf16.mxu0 %v7668_v56 }
 0x38b   :  { %5293 = vmatmul.mubr.msk.bf16.vlgmr.msra.gmra.mrb[124].mxu0 %vm2094_vm0, %v2870_v14  ;;  %v5734_v14 = vld [vmem:[%s7581_s4 + $0x248] sm:$0xff]  }
 0x38c   :  { %5297 = vmatpush3.bf16.msra.mxu0 %v5729_v30  ;;  %5304 = vmatprep.mubr.msk.bf16.mxu0 %vm5743_vm15, %v7668_v56 }
 0x38d   :  { %5298 = vmatprep.subr.bf16.mxu0 %v7668_v56 }
 0x390   :  { %5299 = vmatpush3.bf16.msra.mxu0 %v5730_v35 }
 0x391   :  { %5300 = vmatprep.subr.bf16.mxu0 %v7668_v56 }
 0x394   :  { %5301 = vmatpush3.bf16.msra.mxu0 %v5731_v28 }
 0x395   :  { %5302 = vmatprep.subr.bf16.mxu0 %v7668_v56 }
 0x398   :  { %5303 = vmatpush3.bf16.msra.mxu0 %v5732_v18 }
 0x399   :  { %5308 = vmatprep.subr.bf16.mxu0 %v7668_v56 }
 0x39b   :  { %5305 = vmatmul.mubr.msk.bf16.vlgmr.msra.gmra.mrb[124].mxu0 %vm2094_vm0, %v2871_v40  ;;  %v5739_v40 = vld [vmem:[%s7581_s4 + $0x270] sm:$0xff]  }
 0x39c   :  { %5309 = vmatpush3.bf16.msra.mxu0 %v5733_v33  ;;  %5316 = vmatprep.mubr.msk.bf16.mxu0 %vm5743_vm15, %v7668_v56 }
 0x39d   :  { %5310 = vmatprep.subr.bf16.mxu0 %v7668_v56 }
 0x3a0   :  { %5311 = vmatpush3.bf16.msra.mxu0 %v5734_v14 }
 0x3a1   :  { %5312 = vmatprep.subr.bf16.mxu0 %v7668_v56 }
 0x3a4   :  { %5313 = vmatpush3.bf16.msra.mxu0 %v5735_v4 }
 0x3a5   :  { %5314 = vmatprep.subr.bf16.mxu0 %v7668_v56 }
 0x3a8   :  { %5315 = vmatpush3.bf16.msra.mxu0 %v5736_v5 }
 0x3a9   :  { %5320 = vmatprep.subr.bf16.mxu0 %v7668_v56 }
 0x3ab   :  { %5317 = vmatmul.mubr.msk.bf16.vlgmr.msra.gmra.mrb[124].mxu0 %vm2094_vm0, %v2872_v42 }
 0x3ac   :  { %5321 = vmatpush3.bf16.msra.mxu0 %v5737_v0  ;;  %5328 = vmatprep.mubr.msk.bf16.mxu0 %vm5743_vm15, %v7668_v56 }
 0x3ad   :  { %5322 = vmatprep.subr.bf16.mxu0 %v7668_v56 }
 0x3b0   :  { %5323 = vmatpush3.bf16.msra.mxu0 %v5738_v17 }
 0x3b1   :  { %5324 = vmatprep.subr.bf16.mxu0 %v7668_v56 }
 0x3b4   :  { %5325 = vmatpush3.bf16.msra.mxu0 %v5739_v40 }
 0x3b5   :  { %5326 = vmatprep.subr.bf16.mxu0 %v7668_v56 }
 0x3b8   :  { %5327 = vmatpush3.bf16.msra.mxu0 %v5740_v55 }
 0x3bb   :  { %5329 = vmatmul.mubr.msk.bf16.vlgmr.msra.gmra.mrb[124].mxu0 %vm2094_vm0, %v2873_v21 }
 0x48e   :  { %v4451_v36 = vpop.f32.mrb[124].mxu0 }
 0x48f   :  { %v5388_v7 = vadd.f32 %v4583_v52, %v4451_v36  ;;  %v5330_v44 = vpop.f32.mrb[125].mxu0 }
 0x490   :  { %v4454_v63 = vpop.f32.mrb[126].mxu0 }
 0x491   :  { %4460 = vst [vmem:[%s7584_s6] sm:$0xff] %v5388_v7  ;;  %v5389_v13 = vadd.f32 %v4583_v52, %v4454_v63  ;;  %v5331_v56 = vpop.f32.mrb[127].mxu0 }
 0x493   :  { %4461 = vst [vmem:[%s7584_s6 + $0x8] sm:$0xff] %v5389_v13 }

</bundles_post_ra>
